<compile_context>
chip_gen: v5e
topology: v5e:2x2
jax: 0.10.0
libtpu: 0.0.40
codegen_flags: <defaults>
</compile_context>

<pallas_src>
import functools

import jax
import jax.numpy as jnp
from jax.experimental import pallas as pl
from jax.experimental.pallas import tpu as pltpu


# ----------------------------- Pallas kernel --------------------------------
def _conv_bn_relu_kernel(x_ref, w_ref, b_ref, o_ref, *scratch, TH, OW, KH, KW,
                         C, stride, relu6, fold_taps):
    """One (TH, OW, OCp) output tile of conv + BN bias + ReLU.

    x_ref : (Hp, Wp, C)      zero-padded NHWC input (batch squeezed), bf16;
                             resident across all row tiles of this image
    w_ref : (KH*KW*C, OCp)   conv weight with BN scale folded, rows = (kh,kw,c)
    b_ref : (1, OCp)         BN bias (beta - mean*scale), fp32
    o_ref : (TH, OW, OCp)    output tile
    scratch: optional (TH*OW, OCp) fp32 VMEM accumulator (per-tap path only)
    """
    t = pl.program_id(1)
    r0 = pl.multiple_of(t * (TH * stride), TH * stride)   # first input row of tile
    M = TH * OW

    if stride == 1:
        def patch(kh, kw):                                 # (TH*OW, C)
            return x_ref[pl.ds(r0 + kh, TH), kw:kw + OW, :].reshape(M, C)
    else:
        def patch(kh, kw):
            rows = [x_ref[r0 + i * stride + kh, pl.ds(kw, OW, stride=stride), :]
                    for i in range(TH)]                    # TH x (OW, C)
            return jnp.stack(rows, axis=0).reshape(M, C)

    bias = b_ref[...]                                      # (1, OCp) fp32

    if fold_taps:
        # Single MXU dot with K = KH*KW*C (fills the contraction for small C).
        cols = [patch(kh, kw) for kh in range(KH) for kw in range(KW)]
        lhs = cols[0] if len(cols) == 1 else jnp.concatenate(cols, axis=-1)
        acc = jnp.dot(lhs, w_ref[...], preferred_element_type=jnp.float32)
    else:
        # Per-tap dots (K = C) accumulated into a VMEM fp32 scratch; weight
        # taps are re-read from VMEM per tap (vld hides under MXU, no hoist).
        acc_ref = scratch[0]
        acc_ref[...] = jnp.zeros_like(acc_ref)
        for kh in range(KH):
            for kw in range(KW):
                k0 = (kh * KW + kw) * C
                acc_ref[...] += jnp.dot(patch(kh, kw), w_ref[k0:k0 + C, :],
                                        preferred_element_type=jnp.float32)
        acc = acc_ref[...]

    y = acc + bias                                         # fp32 epilogue
    y = jnp.maximum(y, 0.0)                                # ReLU
    if relu6:
        y = jnp.minimum(y, 6.0)
    o_ref[...] = y.reshape(o_ref.shape).astype(o_ref.dtype)


# ------------------------------ wrapper --------------------------------------
def conv_bn_relu(x_nchw, conv_w, gamma, beta, running_mean, running_var, *,
                 stride=1, padding=0, dilation=1, groups=1, relu6=False,
                 eps=1e-5, compute_dtype=jnp.bfloat16, out_layout="NCHW",
                 out_dtype=None, fold_taps=None, row_tile=None):
    """Conv2d(bias=False) + BatchNorm2d (eval, running stats) + ReLU/ReLU6.

    x_nchw : (N, C, H, W) fp32,  conv_w : (OC, IC, KH, KW) fp32 (PyTorch layouts).
    out_layout="NHWC" (default bf16 out_dtype) returns the kernel's native
    NHWC output without the NCHW transpose, for chaining into the next conv.
    """
    # TODO(synk): grouped / dilated convolutions are not implemented in the
    # Pallas path (module defaults are groups=1, dilation=1).
    if dilation != 1 or groups != 1:
        raise NotImplementedError("dilation/groups != 1 not supported")

    N, C, H, W = x_nchw.shape
    OC, IC, KH, KW = conv_w.shape
    assert IC == C

    OH = (H + 2 * padding - KH) // stride + 1
    OW = (W + 2 * padding - KW) // stride + 1

    # Lane-dense OC only when padding overhead is small (narrow layers keep OC
    # and accept masked stores instead of inflating weights/writeback 4-16x).
    OCp = OC if (OC < 64 or OC % 128 == 0) else ((OC + 127) // 128) * 128

    # Row tile: enough output rows that the MXU M dim (TH*OW) is >= ~512.
    if row_tile is None:
        TH = max(1, min(OH, -(-512 // OW)))
    else:
        TH = max(1, min(OH, row_tile))
    T = -(-OH // TH)                      # number of row tiles
    OHp = T * TH                          # padded output rows (sliced below)

    if fold_taps is None:
        fold_taps = (KH * KW * C <= 256)

    if out_dtype is None:
        out_dtype = jnp.bfloat16 if out_layout == "NHWC" else x_nchw.dtype

    # Padded input: conv padding + extra bottom rows so the last row tile's
    # reads stay in bounds (those rows only feed sliced-off output rows).
    rows_needed = stride * (OHp - 1) + KH
    pad_top = padding
    pad_bot = max(padding, rows_needed - H - padding)
    Hp = H + pad_top + pad_bot
    Wp = W + 2 * padding

    x = jnp.transpose(x_nchw, (0, 2, 3, 1))                       # NHWC
    x = jnp.pad(x, ((0, 0), (pad_top, pad_bot), (padding, padding), (0, 0)))
    x = x.astype(compute_dtype)                                   # bf16 to MXU

    # Fold BN scale into the conv weight once; rows ordered (kh, kw, c).
    scale = gamma / jnp.sqrt(running_var + eps)                   # (OC,)
    bias = beta - running_mean * scale                            # (OC,)
    w = jnp.transpose(conv_w, (2, 3, 1, 0)) * scale               # (KH,KW,C,OC)
    w = w.reshape(KH * KW * C, OC)
    w = jnp.pad(w, ((0, 0), (0, OCp - OC))).astype(compute_dtype)
    b = jnp.pad(bias, (0, OCp - OC)).reshape(1, OCp).astype(jnp.float32)

    kernel = functools.partial(_conv_bn_relu_kernel, TH=TH, OW=OW, KH=KH,
                               KW=KW, C=C, stride=stride, relu6=relu6,
                               fold_taps=fold_taps)

    scratch_shapes = ([] if fold_taps
                      else [pltpu.VMEM((TH * OW, OCp), jnp.float32)])

    out_isz = jnp.dtype(out_dtype).itemsize
    vmem_est = (2 * Hp * Wp * C * 2 + 2 * KH * KW * C * OCp * 2 + 2 * OCp * 4
                + 2 * TH * OW * OCp * out_isz
                + (0 if fold_taps else TH * OW * OCp * 4))
    vmem_limit = int(min(max(4 * vmem_est, 32 * 1024 * 1024),
                         64 * 1024 * 1024))

    out = pl.pallas_call(
        kernel,
        out_shape=jax.ShapeDtypeStruct((N, OHp, OW, OCp), out_dtype),
        grid_spec=pltpu.PrefetchScalarGridSpec(
            num_scalar_prefetch=0,
            grid=(N, T),  # N*T parallel blocks -> v7x uses both TCs at batch 1
            in_specs=[
                # Whole padded image stays resident across the row-tile axis
                # (index_map constant in t -> one input DMA per batch element).
                pl.BlockSpec((None, Hp, Wp, C), lambda n, t: (n, 0, 0, 0)),
                pl.BlockSpec((KH * KW * C, OCp), lambda n, t: (0, 0)),
                pl.BlockSpec((1, OCp), lambda n, t: (0, 0)),
            ],
            out_specs=pl.BlockSpec((None, TH, OW, OCp),
                                   lambda n, t: (n, t, 0, 0)),
            scratch_shapes=scratch_shapes,
        ),
        compiler_params=pltpu.CompilerParams(
            dimension_semantics=("parallel", "parallel"),
            vmem_limit_bytes=vmem_limit,
        ),
    )(x, w, b)

    out = out[:, :OH, :, :OC]             # drop row-tile / OC padding
    if out_layout == "NHWC":
        return out
    return jnp.transpose(out, (0, 3, 1, 2))   # NHWC -> NCHW (PyTorch layout)


# ------------------------------ reference ------------------------------------
def _reference(x_nchw, conv_w, gamma, beta, running_mean, running_var, *,
               stride=1, padding=0, eps=1e-5, relu6=False):
    y = jax.lax.conv_general_dilated(
        x_nchw, conv_w,
        window_strides=(stride, stride),
        padding=((padding, padding), (padding, padding)),
        dimension_numbers=("NCHW", "OIHW", "NCHW"),
    )
    s = (gamma / jnp.sqrt(running_var + eps)).reshape(1, -1, 1, 1)
    b = (beta - running_mean * gamma / jnp.sqrt(running_var + eps)).reshape(1, -1, 1, 1)
    y = jnp.maximum(y * s + b, 0.0)
    if relu6:
        y = jnp.minimum(y, 6.0)
    return y


if __name__ == "__main__":
    # module config: _ConvBNReLU(in_channels=4, out_channels=8, kernel_size=3,
    #                            stride=1, padding=1)   (relu6=False -> ReLU)
    N, C, H, W = 2, 4, 16, 16
    OC, KH, KW = 8, 3, 3

    key = jax.random.PRNGKey(0)
    kx, kw_, kg, kb, km, kv = jax.random.split(key, 6)

    x = jax.random.normal(kx, (N, C, H, W), dtype=jnp.float32)
    conv_w = jax.random.normal(kw_, (OC, C, KH, KW), dtype=jnp.float32) * 0.1
    gamma = jax.random.normal(kg, (OC,), dtype=jnp.float32) * 0.1 + 1.0
    beta = jax.random.normal(kb, (OC,), dtype=jnp.float32) * 0.1
    running_mean = jax.random.normal(km, (OC,), dtype=jnp.float32) * 0.1
    running_var = jax.random.uniform(kv, (OC,), dtype=jnp.float32,
                                     minval=0.5, maxval=1.5)

    ref = _reference(x, conv_w, gamma, beta, running_mean, running_var,
                     stride=1, padding=1)

    # 1) drop-in path (NCHW fp32), small-C folded-K dot (one dot per row tile).
    out = conv_bn_relu(x, conv_w, gamma, beta, running_mean, running_var,
                       stride=1, padding=1)
    out = jax.block_until_ready(out)
    assert out.shape == (N, OC, H, W)
    # bf16 MXU operands (fp32 accumulation) -> loosened tolerance vs fp32 ref.
    assert jnp.allclose(out, ref, atol=5e-2, rtol=5e-2)

    # 2) per-tap VMEM-accumulator path (used for large-C layers) agrees too.
    out2 = conv_bn_relu(x, conv_w, gamma, beta, running_mean, running_var,
                        stride=1, padding=1, fold_taps=False)
    out2 = jax.block_until_ready(out2)
    assert jnp.allclose(out2, ref, atol=5e-2, rtol=5e-2)

    # 3) NHWC bf16 output for chaining into the next _ConvBNReLU (no transpose
    #    glue, half the HBM writeback).
    out3 = conv_bn_relu(x, conv_w, gamma, beta, running_mean, running_var,
                        stride=1, padding=1, out_layout="NHWC")
    out3 = jax.block_until_ready(out3)
    assert out3.shape == (N, H, W, OC) and out3.dtype == jnp.bfloat16
    assert jnp.allclose(jnp.transpose(out3.astype(jnp.float32), (0, 3, 1, 2)),
                        ref, atol=1e-1, rtol=1e-1)

    print("KERNEL_OK")
</pallas_src>

<mosaic_0001>
module attributes {stable_mosaic.version = 11 : i64} {
  func.func @_conv_bn_relu_kernel(%arg0: i32, %arg1: i32, %arg2: memref<1x18x18x4xbf16, #tpu.memory_space<vmem>>, %arg3: memref<36x8xbf16, #tpu.memory_space<vmem>>, %arg4: memref<1x8xf32, #tpu.memory_space<vmem>>, %arg5: memref<1x16x16x8xf32, #tpu.memory_space<vmem>>) attributes {dimension_semantics = [#tpu.dimension_semantics<parallel>, #tpu.dimension_semantics<parallel>], iteration_bounds = array<i64: 2, 1>, scalar_prefetch = 0 : i64, scratch_operands = 0 : i64, tpu.core_type = #tpu.core_type<tc>, window_params = [{transform_indices = @transform_0, window_bounds = array<i64: 1, 18, 18, 4>}, {pipeline_mode = #tpu.pipeline_mode<synchronous>, transform_indices = @transform_1, window_bounds = array<i64: 36, 8>}, {pipeline_mode = #tpu.pipeline_mode<synchronous>, transform_indices = @transform_2, window_bounds = array<i64: 1, 8>}, {transform_indices = @transform_3, window_bounds = array<i64: 1, 16, 16, 8>}]} {
    %c16_i32 = arith.constant 16 : i32
    %0 = arith.muli %arg1, %c16_i32 : i32
    %1 = tpu.assume_multiple %0, 16 : i32
    %c0 = arith.constant 0 : index
    %c0_0 = arith.constant 0 : index
    %2 = vector.load %arg4[%c0, %c0_0] : memref<1x8xf32, #tpu.memory_space<vmem>>, vector<1x8xf32>
    %c0_i32 = arith.constant 0 : i32
    %3 = arith.addi %1, %c0_i32 : i32
    %c0_1 = arith.constant 0 : index
    %4 = arith.index_cast %3 : i32 to index
    %c0_2 = arith.constant 0 : index
    %c0_3 = arith.constant 0 : index
    %5 = vector.load %arg2[%c0_1, %4, %c0_2, %c0_3] : memref<1x18x18x4xbf16, #tpu.memory_space<vmem>>, vector<1x16x16x4xbf16>
    %6 = vector.shape_cast %5 : vector<1x16x16x4xbf16> to vector<16x16x4xbf16>
    %7 = vector.shape_cast %6 : vector<16x16x4xbf16> to vector<256x4xbf16>
    %c0_i32_4 = arith.constant 0 : i32
    %8 = arith.addi %1, %c0_i32_4 : i32
    %c0_5 = arith.constant 0 : index
    %9 = arith.index_cast %8 : i32 to index
    %c1 = arith.constant 1 : index
    %c0_6 = arith.constant 0 : index
    %10 = vector.load %arg2[%c0_5, %9, %c1, %c0_6] : memref<1x18x18x4xbf16, #tpu.memory_space<vmem>>, vector<1x16x16x4xbf16>
    %11 = vector.shape_cast %10 : vector<1x16x16x4xbf16> to vector<16x16x4xbf16>
    %12 = vector.shape_cast %11 : vector<16x16x4xbf16> to vector<256x4xbf16>
    %c0_i32_7 = arith.constant 0 : i32
    %13 = arith.addi %1, %c0_i32_7 : i32
    %c0_8 = arith.constant 0 : index
    %14 = arith.index_cast %13 : i32 to index
    %c2 = arith.constant 2 : index
    %c0_9 = arith.constant 0 : index
    %15 = vector.load %arg2[%c0_8, %14, %c2, %c0_9] : memref<1x18x18x4xbf16, #tpu.memory_space<vmem>>, vector<1x16x16x4xbf16>
    %16 = vector.shape_cast %15 : vector<1x16x16x4xbf16> to vector<16x16x4xbf16>
    %17 = vector.shape_cast %16 : vector<16x16x4xbf16> to vector<256x4xbf16>
    %c1_i32 = arith.constant 1 : i32
    %18 = arith.addi %1, %c1_i32 : i32
    %c0_10 = arith.constant 0 : index
    %19 = arith.index_cast %18 : i32 to index
    %c0_11 = arith.constant 0 : index
    %c0_12 = arith.constant 0 : index
    %20 = vector.load %arg2[%c0_10, %19, %c0_11, %c0_12] : memref<1x18x18x4xbf16, #tpu.memory_space<vmem>>, vector<1x16x16x4xbf16>
    %21 = vector.shape_cast %20 : vector<1x16x16x4xbf16> to vector<16x16x4xbf16>
    %22 = vector.shape_cast %21 : vector<16x16x4xbf16> to vector<256x4xbf16>
    %c1_i32_13 = arith.constant 1 : i32
    %23 = arith.addi %1, %c1_i32_13 : i32
    %c0_14 = arith.constant 0 : index
    %24 = arith.index_cast %23 : i32 to index
    %c1_15 = arith.constant 1 : index
    %c0_16 = arith.constant 0 : index
    %25 = vector.load %arg2[%c0_14, %24, %c1_15, %c0_16] : memref<1x18x18x4xbf16, #tpu.memory_space<vmem>>, vector<1x16x16x4xbf16>
    %26 = vector.shape_cast %25 : vector<1x16x16x4xbf16> to vector<16x16x4xbf16>
    %27 = vector.shape_cast %26 : vector<16x16x4xbf16> to vector<256x4xbf16>
    %c1_i32_17 = arith.constant 1 : i32
    %28 = arith.addi %1, %c1_i32_17 : i32
    %c0_18 = arith.constant 0 : index
    %29 = arith.index_cast %28 : i32 to index
    %c2_19 = arith.constant 2 : index
    %c0_20 = arith.constant 0 : index
    %30 = vector.load %arg2[%c0_18, %29, %c2_19, %c0_20] : memref<1x18x18x4xbf16, #tpu.memory_space<vmem>>, vector<1x16x16x4xbf16>
    %31 = vector.shape_cast %30 : vector<1x16x16x4xbf16> to vector<16x16x4xbf16>
    %32 = vector.shape_cast %31 : vector<16x16x4xbf16> to vector<256x4xbf16>
    %c2_i32 = arith.constant 2 : i32
    %33 = arith.addi %1, %c2_i32 : i32
    %c0_21 = arith.constant 0 : index
    %34 = arith.index_cast %33 : i32 to index
    %c0_22 = arith.constant 0 : index
    %c0_23 = arith.constant 0 : index
    %35 = vector.load %arg2[%c0_21, %34, %c0_22, %c0_23] : memref<1x18x18x4xbf16, #tpu.memory_space<vmem>>, vector<1x16x16x4xbf16>
    %36 = vector.shape_cast %35 : vector<1x16x16x4xbf16> to vector<16x16x4xbf16>
    %37 = vector.shape_cast %36 : vector<16x16x4xbf16> to vector<256x4xbf16>
    %c2_i32_24 = arith.constant 2 : i32
    %38 = arith.addi %1, %c2_i32_24 : i32
    %c0_25 = arith.constant 0 : index
    %39 = arith.index_cast %38 : i32 to index
    %c1_26 = arith.constant 1 : index
    %c0_27 = arith.constant 0 : index
    %40 = vector.load %arg2[%c0_25, %39, %c1_26, %c0_27] : memref<1x18x18x4xbf16, #tpu.memory_space<vmem>>, vector<1x16x16x4xbf16>
    %41 = vector.shape_cast %40 : vector<1x16x16x4xbf16> to vector<16x16x4xbf16>
    %42 = vector.shape_cast %41 : vector<16x16x4xbf16> to vector<256x4xbf16>
    %c2_i32_28 = arith.constant 2 : i32
    %43 = arith.addi %1, %c2_i32_28 : i32
    %c0_29 = arith.constant 0 : index
    %44 = arith.index_cast %43 : i32 to index
    %c2_30 = arith.constant 2 : index
    %c0_31 = arith.constant 0 : index
    %45 = vector.load %arg2[%c0_29, %44, %c2_30, %c0_31] : memref<1x18x18x4xbf16, #tpu.memory_space<vmem>>, vector<1x16x16x4xbf16>
    %46 = vector.shape_cast %45 : vector<1x16x16x4xbf16> to vector<16x16x4xbf16>
    %47 = vector.shape_cast %46 : vector<16x16x4xbf16> to vector<256x4xbf16>
    %48 = tpu.concatenate %7, %12, %17, %22, %27, %32, %37, %42, %47 in 1 : vector<256x4xbf16>, vector<256x4xbf16>, vector<256x4xbf16>, vector<256x4xbf16>, vector<256x4xbf16>, vector<256x4xbf16>, vector<256x4xbf16>, vector<256x4xbf16>, vector<256x4xbf16> -> vector<256x36xbf16>
    %c0_32 = arith.constant 0 : index
    %c0_33 = arith.constant 0 : index
    %49 = vector.load %arg3[%c0_32, %c0_33] : memref<36x8xbf16, #tpu.memory_space<vmem>>, vector<36x8xbf16>
    %cst = arith.constant dense<0.000000e+00> : vector<256x8xf32>
    %50 = tpu.matmul %48, %49, %cst {dimension_numbers = #tpu.dot_dimension_numbers<[1], [0], [0], [1], [0, 0, 1, 1], [], []>} : vector<256x36xbf16>, vector<36x8xbf16>, vector<256x8xf32> -> vector<256x8xf32>
    %51 = vector.broadcast %2 : vector<1x8xf32> to vector<256x8xf32>
    %52 = arith.addf %50, %51 : vector<256x8xf32>
    %cst_34 = arith.constant 0.000000e+00 : f32
    %53 = vector.broadcast %cst_34 : f32 to vector<256x8xf32>
    %54 = arith.maximumf %52, %53 : vector<256x8xf32>
    %55 = vector.shape_cast %54 : vector<256x8xf32> to vector<16x16x8xf32>
    %c0_35 = arith.constant 0 : index
    %c0_36 = arith.constant 0 : index
    %c0_37 = arith.constant 0 : index
    %c0_38 = arith.constant 0 : index
    %56 = vector.load %arg5[%c0_35, %c0_36, %c0_37, %c0_38] : memref<1x16x16x8xf32, #tpu.memory_space<vmem>>, vector<1x16x16x8xf32>
    %57 = vector.shape_cast %56 : vector<1x16x16x8xf32> to vector<16x16x8xf32>
    %58 = vector.shape_cast %55 : vector<16x16x8xf32> to vector<1x16x16x8xf32>
    tpu.vector_store %arg5[%c0_35, %c0_36, %c0_37, %c0_38], %58 {strides = array<i32>} : memref<1x16x16x8xf32, #tpu.memory_space<vmem>>, vector<1x16x16x8xf32>,
    return
  }
  func.func @transform_0(%arg0: i32, %arg1: i32) -> (i32, i32, i32, i32) {
    %c0_i32 = arith.constant 0 : i32
    %c0_i32_0 = arith.constant 0 : i32
    %c0_i32_1 = arith.constant 0 : i32
    %c0_i32_2 = arith.constant 0 : i32
    return %arg0, %c0_i32, %c0_i32_0, %c0_i32_1 : i32, i32, i32, i32
  }
  func.func @transform_1(%arg0: i32, %arg1: i32) -> (i32, i32) {
    %c0_i32 = arith.constant 0 : i32
    %c0_i32_0 = arith.constant 0 : i32
    %c0_i32_1 = arith.constant 0 : i32
    return %c0_i32, %c0_i32_0 : i32, i32
  }
  func.func @transform_2(%arg0: i32, %arg1: i32) -> (i32, i32) {
    %c0_i32 = arith.constant 0 : i32
    %c0_i32_0 = arith.constant 0 : i32
    %c0_i32_1 = arith.constant 0 : i32
    return %c0_i32, %c0_i32_0 : i32, i32
  }
  func.func @transform_3(%arg0: i32, %arg1: i32) -> (i32, i32, i32, i32) {
    %c0_i32 = arith.constant 0 : i32
    %c0_i32_0 = arith.constant 0 : i32
    %c0_i32_1 = arith.constant 0 : i32
    return %arg0, %arg1, %c0_i32, %c0_i32_0 : i32, i32, i32, i32
  }
}

</mosaic_0001>

<bundles_post_ra>
// kernel: tpu_custom_call.1
= control target key start
LH: loop header
LB: loop body
LE: loop exit
PB: predicated region body
PF: predicated region fallthrough
CT: control target
= control target key end

     0   :  { %s3914_s12 = smov 0   ;;  %s3916_s13 = smov 0   ;;  %s5753_s0 = inlined_call_operand.vmem [shape: bf16[2,18,18,4], index: 0, kind: input, shape index: {}]   ;;  %s5754_s1 = inlined_call_operand.vmem [shape: bf16[36,8], index: 1, kind: input, shape index: {}]   ;;  %s5755_s2 = inlined_call_operand.vmem [shape: f32[1,8], index: 2, kind: input, shape index: {}]   ;;  %s5756_s3 = inlined_call_operand.vmem [shape: f32[2,16,16,8], index: 3, kind: output, shape index: {}]  }
   0x1   :  { %s3918_s14 = smov 0  }
   0x2 LB: > { %s25_s15 = sadd.s32 1, %s3880_s13  ;;  %p3370_p0 = scmp.ge.s32.totalorder %s3884_s14, 1  ;;  %s3884_s14 = sphi %s3918_s14, %s13_s14   ;;  %s3880_s13 = sphi %s3916_s13, %s5762_s13   ;;  %s3876_s12 = sphi %s3914_s12, %s5761_s12  }
   0x3   : > { %p27_p1 = scmp.ge.s32.totalorder %s25_s15, 2  ;;  %p151_p2 = scmp.lt.s32.totalorder %s3884_s14, 3 }
   0x5   : > { %s5764_s15 = smov (%p27_p1, %s25_s15), 0  ;;  %p152_p3 = pnand %p3370_p0, %p151_p2 }
   0x6   : > { %p180_p4 = scmp.lt.s32.totalorder (!%p152_p3), %s3876_s12, 1  ;;  %s3886_s20 = smov (!%p152_p3), 4  }
   0x7   : > { %155 = sbr.rel (%p152_p3) target bundleno = 657 (0x291), region = 32  ;;  %s3887_s21 = smov (!%p152_p3), 8  }
   0x8   : > { %s3888_s22 = smov (!%p152_p3), 12   ;;  %s3889_s23 = smov (!%p152_p3), 16  }
   0x9   : > { %s3890_s24 = smov (!%p152_p3), 20   ;;  %s3891_s25 = smov (!%p152_p3), 28  }
   0xa   : > { %s3892_s26 = smov (!%p152_p3), 24   ;;  %s3893_s27 = smov (!%p152_p3), 32  }
   0xc   : > { %s5766_s12 = smov (!%p180_p4, %s3876_s12), 1  ;;  %vm250_vm0 = vsmask.f32 3328  ;;  %vm251_vm1 = vsmask.f32 7440  ;;  %vm701_vm3 = vcmask 1042432  }
   0xd   : > { %s3828_s16 = smul.u32 216, %s5766_s12  ;;  %vm3966_vm2 = vmor %vm250_vm0, %vm251_vm1  ;;  %vm702_vm4 = vcmask 1046532   ;;  %vm2776_vm6 = vcmask 31744   ;;  %vm2825_vm7 = vcmask 64512   ;;  %vm2858_vm8 = vcmask 97280   ;;  %s3768_s9 = sshll.u32 %s5766_s12, 8 }
   0xe   : > { %vm4168_vm5 = vmor %vm701_vm3, %vm702_vm4  ;;  %vm2891_vm9 = vcmask 130048   ;;  %vm3112_vm10 = vcmask 1041408   ;;  %vm2924_vm11 = vcmask 162816   ;;  %vm2957_vm12 = vcmask 195584  }
   0xf   : > { %s3938_s19 = scalar_lea.vmem %s5753_s0, %s3828_s16  ;;  %vm2990_vm13 = vcmask 228352   ;;  %vm3023_vm14 = vcmask 261120   ;;  %vm3079_vm15 = vcmask 293888   ;;  %s5617_s16 = scalar_lea.vmem %s5756_s3, %s3768_s9 }
  0x10   : > { %v210_v0 = vld [vmem:[%s3938_s19 + $0x30] sm:$0xf]  ;;  %v3942_v1 = vld [vmem:[%s3938_s19 + $0x34] sm:$0xf]  ;;  %v3945_v2 = vld [vmem:[%s3938_s19 + $0x38] sm:$0x1] }
  0x11   : > { %v350_v3 = vshrl.u32 %v210_v0, 16  ;;  %v353_v4 = vshll.u32 %v210_v0, 16  ;;  %v359_v5 = vshll.u32 %v3942_v1, 16  ;;  %v363_v6 = vshrl.u32 %v3942_v1, 16  ;;  %v206_v7 = vld [vmem:[%s3938_s19 + $0x18] sm:$0xf] }
  0x12   : > { %v369_v8 = vshll.u32 %v3945_v2, 16  ;;  %v3952_v9 = vld [vmem:[%s3938_s19 + $0x1c] sm:$0xf]  ;;  %v3955_v10 = vld [vmem:[%s3938_s19 + $0x20] sm:$0x1]  ;;  %v302_v11 = vshrl.u32 %v206_v7, 16 }
  0x13   : > { %v352_v12 = vrot.slane %v350_v3, 4  ;;  %v355_v13 = vrot.slane %v353_v4, 5  ;;  %v361_v14 = vrot.slane %v359_v5, 5  ;;  %v365_v15 = vrot.slane %v363_v6, 4  ;;  %v202_v16 = vld [vmem:[%s3938_s19] sm:$0xf] }
  0x14   : > { %v371_v17 = vrot.slane %v369_v8, 5  ;;  %v304_v18 = vrot.slane %v302_v11, 4  ;;  %v305_v19 = vshll.u32 %v206_v7, 16  ;;  %v311_v20 = vshll.u32 %v3952_v9, 16  ;;  %v3962_v25 = vld [vmem:[%s3938_s19 + $0x4] sm:$0xf] }
  0x15   : > { %v356_v21 = vor.u32 %v355_v13, %v352_v12  ;;  %v366_v22 = vor.u32 %v365_v15, %v361_v14  ;;  %v315_v23 = vshrl.u32 %v3952_v9, 16  ;;  %v321_v24 = vshll.u32 %v3955_v10, 16  ;;  %v3971_v36 = vld [vmem:[%s3938_s19 + $0x8] sm:$0x1]  ;;  %v212_v44 = vld [vmem:[%s3938_s19 + $0x3c] sm:$0xf] }
  0x16   : > { %v307_v27 = vrot.slane %v305_v19, 5  ;;  %v313_v28 = vrot.slane %v311_v20, 5  ;;  %v254_v29 = vshrl.u32 %v202_v16, 16  ;;  %v257_v30 = vshll.u32 %v202_v16, 16  ;;  %v3984_v56 = vld [vmem:[%s3938_s19 + $0x40] sm:$0xf] }
  0x17   : > { %v357_v31 = vrot.slane %v356_v21, 4  ;;  %v367_v32 = vrot.slane %v366_v22, 4  ;;  %v317_v33 = vrot.slane %v315_v23, 4  ;;  %v323_v34 = vrot.slane %v321_v24, 5  ;;  %v3989_v62 = vld [vmem:[%s3938_s19 + $0x44] sm:$0x1] }
  0x18   : > { %v308_v35 = vor.u32 %v307_v27, %v304_v18  ;;  %v256_v37 = vrot.slane %v254_v29, 4  ;;  %v259_v38 = vrot.slane %v257_v30, 5  ;;  %v263_v39 = vshll.u32 %v3962_v25, 16  ;;  %v208_v63 = vld [vmem:[%s3938_s19 + $0x24] sm:$0xf] }
  0x19   : > { %v362_v40 = vsel %vm3966_vm2, %v357_v31, %v361_v14  ;;  %v372_v41 = vsel %vm3966_vm2, %v367_v32, %v371_v17  ;;  %v318_v42 = vor.u32 %v317_v33, %v313_v28  ;;  %v267_v43 = vshrl.u32 %v3962_v25, 16  ;;  %v3998_v12 = vld [vmem:[%s3938_s19 + $0x28] sm:$0xf]  ;;  %v4002_v16 = vld [vmem:[%s3938_s19 + $0x2c] sm:$0x1] }
  0x1a   : > { %v2112_v45 = vunpack.c.l.b16 %v362_v40  ;;  %v2113_v46 = vunpack.c.l.b16 %v372_v41  ;;  %v309_v47 = vrot.slane %v308_v35, 4  ;;  %v260_v48 = vor.u32 %v259_v38, %v256_v37  ;;  %v204_v22 = vld [vmem:[%s3938_s19 + $0xc] sm:$0xf]  ;;  %v4012_v37 = vld [vmem:[%s3938_s19 + $0x10] sm:$0xf] }
  0x1b   : > { %v319_v49 = vrot.slane %v318_v42, 4  ;;  %v265_v50 = vrot.slane %v263_v39, 5  ;;  %v269_v51 = vrot.slane %v267_v43, 4  ;;  %v273_v52 = vshll.u32 %v3971_v36, 16  ;;  %v4015_v43 = vld [vmem:[%s3938_s19 + $0x14] sm:$0x1] }
  0x1c   : > { %v2140_v53 = vpack.c.b16 %v2113_v46, %v2112_v45  ;;  %v314_v54 = vsel %vm3966_vm2, %v309_v47, %v313_v28  ;;  %v261_v55 = vrot.slane %v260_v48, 4  ;;  %v374_v57 = vshrl.u32 %v212_v44, 16  ;;  %v218_v48 = vld [vmem:[%s3938_s19 + $0x60] sm:$0xf] }
  0x1d   : > { %v324_v58 = vsel %vm3966_vm2, %v319_v49, %v323_v34  ;;  %v2108_v59 = vunpack.c.l.b16 %v314_v54  ;;  %v270_v60 = vor.u32 %v269_v51, %v265_v50  ;;  %v275_v61 = vrot.slane %v273_v52, 5 }
  0x1e   : > { %2160 = vrot.lane.b32.xlu2 %v2140_v53, %s3886_s20  ;;  %v2109_v0 = vunpack.c.l.b16 %v324_v58  ;;  %v266_v3 = vsel %vm3966_vm2, %v261_v55, %v265_v50  ;;  %v376_v4 = vrot.slane %v374_v57, 4  ;;  %v377_v5 = vshll.u32 %v212_v44, 16 }
  0x1f   : > { %v271_v6 = vrot.slane %v270_v60, 4  ;;  %v2104_v7 = vunpack.c.l.b16 %v266_v3  ;;  %v383_v8 = vshll.u32 %v3984_v56, 16  ;;  %v387_v11 = vshrl.u32 %v3984_v56, 16 }
  0x20   : > { %v2138_v13 = vpack.c.b16 %v2109_v0, %v2108_v59  ;;  %v379_v14 = vrot.slane %v377_v5, 5  ;;  %v393_v15 = vshll.u32 %v3989_v62, 16  ;;  %v326_v17 = vshrl.u32 %v208_v63, 16 }
  0x21   : > { %v276_v18 = vsel %vm3966_vm2, %v271_v6, %v275_v61  ;;  %v385_v19 = vrot.slane %v383_v8, 5  ;;  %v389_v20 = vrot.slane %v387_v11, 4  ;;  %v329_v21 = vshll.u32 %v208_v63, 16  ;;  %v4029_v61 = vld [vmem:[%s3938_s19 + $0x64] sm:$0xf] }
  0x22   : > { %2156 = vrot.lane.b32.xlu1 %v2138_v13, %s3886_s20  ;;  %v2105_v23 = vunpack.c.l.b16 %v276_v18  ;;  %v380_v24 = vor.u32 %v379_v14, %v376_v4  ;;  %v395_v27 = vrot.slane %v393_v15, 5  ;;  %v328_v28 = vrot.slane %v326_v17, 4  ;;  %v4032_v6 = vld [vmem:[%s3938_s19 + $0x68] sm:$0x1] }
  0x23   : > { %v390_v29 = vor.u32 %v389_v20, %v385_v19  ;;  %v331_v30 = vrot.slane %v329_v21, 5  ;;  %v335_v31 = vshll.u32 %v3998_v12, 16  ;;  %v339_v32 = vshrl.u32 %v3998_v12, 16 }
  0x24   : > { %v2136_v33 = vpack.c.b16 %v2105_v23, %v2104_v7  ;;  %v381_v34 = vrot.slane %v380_v24, 4  ;;  %v345_v35 = vshll.u32 %v4002_v16, 16  ;;  %v278_v38 = vshrl.u32 %v204_v22, 16  ;;  %v216_v7 = vld [vmem:[%s3938_s19 + $0x54] sm:$0xf] }
  0x25   : > { %v391_v39 = vrot.slane %v390_v29, 4  ;;  %v332_v40 = vor.u32 %v331_v30, %v328_v28  ;;  %v337_v41 = vrot.slane %v335_v31, 5  ;;  %v341_v42 = vrot.slane %v339_v32, 4  ;;  %v4042_v23 = vld [vmem:[%s3938_s19 + $0x58] sm:$0xf] }
  0x26   : > { %2152 = vrot.lane.b32.xlu0 %v2136_v33, %s3886_s20  ;;  %v386_v44 = vsel %vm3966_vm2, %v381_v34, %v385_v19  ;;  %v347_v45 = vrot.slane %v345_v35, 5  ;;  %v280_v46 = vrot.slane %v278_v38, 4  ;;  %v281_v47 = vshll.u32 %v204_v22, 16  ;;  %v4047_v31 = vld [vmem:[%s3938_s19 + $0x5c] sm:$0x1] }
  0x27   : > { %v396_v49 = vsel %vm3966_vm2, %v391_v39, %v395_v27  ;;  %v2114_v50 = vunpack.c.l.b16 %v386_v44  ;;  %v333_v51 = vrot.slane %v332_v40, 4  ;;  %v342_v52 = vor.u32 %v341_v42, %v337_v41  ;;  %v214_v42 = vld [vmem:[%s3938_s19 + $0x48] sm:$0xf] }
  0x28   : > { %v2115_v53 = vunpack.c.l.b16 %v396_v49  ;;  %v283_v54 = vrot.slane %v281_v47, 5  ;;  %v287_v55 = vshll.u32 %v4012_v37, 16  ;;  %v291_v57 = vshrl.u32 %v4012_v37, 16 }
  0x29   : > { %v338_v58 = vsel %vm3966_vm2, %v333_v51, %v337_v41  ;;  %v343_v59 = vrot.slane %v342_v52, 4  ;;  %v297_v60 = vshll.u32 %v4015_v43, 16  ;;  %v446_v63 = vshrl.u32 %v218_v48, 16 }
  0x2a   : > { %v2141_v0 = vpack.c.b16 %v2115_v53, %v2114_v50  ;;  %v2110_v3 = vunpack.c.l.b16 %v338_v58  ;;  %v284_v4 = vor.u32 %v283_v54, %v280_v46  ;;  %v289_v5 = vrot.slane %v287_v55, 5  ;;  %v4057_v55 = vld [vmem:[%s3938_s19 + $0x4c] sm:$0xf] }
  0x2b   : > { %v348_v8 = vsel %vm3966_vm2, %v343_v59, %v347_v45  ;;  %v293_v11 = vrot.slane %v291_v57, 4  ;;  %v299_v13 = vrot.slane %v297_v60, 5  ;;  %v448_v14 = vrot.slane %v446_v63, 4  ;;  %v4062_v63 = vld [vmem:[%s3938_s19 + $0x50] sm:$0x1] }
  0x2c   : > { %2162 = vrot.lane.b32.xlu2 %v2141_v0, %s3886_s20  ;;  %v2111_v15 = vunpack.c.l.b16 %v348_v8  ;;  %v285_v17 = vrot.slane %v284_v4, 4  ;;  %v449_v18 = vshll.u32 %v218_v48, 16  ;;  %v455_v19 = vshll.u32 %v4029_v61, 16 }
  0x2d   : > { %v294_v20 = vor.u32 %v293_v11, %v289_v5  ;;  %v459_v21 = vshrl.u32 %v4029_v61, 16  ;;  %v465_v22 = vshll.u32 %v4032_v6, 16  ;;  %v422_v24 = vshrl.u32 %v216_v7, 16 }
  0x2e   : > { %v2139_v27 = vpack.c.b16 %v2111_v15, %v2110_v3  ;;  %v290_v28 = vsel %vm3966_vm2, %v285_v17, %v289_v5  ;;  %v451_v29 = vrot.slane %v449_v18, 5  ;;  %v457_v30 = vrot.slane %v455_v19, 5  ;;  %v224_v3 = vld [vmem:[%s3938_s19 + $0x84] sm:$0xf] }
  0x2f   : > { %v295_v32 = vrot.slane %v294_v20, 4  ;;  %v2106_v33 = vunpack.c.l.b16 %v290_v28  ;;  %v461_v34 = vrot.slane %v459_v21, 4  ;;  %v467_v35 = vrot.slane %v465_v22, 5  ;;  %v4074_v28 = vld [vmem:[%s3938_s19 + $0x88] sm:$0xf] }
  0x30   : > { %2158 = vrot.lane.b32.xlu1 %v2139_v27, %s3886_s20  ;;  %v452_v38 = vor.u32 %v451_v29, %v448_v14  ;;  %v424_v39 = vrot.slane %v422_v24, 4  ;;  %v425_v40 = vshll.u32 %v216_v7, 16  ;;  %v431_v41 = vshll.u32 %v4042_v23, 16  ;;  %v4077_v29 = vld [vmem:[%s3938_s19 + $0x8c] sm:$0x1] }
  0x31   : > { %v300_v44 = vsel %vm3966_vm2, %v295_v32, %v299_v13  ;;  %v462_v45 = vor.u32 %v461_v34, %v457_v30  ;;  %v435_v46 = vshrl.u32 %v4042_v23, 16  ;;  %v441_v47 = vshll.u32 %v4047_v31, 16 }
  0x32   : > { %v2107_v48 = vunpack.c.l.b16 %v300_v44  ;;  %v453_v49 = vrot.slane %v452_v38, 4  ;;  %v427_v50 = vrot.slane %v425_v40, 5  ;;  %v433_v51 = vrot.slane %v431_v41, 5 }
  0x33   : > { %v463_v52 = vrot.slane %v462_v45, 4  ;;  %v437_v53 = vrot.slane %v435_v46, 4  ;;  %v443_v54 = vrot.slane %v441_v47, 5  ;;  %v398_v57 = vshrl.u32 %v214_v42, 16 }
  0x34   : > { %v2137_v58 = vpack.c.b16 %v2107_v48, %v2106_v33  ;;  %v458_v59 = vsel %vm3966_vm2, %v453_v49, %v457_v30  ;;  %v428_v60 = vor.u32 %v427_v50, %v424_v39  ;;  %v401_v0 = vshll.u32 %v214_v42, 16  ;;  %v4089_v50 = vld [vmem:[%s3938_s19 + $0x7c] sm:$0xf] }
  0x35   : > { %v468_v4 = vsel %vm3966_vm2, %v463_v52, %v467_v35  ;;  %v2120_v5 = vunpack.c.l.b16 %v458_v59  ;;  %v438_v7 = vor.u32 %v437_v53, %v433_v51  ;;  %v400_v8 = vrot.slane %v398_v57, 4  ;;  %v222_v35 = vld [vmem:[%s3938_s19 + $0x78] sm:$0xf] }
  0x36   : > { %2154 = vrot.lane.b32.xlu0 %v2137_v58, %s3886_s20  ;;  %v2121_v11 = vunpack.c.l.b16 %v468_v4  ;;  %v429_v13 = vrot.slane %v428_v60, 4  ;;  %v403_v14 = vrot.slane %v401_v0, 5  ;;  %v407_v15 = vshll.u32 %v4057_v55, 16  ;;  %v4092_v58 = vld [vmem:[%s3938_s19 + $0x80] sm:$0x1] }
  0x37   : > { %v439_v17 = vrot.slane %v438_v7, 4  ;;  %v411_v18 = vshrl.u32 %v4057_v55, 16  ;;  %v417_v19 = vshll.u32 %v4062_v63, 16  ;;  %v518_v20 = vshrl.u32 %v224_v3, 16  ;;  %v220_v4 = vld [vmem:[%s3938_s19 + $0x6c] sm:$0xf] }
  0x38   : > { %v2144_v21 = vpack.c.b16 %v2121_v11, %v2120_v5  ;;  %v434_v22 = vsel %vm3966_vm2, %v429_v13, %v433_v51  ;;  %v404_v24 = vor.u32 %v403_v14, %v400_v8  ;;  %v409_v27 = vrot.slane %v407_v15, 5 }
  0x39   : > { %v444_v30 = vsel %vm3966_vm2, %v439_v17, %v443_v54  ;;  %v2118_v32 = vunpack.c.l.b16 %v434_v22  ;;  %v413_v33 = vrot.slane %v411_v18, 4  ;;  %v419_v34 = vrot.slane %v417_v19, 5 }
  0x3a   : > { %2168 = vrot.lane.b32.xlu2 %v2144_v21, %s3886_s20  ;;  %v2119_v38 = vunpack.c.l.b16 %v444_v30  ;;  %v405_v39 = vrot.slane %v404_v24, 4  ;;  %v520_v40 = vrot.slane %v518_v20, 4  ;;  %v521_v41 = vshll.u32 %v224_v3, 16  ;;  %v4102_v21 = vld [vmem:[%s3938_s19 + $0x70] sm:$0xf] }
  0x3b   : > { %v414_v42 = vor.u32 %v413_v33, %v409_v27  ;;  %v527_v44 = vshll.u32 %v4074_v28, 16  ;;  %v531_v45 = vshrl.u32 %v4074_v28, 16  ;;  %v537_v46 = vshll.u32 %v4077_v29, 16  ;;  %v4107_v33 = vld [vmem:[%s3938_s19 + $0x74] sm:$0x1] }
  0x3c   : > { %v2143_v47 = vpack.c.b16 %v2119_v38, %v2118_v32  ;;  %v410_v48 = vsel %vm3966_vm2, %v405_v39, %v409_v27  ;;  %v523_v49 = vrot.slane %v521_v41, 5  ;;  %v494_v51 = vshrl.u32 %v222_v35, 16 }
  0x3d   : > { %v415_v52 = vrot.slane %v414_v42, 4  ;;  %v2116_v53 = vunpack.c.l.b16 %v410_v48  ;;  %v529_v54 = vrot.slane %v527_v44, 5  ;;  %v533_v57 = vrot.slane %v531_v45, 4 }
  0x3e   : > { %2166 = vrot.lane.b32.xlu1 %v2143_v47, %s3886_s20  ;;  %v524_v59 = vor.u32 %v523_v49, %v520_v40  ;;  %v539_v60 = vrot.slane %v537_v46, 5  ;;  %v496_v0 = vrot.slane %v494_v51, 4  ;;  %v497_v3 = vshll.u32 %v222_v35, 16 }
  0x3f   : > { %v420_v5 = vsel %vm3966_vm2, %v415_v52, %v419_v34  ;;  %v534_v7 = vor.u32 %v533_v57, %v529_v54  ;;  %v503_v8 = vshll.u32 %v4089_v50, 16  ;;  %v507_v11 = vshrl.u32 %v4089_v50, 16  ;;  %v230_v34 = vld [vmem:[%s3938_s19 + $0xa8] sm:$0xf]  ;;  %v4119_v57 = vld [vmem:[%s3938_s19 + $0xac] sm:$0xf] }
  0x40   : > { %v2117_v13 = vunpack.c.l.b16 %v420_v5  ;;  %v525_v14 = vrot.slane %v524_v59, 4  ;;  %v499_v15 = vrot.slane %v497_v3, 5  ;;  %v513_v17 = vshll.u32 %v4092_v58, 16  ;;  %v4122_v59 = vld [vmem:[%s3938_s19 + $0xb0] sm:$0x1] }
  0x41   : > { %v535_v18 = vrot.slane %v534_v7, 4  ;;  %v505_v19 = vrot.slane %v503_v8, 5  ;;  %v509_v20 = vrot.slane %v507_v11, 4  ;;  %v470_v22 = vshrl.u32 %v220_v4, 16  ;;  %v228_v5 = vld [vmem:[%s3938_s19 + $0x9c] sm:$0xf] }
  0x42   : > { %v2142_v24 = vpack.c.b16 %v2117_v13, %v2116_v53  ;;  %v530_v27 = vsel %vm3966_vm2, %v525_v14, %v529_v54  ;;  %v500_v30 = vor.u32 %v499_v15, %v496_v0  ;;  %v515_v32 = vrot.slane %v513_v17, 5 }
  0x43   : > { %v540_v35 = vsel %vm3966_vm2, %v535_v18, %v539_v60  ;;  %v2126_v38 = vunpack.c.l.b16 %v530_v27  ;;  %v510_v39 = vor.u32 %v509_v20, %v505_v19  ;;  %v472_v40 = vrot.slane %v470_v22, 4 }
  0x44   : > { %2164 = vrot.lane.b32.xlu0 %v2142_v24, %s3886_s20  ;;  %v2127_v41 = vunpack.c.l.b16 %v540_v35  ;;  %v501_v42 = vrot.slane %v500_v30, 4  ;;  %v473_v44 = vshll.u32 %v220_v4, 16  ;;  %v479_v45 = vshll.u32 %v4102_v21, 16  ;;  %v4132_v24 = vld [vmem:[%s3938_s19 + $0xa0] sm:$0xf] }
  0x45   : > { %v511_v46 = vrot.slane %v510_v39, 4  ;;  %v483_v47 = vshrl.u32 %v4102_v21, 16  ;;  %v489_v48 = vshll.u32 %v4107_v33, 16  ;;  %v590_v49 = vshrl.u32 %v230_v34, 16 }
  0x46   : > { %v2147_v51 = vpack.c.b16 %v2127_v41, %v2126_v38  ;;  %v506_v52 = vsel %vm3966_vm2, %v501_v42, %v505_v19  ;;  %v475_v53 = vrot.slane %v473_v44, 5  ;;  %v481_v54 = vrot.slane %v479_v45, 5  ;;  %v226_v44 = vld [vmem:[%s3938_s19 + $0x90] sm:$0xf] }
  0x47   : > { %v516_v60 = vsel %vm3966_vm2, %v511_v46, %v515_v32  ;;  %v2124_v0 = vunpack.c.l.b16 %v506_v52  ;;  %v485_v3 = vrot.slane %v483_v47, 4  ;;  %v491_v4 = vrot.slane %v489_v48, 5 }
  0x48   : > { %2174 = vrot.lane.b32.xlu2 %v2147_v51, %s3886_s20  ;;  %v2125_v7 = vunpack.c.l.b16 %v516_v60  ;;  %v476_v8 = vor.u32 %v475_v53, %v472_v40  ;;  %v592_v11 = vrot.slane %v590_v49, 4  ;;  %v593_v13 = vshll.u32 %v230_v34, 16  ;;  %v4138_v40 = vld [vmem:[%s3938_s19 + $0xa4] sm:$0x1] }
  0x49   : > { %v486_v14 = vor.u32 %v485_v3, %v481_v54  ;;  %v599_v15 = vshll.u32 %v4119_v57, 16  ;;  %v603_v17 = vshrl.u32 %v4119_v57, 16  ;;  %v609_v18 = vshll.u32 %v4122_v59, 16 }
  0x4a   : > { %v2146_v19 = vpack.c.b16 %v2125_v7, %v2124_v0  ;;  %v477_v20 = vrot.slane %v476_v8, 4  ;;  %v595_v22 = vrot.slane %v593_v13, 5  ;;  %v566_v27 = vshrl.u32 %v228_v5, 16  ;;  %v4152_v13 = vld [vmem:[%s3938_s19 + $0x98] sm:$0x1] }
  0x4b   : > { %v487_v30 = vrot.slane %v486_v14, 4  ;;  %v601_v32 = vrot.slane %v599_v15, 5  ;;  %v605_v35 = vrot.slane %v603_v17, 4  ;;  %v611_v38 = vrot.slane %v609_v18, 5 }
  0x4c   : > { %2172 = vrot.lane.b32.xlu1 %v2146_v19, %s3886_s20  ;;  %v482_v34 = vsel %vm3966_vm2, %v477_v20, %v481_v54  ;;  %v596_v39 = vor.u32 %v595_v22, %v592_v11  ;;  %v568_v41 = vrot.slane %v566_v27, 4  ;;  %v569_v42 = vshll.u32 %v228_v5, 16  ;;  %v4149_v11 = vld [vmem:[%s3938_s19 + $0x94] sm:$0xf] }
  0x4d   : > { %v492_v45 = vsel %vm3966_vm2, %v487_v30, %v491_v4  ;;  %v2122_v46 = vunpack.c.l.b16 %v482_v34  ;;  %v606_v47 = vor.u32 %v605_v35, %v601_v32  ;;  %v575_v48 = vshll.u32 %v4132_v24, 16  ;;  %v638_v34 = vld [vmem:[%s3938_s19 + $0xc] sm:$0xe] }
  0x4e   : > { %v2123_v49 = vunpack.c.l.b16 %v492_v45  ;;  %v597_v51 = vrot.slane %v596_v39, 4  ;;  %v571_v52 = vrot.slane %v569_v42, 5  ;;  %v579_v53 = vshrl.u32 %v4132_v24, 16 }
  0x4f   : > { %v607_v54 = vrot.slane %v606_v47, 4  ;;  %v577_v60 = vrot.slane %v575_v48, 5  ;;  %v585_v0 = vshll.u32 %v4138_v40, 16  ;;  %v542_v3 = vshrl.u32 %v226_v44, 16 }
  0x50   : > { %v2145_v5 = vpack.c.b16 %v2123_v49, %v2122_v46  ;;  %v602_v4 = vsel %vm3966_vm2, %v597_v51, %v601_v32  ;;  %v572_v7 = vor.u32 %v571_v52, %v568_v41  ;;  %v581_v8 = vrot.slane %v579_v53, 4  ;;  %v637_v49 = vld [vmem:[%s3938_s19] sm:$0xe] }
  0x51   : > { %v612_v14 = vsel %vm3966_vm2, %v607_v54, %v611_v38  ;;  %v2132_v15 = vunpack.c.l.b16 %v602_v4  ;;  %v587_v17 = vrot.slane %v585_v0, 5  ;;  %v544_v18 = vrot.slane %v542_v3, 4 }
  0x52   : > { %2170 = vrot.lane.b32.xlu0 %v2145_v5, %s3886_s20  ;;  %v2133_v19 = vunpack.c.l.b16 %v612_v14  ;;  %v573_v20 = vrot.slane %v572_v7, 4  ;;  %v582_v22 = vor.u32 %v581_v8, %v577_v60  ;;  %v545_v27 = vshll.u32 %v226_v44, 16 }
  0x53   : > { %v551_v30 = vshll.u32 %v4149_v11, 16  ;;  %v555_v32 = vshrl.u32 %v4149_v11, 16  ;;  %v561_v35 = vshll.u32 %v4152_v13, 16  ;;  %v3375_v52 = vrot.slane %v638_v34, 9 }
  0x54   : > { %v2150_v39 = vpack.c.b16 %v2133_v19, %v2132_v15  ;;  %v578_v38 = vsel %vm3966_vm2, %v573_v20, %v577_v60  ;;  %v583_v41 = vrot.slane %v582_v22, 4  ;;  %v547_v42 = vrot.slane %v545_v27, 5  ;;  %v232_v19 = vld [vmem:[%s3938_s19 + $0xb4] sm:$0xf] }
  0x55   : > { %v2130_v45 = vunpack.c.l.b16 %v578_v38  ;;  %v553_v46 = vrot.slane %v551_v30, 5  ;;  %v557_v47 = vrot.slane %v555_v32, 4  ;;  %v563_v48 = vrot.slane %v561_v35, 5  ;;  %v4192_v35 = vld [vmem:[%s3938_s19 + $0xbc] sm:$0x1] }
  0x56   : > { %2180 = vrot.lane.b32.xlu2 %v2150_v39, %s3886_s20  ;;  %v588_v44 = vsel %vm3966_vm2, %v583_v41, %v587_v17  ;;  %v548_v51 = vor.u32 %v547_v42, %v544_v18  ;;  %v713_v0 = vrot.slane %v4012_v37, 5  ;;  %v716_v3 = vrot.slane %v4015_v43, 5 }
  0x57   : > { %v2131_v53 = vunpack.c.l.b16 %v588_v44  ;;  %v558_v54 = vor.u32 %v557_v47, %v553_v46  ;;  %v3374_v4 = vrot.slane %v637_v49, 9  ;;  %v706_v7 = vrot.slane %v3962_v25, 5  ;;  %v4184_v25 = vld [vmem:[%s3938_s19 + $0xb8] sm:$0xf] }
  0x58   : > { %v549_v5 = vrot.slane %v548_v51, 4  ;;  %v709_v8 = vrot.slane %v3971_v36, 5  ;;  %v714_v17 = vsel %vm4168_vm5, %v3375_v52, %v713_v0  ;;  %v715_v18 = vrot.slane %v713_v0, 4 }
  0x59   : > { %v2149_v14 = vpack.c.b16 %v2131_v53, %v2130_v45  ;;  %v559_v15 = vrot.slane %v558_v54, 4  ;;  %v2186_v37 = vunpack.c.l.b16 %v714_v17  ;;  %v707_v43 = vsel %vm4168_vm5, %v3374_v4, %v706_v7  ;;  %v640_v53 = vld [vmem:[%s3938_s19 + $0x24] sm:$0xe]  ;;  %v639_v4 = vld [vmem:[%s3938_s19 + $0x18] sm:$0xe] }
  0x5a   : > { %v554_v20 = vsel %vm3966_vm2, %v549_v5, %v553_v46  ;;  %v708_v22 = vrot.slane %v706_v7, 4  ;;  %v717_v30 = vsel %vm4168_vm5, %v715_v18, %v716_v3  ;;  %v2184_v32 = vunpack.c.l.b16 %v707_v43 }
  0x5b   : > { %2178 = vrot.lane.b32.xlu1 %v2149_v14, %s3886_s20  ;;  %v564_v36 = vsel %vm3966_vm2, %v559_v15, %v563_v48  ;;  %v2128_v27 = vunpack.c.l.b16 %v554_v20  ;;  %v2187_v39 = vunpack.c.l.b16 %v717_v30  ;;  %v614_v41 = vshrl.u32 %v232_v19, 16  ;;  %v641_v48 = vld [vmem:[%s3938_s19 + $0x30] sm:$0xe] }
  0x5c   : > { %v2129_v34 = vunpack.c.l.b16 %v564_v36  ;;  %v710_v38 = vsel %vm4168_vm5, %v708_v22, %v709_v8  ;;  %v617_v45 = vshll.u32 %v232_v19, 16  ;;  %v623_v46 = vshll.u32 %v4184_v25, 16 }
  0x5d   : > { %v2185_v42 = vunpack.c.l.b16 %v710_v38  ;;  %v627_v47 = vshrl.u32 %v4184_v25, 16  ;;  %v2217_v44 = vpack.c.b16 %v2187_v39, %v2186_v37  ;;  %v616_v51 = vrot.slane %v614_v41, 4 }
  0x5e   : > { %v2148_v49 = vpack.c.b16 %v2129_v34, %v2128_v27  ;;  %v633_v52 = vshll.u32 %v4192_v35, 16  ;;  %v619_v0 = vrot.slane %v617_v45, 5  ;;  %v625_v3 = vrot.slane %v623_v46, 5  ;;  %v644_v45 = vld [vmem:[%s3938_s19 + $0x54] sm:$0xe] }
  0x5f   : > { %v2216_v54 = vpack.c.b16 %v2185_v42, %v2184_v32  ;;  %v629_v5 = vrot.slane %v627_v47, 4  ;;  %2234 = vrot.lane.b32.xlu2 %v2217_v44, %s3887_s21  ;;  %v3378_v8 = vrot.slane %v641_v48, 9  ;;  %v734_v14 = vrot.slane %v3942_v1, 5 }
  0x60   : > { %2176 = vrot.lane.b32.xlu0 %v2148_v49, %s3886_s20  ;;  %v635_v7 = vrot.slane %v633_v52, 5  ;;  %v737_v15 = vrot.slane %v3945_v2, 5  ;;  %v620_v17 = vor.u32 %v619_v0, %v616_v51  ;;  %v3377_v19 = vrot.slane %v640_v53, 9 }
  0x61   : > { %v630_v18 = vor.u32 %v629_v5, %v625_v3  ;;  %v727_v20 = vrot.slane %v3998_v12, 5  ;;  %v735_v37 = vsel %vm4168_vm5, %v3378_v8, %v734_v14  ;;  %v736_v43 = vrot.slane %v734_v14, 4  ;;  %v642_v5 = vld [vmem:[%s3938_s19 + $0x3c] sm:$0xe] }
  0x62   : > { %v730_v22 = vrot.slane %v4002_v16, 5  ;;  %v3376_v36 = vrot.slane %v639_v4, 9  ;;  %v621_v27 = vrot.slane %v620_v17, 4  ;;  %v2192_v1 = vunpack.c.l.b16 %v735_v37 }
  0x63   : > { %2232 = vrot.lane.b32.xlu1 %v2216_v54, %s3887_s21  ;;  %v631_v30 = vrot.slane %v630_v18, 4  ;;  %v728_v2 = vsel %vm4168_vm5, %v3377_v19, %v727_v20  ;;  %v738_v12 = vsel %vm4168_vm5, %v736_v43, %v737_v15  ;;  %v729_v32 = vrot.slane %v727_v20, 4  ;;  %v647_v18 = vld [vmem:[%s3938_s19 + $0x78] sm:$0xe] }
  0x64   : > { %v2190_v34 = vunpack.c.l.b16 %v728_v2  ;;  %v720_v39 = vrot.slane %v3952_v9, 5  ;;  %v626_v16 = vsel %vm3966_vm2, %v621_v27, %v625_v3  ;;  %v2193_v41 = vunpack.c.l.b16 %v738_v12  ;;  %v643_v9 = vld [vmem:[%s3938_s19 + $0x48] sm:$0xe] }
  0x65   : > { %v636_v38 = vsel %vm3966_vm2, %v631_v30, %v635_v7  ;;  %v723_v42 = vrot.slane %v3955_v10, 5  ;;  %v2134_v46 = vunpack.c.l.b16 %v626_v16  ;;  %v731_v48 = vsel %vm4168_vm5, %v729_v32, %v730_v22  ;;  %v646_v30 = vld [vmem:[%s3938_s19 + $0x6c] sm:$0xe] }
  0x66   : > { %v2135_v47 = vunpack.c.l.b16 %v636_v38  ;;  %v721_v49 = vsel %vm4168_vm5, %v3376_v36, %v720_v39  ;;  %v2220_v44 = vpack.c.b16 %v2193_v41, %v2192_v1  ;;  %v2191_v51 = vunpack.c.l.b16 %v731_v48 }
  0x67   : > { %v722_v52 = vrot.slane %v720_v39, 4  ;;  %v2188_v53 = vunpack.c.l.b16 %v721_v49  ;;  %v3381_v0 = vrot.slane %v644_v45, 9  ;;  %v755_v3 = vrot.slane %v4042_v23, 5 }
  0x68   : > { %v2151_v54 = vpack.c.b16 %v2135_v47, %v2134_v46  ;;  %v758_v10 = vrot.slane %v4047_v31, 5  ;;  %2240 = vrot.lane.b32.xlu2 %v2220_v44, %s3887_s21  ;;  %v2219_v4 = vpack.c.b16 %v2191_v51, %v2190_v34  ;;  %v3380_v8 = vrot.slane %v643_v9, 9 }
  0x69   : > { %v724_v7 = vsel %vm4168_vm5, %v722_v52, %v723_v42  ;;  %v748_v14 = vrot.slane %v4057_v55, 5  ;;  %v756_v17 = vsel %vm4168_vm5, %v3381_v0, %v755_v3  ;;  %v757_v23 = vrot.slane %v755_v3, 4  ;;  %v645_v42 = vld [vmem:[%s3938_s19 + $0x60] sm:$0xe]  ;;  %v649_v3 = vld [vmem:[%s3938_s19 + $0x90] sm:$0xe] }
  0x6a   : > { %2182 = vrot.lane.b32.xlu0 %v2151_v54, %s3886_s20  ;;  %v2189_v15 = vunpack.c.l.b16 %v724_v7  ;;  %v751_v31 = vrot.slane %v4062_v63, 5  ;;  %v2198_v19 = vunpack.c.l.b16 %v756_v17  ;;  %v3379_v43 = vrot.slane %v642_v5, 9 }
  0x6b   : > { %2238 = vrot.lane.b32.xlu1 %v2219_v4, %s3887_s21  ;;  %v749_v20 = vsel %vm4168_vm5, %v3380_v8, %v748_v14  ;;  %v750_v37 = vrot.slane %v748_v14, 4  ;;  %v759_v22 = vsel %vm4168_vm5, %v757_v23, %v758_v10  ;;  %v741_v27 = vrot.slane %v3984_v56, 5 }
  0x6c   : > { %v2218_v55 = vpack.c.b16 %v2189_v15, %v2188_v53  ;;  %v2196_v36 = vunpack.c.l.b16 %v749_v20  ;;  %v2199_v1 = vunpack.c.l.b16 %v759_v22  ;;  %v744_v2 = vrot.slane %v3989_v62, 5  ;;  %v648_v15 = vld [vmem:[%s3938_s19 + $0x84] sm:$0xe] }
  0x6d   : > { %v752_v63 = vsel %vm4168_vm5, %v750_v37, %v751_v31  ;;  %v3384_v12 = vrot.slane %v647_v18, 9  ;;  %v742_v34 = vsel %vm4168_vm5, %v3379_v43, %v741_v27  ;;  %v743_v39 = vrot.slane %v741_v27, 4 }
  0x6e   : > { %v2197_v32 = vunpack.c.l.b16 %v752_v63  ;;  %v776_v16 = vrot.slane %v4089_v50, 5  ;;  %v2223_v38 = vpack.c.b16 %v2199_v1, %v2198_v19  ;;  %v779_v41 = vrot.slane %v4092_v58, 5  ;;  %v650_v58 = vld [vmem:[%s3938_s19 + $0x9c] sm:$0xe] }
  0x6f   : > { %v3383_v56 = vrot.slane %v646_v30, 9  ;;  %v745_v46 = vsel %vm4168_vm5, %v743_v39, %v744_v2  ;;  %v2194_v48 = vunpack.c.l.b16 %v742_v34  ;;  %v769_v50 = vrot.slane %v4102_v21, 5 }
  0x70   : > { %v2222_v45 = vpack.c.b16 %v2197_v32, %v2196_v36  ;;  %v777_v62 = vsel %vm4168_vm5, %v3384_v12, %v776_v16  ;;  %v778_v47 = vrot.slane %v776_v16, 4  ;;  %2246 = vrot.lane.b32.xlu2 %v2223_v38, %s3887_s21  ;;  %v772_v9 = vrot.slane %v4107_v33, 5  ;;  %v652_v36 = vld [vmem:[%s3938_s19 + $0xb4] sm:$0xe] }
  0x71   : > { %v2204_v49 = vunpack.c.l.b16 %v777_v62  ;;  %v2195_v44 = vunpack.c.l.b16 %v745_v46  ;;  %v3382_v52 = vrot.slane %v645_v42, 9  ;;  %v762_v53 = vrot.slane %v4029_v61, 5 }
  0x72   : > { %2236 = vrot.lane.b32.xlu0 %v2218_v55, %s3887_s21  ;;  %v780_v51 = vsel %vm4168_vm5, %v778_v47, %v779_v41  ;;  %v770_v0 = vsel %vm4168_vm5, %v3383_v56, %v769_v50  ;;  %v771_v21 = vrot.slane %v769_v50, 4  ;;  %v765_v33 = vrot.slane %v4032_v6, 5 }
  0x73   : > { %2244 = vrot.lane.b32.xlu1 %v2222_v45, %s3887_s21  ;;  %v2205_v54 = vunpack.c.l.b16 %v780_v51  ;;  %v2202_v10 = vunpack.c.l.b16 %v770_v0  ;;  %v764_v5 = vrot.slane %v762_v53, 4  ;;  %v3387_v4 = vrot.slane %v650_v58, 9 }
  0x74   : > { %v773_v8 = vsel %vm4168_vm5, %v771_v21, %v772_v9  ;;  %v763_v61 = vsel %vm4168_vm5, %v3382_v52, %v762_v53  ;;  %v797_v14 = vrot.slane %v4132_v24, 5  ;;  %v2221_v17 = vpack.c.b16 %v2195_v44, %v2194_v48  ;;  %v651_v48 = vld [vmem:[%s3938_s19 + $0xa8] sm:$0xe]  ;;  %v3785_v52 = vld [vmem:[%s3938_s19 + $0xc] sm:$0xff] }
  0x75   : > { %v2226_v7 = vpack.c.b16 %v2205_v54, %v2204_v49  ;;  %v2203_v23 = vunpack.c.l.b16 %v773_v8  ;;  %v800_v31 = vrot.slane %v4138_v40, 5  ;;  %v3386_v6 = vrot.slane %v649_v3, 9  ;;  %v3788_v3 = vld [vmem:[%s3938_s19 + $0x30] sm:$0xff] }
  0x76   : > { %v766_v18 = vsel %vm4168_vm5, %v764_v5, %v765_v33  ;;  %v798_v19 = vsel %vm4168_vm5, %v3387_v4, %v797_v14  ;;  %v799_v20 = vrot.slane %v797_v14, 4  ;;  %v790_v37 = vrot.slane %v4149_v11, 5  ;;  %v3787_v5 = vld [vmem:[%s3938_s19 + $0x24] sm:$0xff]  ;;  %v4331_v8 = vld [vmem:[%s3938_s19 + $0x70] sm:$0xf]  ;;  %v3791_v14 = vld [vmem:[%s3938_s19 + $0x54] sm:$0xff] }
  0x77   : > { %v2225_v43 = vpack.c.b16 %v2203_v23, %v2202_v10  ;;  %v2200_v55 = vunpack.c.l.b16 %v763_v61  ;;  %v793_v22 = vrot.slane %v4152_v13, 5  ;;  %v3385_v24 = vrot.slane %v648_v15, 9  ;;  %v3392_v61 = vld [vmem:[%s3938_s19 + $0x18] sm:$0xf]  ;;  %v4336_v23 = vld [vmem:[%s3938_s19 + $0x1c] sm:$0xf] }
  0x78   : > { %2252 = vrot.lane.b32.xlu2 %v2226_v7, %s3887_s21  ;;  %v801_v40 = vsel %vm4168_vm5, %v799_v20, %v800_v31  ;;  %v2210_v27 = vunpack.c.l.b16 %v798_v19  ;;  %v791_v30 = vsel %vm4168_vm5, %v3386_v6, %v790_v37  ;;  %v792_v1 = vrot.slane %v790_v37, 4  ;;  %v4317_v21 = vpop.permute.xlu2 %2160  ;;  %v3406_v7 = vld [vmem:[%s3938_s19 + $0x6c] sm:$0xf]  ;;  %v3786_v31 = vld [vmem:[%s3938_s19 + $0x18] sm:$0xff] }
  0x79   : > { %v2201_v63 = vunpack.c.l.b16 %v766_v18  ;;  %v2211_v11 = vunpack.c.l.b16 %v801_v40  ;;  %v783_v2 = vrot.slane %v4074_v28, 5  ;;  %v786_v13 = vrot.slane %v4077_v29, 5  ;;  %v3790_v6 = vld [vmem:[%s3938_s19 + $0x48] sm:$0xff]  ;;  %v4346_v40 = vld [vmem:[%s3938_s19 + $0x74] sm:$0x1] }
  0x7a   : > { %2242 = vrot.lane.b32.xlu0 %v2221_v17, %s3887_s21  ;;  %v794_v12 = vsel %vm4168_vm5, %v792_v1, %v793_v22  ;;  %v2208_v32 = vunpack.c.l.b16 %v791_v30  ;;  %v3389_v34 = vrot.slane %v652_v36, 9  ;;  %v811_v39 = vrot.slane %v4184_v25, 5  ;;  %v3390_v36 = vld [vmem:[%s3938_s19 + $0xc] sm:$0xf]  ;;  %v4349_v1 = vld [vmem:[%s3938_s19 + $0x20] sm:$0x1] }
  0x7b   : > { %2250 = vrot.lane.b32.xlu1 %v2225_v43, %s3887_s21  ;;  %v2209_v16 = vunpack.c.l.b16 %v794_v12  ;;  %v784_v38 = vsel %vm4168_vm5, %v3385_v24, %v783_v2  ;;  %v785_v41 = vrot.slane %v783_v2, 4  ;;  %v814_v56 = vrot.slane %v4192_v35, 5 }
  0x7c   : > { %v2229_v28 = vpack.c.b16 %v2211_v11, %v2210_v27  ;;  %v2206_v42 = vunpack.c.l.b16 %v784_v38  ;;  %v813_v29 = vrot.slane %v811_v39, 4  ;;  %v2224_v45 = vpack.c.b16 %v2201_v63, %v2200_v55  ;;  %v4356_v38 = vld [vmem:[%s3938_s19 + $0x10] sm:$0xf] }
  0x7d   : > { %v787_v46 = vsel %vm4168_vm5, %v785_v41, %v786_v13  ;;  %v2228_v62 = vpack.c.b16 %v2209_v16, %v2208_v32  ;;  %v804_v25 = vrot.slane %v4119_v57, 5  ;;  %v812_v49 = vsel %vm4168_vm5, %v3389_v34, %v811_v39  ;;  %v3773_v13 = vld [vmem:[%s3938_s19 + $0x30] sm:$0xff] }
  0x7e   : > { %v2207_v47 = vunpack.c.l.b16 %v787_v46  ;;  %v815_v50 = vsel %vm4168_vm5, %v813_v29, %v814_v56  ;;  %v3388_v9 = vrot.slane %v651_v48, 9  ;;  %v2214_v58 = vunpack.c.l.b16 %v812_v49  ;;  %v3774_v29 = vld [vmem:[%s3938_s19 + $0x3c] sm:$0xff] }
  0x7f   : > { %v2215_v44 = vunpack.c.l.b16 %v815_v50  ;;  %v806_v51 = vrot.slane %v804_v25, 4  ;;  %v807_v57 = vrot.slane %v4122_v59, 5  ;;  %v1061_v15 = vshrl.u32 %v3406_v7, 16  ;;  %v3777_v49 = vld [vmem:[%s3938_s19 + $0x60] sm:$0xff]  ;;  %v3771_v50 = vld [vmem:[%s3938_s19 + $0x18] sm:$0xff] }
  0x80   : > { %2258 = vrot.lane.b32.xlu2 %v2229_v28, %s3887_s21  ;;  %v2227_v35 = vpack.c.b16 %v2207_v47, %v2206_v42  ;;  %v805_v54 = vsel %vm4168_vm5, %v3388_v9, %v804_v25  ;;  %v1064_v17 = vshll.u32 %v3406_v7, 16  ;;  %v1070_v18 = vshll.u32 %v4331_v8, 16  ;;  %v3794_v25 = vld [vmem:[%s3938_s19 + $0x78] sm:$0xff] }
  0x81   : > { %v2231_v53 = vpack.c.b16 %v2215_v44, %v2214_v58  ;;  %v808_v0 = vsel %vm4168_vm5, %v806_v51, %v807_v57  ;;  %v2212_v59 = vunpack.c.l.b16 %v805_v54  ;;  %v1074_v19 = vshrl.u32 %v4331_v8, 16  ;;  %v3789_v51 = vld [vmem:[%s3938_s19 + $0x3c] sm:$0xff]  ;;  %v3793_v54 = vld [vmem:[%s3938_s19 + $0x6c] sm:$0xff] }
  0x82   : > { %2248 = vrot.lane.b32.xlu0 %v2224_v45, %s3887_s21  ;;  %v2213_v33 = vunpack.c.l.b16 %v808_v0  ;;  %v893_v20 = vshrl.u32 %v3392_v61, 16  ;;  %v896_v37 = vshll.u32 %v3392_v61, 16  ;;  %v1063_v43 = vrot.slane %v1061_v15, 4 }
  0x83   : > { %2256 = vrot.lane.b32.xlu1 %v2228_v62, %s3887_s21  ;;  %v1066_v55 = vrot.slane %v1064_v17, 5  ;;  %v902_v22 = vshll.u32 %v4336_v23, 16  ;;  %v906_v24 = vshrl.u32 %v4336_v23, 16  ;;  %v1072_v27 = vrot.slane %v1070_v18, 5  ;;  %v4398_v18 = vld [vmem:[%s3938_s19 + $0xa0] sm:$0xf] }
  0x84   : > { %v2230_v10 = vpack.c.b16 %v2213_v33, %v2212_v59  ;;  %v1076_v30 = vrot.slane %v1074_v19, 4  ;;  %v1080_v11 = vshll.u32 %v4346_v40, 16  ;;  %v895_v2 = vrot.slane %v893_v20, 4  ;;  %v3780_v19 = vld [vmem:[%s3938_s19 + $0x84] sm:$0xff] }
  0x85   : > { %v1067_v63 = vor.u32 %v1066_v55, %v1063_v43  ;;  %v898_v34 = vrot.slane %v896_v37, 5  ;;  %v904_v39 = vrot.slane %v902_v22, 5  ;;  %v908_v16 = vrot.slane %v906_v24, 4  ;;  %v3772_v20 = vld [vmem:[%s3938_s19 + $0x24] sm:$0xff] }
  0x86   : > { %v4326_v4 = vpop.permute.xlu2 %2162  ;;  %v1077_v32 = vor.u32 %v1076_v30, %v1072_v27  ;;  %v1082_v56 = vrot.slane %v1080_v11, 5  ;;  %v912_v28 = vshll.u32 %v4349_v1, 16  ;;  %v869_v42 = vshrl.u32 %v3390_v36, 16  ;;  %v4408_v22 = vld [vmem:[%s3938_s19 + $0xa4] sm:$0x1] }
  0x87   : > { %v1068_v41 = vrot.slane %v1067_v63, 4  ;;  %v899_v62 = vor.u32 %v898_v34, %v895_v2  ;;  %v909_v47 = vor.u32 %v908_v16, %v904_v39  ;;  %v872_v48 = vshll.u32 %v3390_v36, 16  ;;  %v3450_v63 = vld [vmem:[%s3938_s19 + $0x9c] sm:$0xe]  ;;  %v3446_v11 = vld [vmem:[%s3938_s19 + $0x6c] sm:$0xe] }
  0x88   : > { %2328 = vrot.lane.b32.xlu2 %v3785_v52, %s3888_s22  ;;  %v1078_v46 = vrot.slane %v1077_v32, 4  ;;  %v871_v9 = vrot.slane %v869_v42, 4  ;;  %v878_v58 = vshll.u32 %v4356_v38, 16  ;;  %v4367_v44 = vsel %vm2776_vm6, %v3773_v13, %v4317_v21  ;;  %v3797_v16 = vld [vmem:[%s3938_s19 + $0x9c] sm:$0xff] }
  0x89   : > { %v900_v57 = vrot.slane %v899_v62, 4  ;;  %v910_v52 = vrot.slane %v909_v47, 4  ;;  %v1073_v59 = vsel %vm3966_vm2, %v1068_v41, %v1072_v27  ;;  %v882_v21 = vshrl.u32 %v4356_v38, 16 }
  0x8a   : > { %2254 = vrot.lane.b32.xlu0 %v2227_v35, %s3887_s21  ;;  %v914_v35 = vrot.slane %v912_v28, 5  ;;  %v1083_v33 = vsel %vm3966_vm2, %v1078_v46, %v1082_v56  ;;  %v880_v61 = vrot.slane %v878_v58, 5  ;;  %v4403_v37 = vunpack.c.l.b16 %v1073_v59 }
  0x8b   : > { %2262 = vrot.lane.b32.xlu1 %v2231_v53, %s3887_s21  ;;  %v4371_v53 = vld [vmem:[%s3938_s19 + $0x14] sm:$0x1]  ;;  %v4405_v43 = vunpack.c.l.b16 %v1083_v33  ;;  %v884_v55 = vrot.slane %v882_v21, 4  ;;  %v1402_v24 = vrot.slane %v4398_v18, 5  ;;  %v3466_v32 = vrot.slane %v3450_v63, 9  ;;  %v3800_v63 = vld [vmem:[%s3938_s19 + $0xc0] sm:$0xff] }
  0x8c   : > { %v915_v7 = vsel %vm3966_vm2, %v910_v52, %v914_v35  ;;  %v3462_v28 = vrot.slane %v3446_v11, 9  ;;  %v1374_v42 = vrot.slane %v4331_v8, 5 }
  0x8d   : > { %v4414_v27 = vunpack.c.l.b16 %v915_v7  ;;  %v1404_v34 = vrot.slane %v1402_v24, 4  ;;  %v1403_v47 = vsel %vm4168_vm5, %v3466_v32, %v1402_v24  ;;  %v2400_v8 = vpack.c.b16 %v4405_v43, %v4403_v37 }
  0x8e   : > { %v4445_v58 = vsel %vm4168_vm5, %v3462_v28, %v1374_v42  ;;  %v2464_v33 = vunpack.c.l.b16 %v1403_v47  ;;  %v1376_v21 = vrot.slane %v1374_v42, 4  ;;  %v3799_v28 = vld [vmem:[%s3938_s19 + $0xb4] sm:$0xff] }
  0x90   : > { %2334 = vrot.lane.b32.xlu2 %v3788_v3, %s3888_s22  ;;  %v874_v3 = vrot.slane %v872_v48, 5 }
  0x92   : > { %2260 = vrot.lane.b32.xlu0 %v2230_v10, %s3887_s21  ;;  %v4381_v10 = vsel %vm2776_vm6, %v3774_v29, %v4326_v4  ;;  %v875_v4 = vor.u32 %v874_v3, %v871_v9  ;;  %v3792_v29 = vld [vmem:[%s3938_s19 + $0x60] sm:$0xff]  ;;  %v3770_v9 = vld [vmem:[%s3938_s19 + $0xc] sm:$0xff] }
  0x93   : > { %2332 = vrot.lane.b32.xlu1 %v3787_v5, %s3888_s22  ;;  %v905_v5 = vsel %vm3966_vm2, %v900_v57, %v904_v39  ;;  %v1405_v39 = vrot.slane %v4408_v22, 5 }
  0x94   : > { %v2157_v12 = vpop.permute.xlu1 %2156  ;;  %v2169_v45 = vpop.permute.xlu2 %2168  ;;  %v4412_v36 = vunpack.c.l.b16 %v905_v5  ;;  %v876_v30 = vrot.slane %v875_v4, 4  ;;  %v1176_v4 = vshll.u32 %v4408_v22, 16 }
  0x95   : > { %v4390_v15 = vsel %vm2776_vm6, %v3777_v49, %v2169_v45  ;;  %v4393_v17 = vsel %vm2776_vm6, %v3771_v50, %v2157_v12  ;;  %v885_v12 = vor.u32 %v884_v55, %v880_v61  ;;  %v1406_v48 = vsel %vm4168_vm5, %v1404_v34, %v1405_v39 }
  0x96   : > { %v881_v46 = vsel %vm3966_vm2, %v876_v30, %v880_v61  ;;  %v2393_v35 = vpack.c.b16 %v4414_v27, %v4412_v36  ;;  %v2465_v3 = vunpack.c.l.b16 %v1406_v48  ;;  %v1170_v61 = vshrl.u32 %v4398_v18, 16 }
  0x97   : > { %v886_v62 = vrot.slane %v885_v12, 4  ;;  %v4450_v59 = vunpack.c.l.b16 %v881_v46  ;;  %v3795_v12 = vld [vmem:[%s3938_s19 + $0x84] sm:$0xff] }
  0x98   : > { %2340 = vrot.lane.b32.xlu2 %v3791_v14, %s3888_s22  ;;  %v2153_v0 = vpop.permute.xlu0 %2152  ;;  %v3414_v14 = vld [vmem:[%s3938_s19 + $0x9c] sm:$0xf]  ;;  %v1172_v30 = vrot.slane %v1170_v61, 4  ;;  %v4481_v48 = vpack.c.b16 %v2465_v3, %v2464_v33  ;;  %v3530_v33 = vld [vmem:[%s3938_s19 + $0xa8] sm:$0xe] }
  0x99   : > { %v1157_v2 = vshrl.u32 %v3414_v14, 16  ;;  %v1160_v52 = vshll.u32 %v3414_v14, 16  ;;  %v4458_v14 = vld [vmem:[%s3938_s19 + $0x7c] sm:$0xf] }
  0x9a   : > { %2330 = vrot.lane.b32.xlu0 %v3786_v31, %s3888_s22  ;;  %v3769_v31 = vld [vmem:[%s3938_s19] sm:$0xff]  ;;  %v1682_v22 = vshll.u32 %v4458_v14, 16  ;;  %v1686_v39 = vshrl.u32 %v4458_v14, 16 }
  0x9b   : > { %2338 = vrot.lane.b32.xlu1 %v3790_v6, %s3888_s22  ;;  %v888_v6 = vshll.u32 %v4371_v53, 16  ;;  %v4421_v41 = vsel %vm2776_vm6, %v3769_v31, %v2153_v0  ;;  %v1159_v57 = vrot.slane %v1157_v2, 4  ;;  %v1162_v7 = vrot.slane %v1160_v52, 5  ;;  %v3495_v52 = vld [vmem:[%s3938_s19 + $0xac] sm:$0xf] }
  0x9c   : > { %v2456_v31 = vunpack.c.l.b16 %v4445_v58  ;;  %v1684_v46 = vrot.slane %v1682_v22, 5  ;;  %v1688_v58 = vrot.slane %v1686_v39, 4  ;;  %v2014_v3 = vrot.slane %v3495_v52, 5 }
  0x9d   : > { %v890_v56 = vrot.slane %v888_v6, 5  ;;  %v4464_v6 = vld [vmem:[%s3938_s19 + $0x80] sm:$0x1]  ;;  %v1163_v24 = vor.u32 %v1162_v7, %v1159_v57  ;;  %v4489_v7 = vld [vmem:[%s3938_s19 + $0xb0] sm:$0x1] }
  0x9f   : > { %v891_v5 = vsel %vm3966_vm2, %v886_v62, %v890_v56  ;;  %v3494_v56 = vld [vmem:[%s3938_s19 + $0xa8] sm:$0xf]  ;;  %v1164_v42 = vrot.slane %v1163_v24, 4  ;;  %v3526_v24 = vld [vmem:[%s3938_s19 + $0x78] sm:$0xe] }
  0xa0   : > { %2346 = vrot.lane.b32.xlu2 %v3794_v25, %s3888_s22  ;;  %v3796_v25 = vld [vmem:[%s3938_s19 + $0x90] sm:$0xff]  ;;  %v4474_v32 = vunpack.c.l.b16 %v891_v5  ;;  %v3783_v62 = vld [vmem:[%s3938_s19 + $0xa8] sm:$0xff]  ;;  %v1689_v5 = vor.u32 %v1688_v58, %v1684_v46 }
  0xa2   : > { %2336 = vrot.lane.b32.xlu0 %v3789_v51, %s3888_s22  ;;  %v2159_v13 = vpop.permute.xlu1 %2158  ;;  %v2175_v45 = vpop.permute.xlu2 %2174  ;;  %v1377_v51 = vrot.slane %v4346_v40, 5  ;;  %v1166_v40 = vshll.u32 %v4398_v18, 16 }
  0xa3   : > { %2344 = vrot.lane.b32.xlu1 %v3793_v54, %s3888_s22  ;;  %v4433_v49 = vsel %vm2776_vm6, %v3780_v19, %v2175_v45  ;;  %v4436_v50 = vsel %vm2776_vm6, %v3772_v20, %v2159_v13  ;;  %v3486_v54 = vld [vmem:[%s3938_s19 + $0x78] sm:$0xf] }
  0xa4   : > { %v1673_v19 = vshrl.u32 %v3486_v54, 16  ;;  %v1676_v20 = vshll.u32 %v3486_v54, 16  ;;  %v1168_v18 = vrot.slane %v1166_v40, 5  ;;  %v1378_v11 = vsel %vm4168_vm5, %v1376_v21, %v1377_v51 }
  0xa5   : > { %v1769_v54 = vshrl.u32 %v3494_v56, 16  ;;  %v2392_v21 = vpack.c.b16 %v4474_v32, %v4450_v59  ;;  %v1986_v40 = vrot.slane %v4458_v14, 5  ;;  %v3542_v14 = vrot.slane %v3526_v24, 9 }
  0xa6   : > { %v1675_v2 = vrot.slane %v1673_v19, 4  ;;  %v1678_v13 = vrot.slane %v1676_v20, 5  ;;  %v1173_v34 = vor.u32 %v1172_v30, %v1168_v18  ;;  %v1169_v61 = vsel %vm3966_vm2, %v1164_v42, %v1168_v18 }
  0xa7   : > { %v3546_v19 = vrot.slane %v3530_v33, 9  ;;  %v2017_v20 = vrot.slane %v4489_v7, 5  ;;  %v1988_v22 = vrot.slane %v1986_v40, 4  ;;  %v4534_v33 = vld [vmem:[%s3938_s19 + $0x40] sm:$0xf] }
  0xa8   : > { %2352 = vrot.lane.b32.xlu2 %v3797_v16, %s3888_s22  ;;  %v2155_v0 = vpop.permute.xlu0 %2154  ;;  %v1692_v16 = vshll.u32 %v4464_v6, 16  ;;  %v1679_v45 = vor.u32 %v1678_v13, %v1675_v2  ;;  %v1346_v37 = vrot.slane %v4534_v33, 5  ;;  %v978_v59 = vshrl.u32 %v4534_v33, 16 }
  0xa9   : > { %v4467_v55 = vsel %vm2776_vm6, %v3770_v9, %v2155_v0  ;;  %v1174_v9 = vrot.slane %v1173_v34, 4  ;;  %v1772_v0 = vshll.u32 %v3494_v56, 16  ;;  %v2015_v18 = vsel %vm4168_vm5, %v3546_v19, %v2014_v3  ;;  %v3798_v34 = vld [vmem:[%s3938_s19 + $0xa8] sm:$0xff] }
  0xaa   : > { %2342 = vrot.lane.b32.xlu0 %v3792_v29, %s3888_s22  ;;  %v1178_v29 = vrot.slane %v1176_v4, 5  ;;  %v1680_v51 = vrot.slane %v1679_v45, 4  ;;  %v1694_v57 = vrot.slane %v1692_v16, 5  ;;  %v3776_v45 = vld [vmem:[%s3938_s19 + $0x54] sm:$0xff] }
  0xab   : > { %2350 = vrot.lane.b32.xlu1 %v3796_v25, %s3888_s22  ;;  %v2457_v25 = vunpack.c.l.b16 %v1378_v11  ;;  %v2016_v11 = vrot.slane %v2014_v3, 4 }
  0xac   : > { %v1179_v4 = vsel %vm3966_vm2, %v1174_v9, %v1178_v29  ;;  %v1685_v30 = vsel %vm3966_vm2, %v1680_v51, %v1684_v46  ;;  %v3775_v9 = vld [vmem:[%s3938_s19 + $0x48] sm:$0xff] }
  0xad   : > { %v4502_v13 = vpack.c.b16 %v2457_v25, %v2456_v31  ;;  %v2018_v56 = vsel %vm4168_vm5, %v2016_v11, %v2017_v20  ;;  %v1987_v31 = vsel %vm4168_vm5, %v3542_v14, %v1986_v40  ;;  %v4519_v42 = vunpack.c.l.b16 %v1179_v4  ;;  %v3442_v4 = vld [vmem:[%s3938_s19 + $0x3c] sm:$0xe]  ;;  %v3438_v20 = vld [vmem:[%s3938_s19 + $0xc] sm:$0xe] }
  0xae   : > { %v1774_v25 = vrot.slane %v1772_v0, 5  ;;  %v2721_v58 = vunpack.c.l.b16 %v2018_v56  ;;  %v2712_v51 = vunpack.c.l.b16 %v1987_v31  ;;  %v1788_v0 = vshll.u32 %v4489_v7, 16  ;;  %v3398_v14 = vld [vmem:[%s3938_s19 + $0x3c] sm:$0xf] }
  0xaf   : > { %v3458_v7 = vrot.slane %v3442_v4, 9 }
  0xb0   : > { %v2181_v47 = vpop.permute.xlu2 %2180  ;;  %2358 = vrot.lane.b32.xlu2 %v3800_v63, %s3888_s22  ;;  %v1690_v63 = vrot.slane %v1689_v5, 4  ;;  %v2167_v2 = vpop.permute.xlu1 %2166  ;;  %v1782_v5 = vshrl.u32 %v3495_v52, 16 }
  0xb1   : > { %v4509_v39 = vsel %vm2776_vm6, %v3783_v62, %v2181_v47  ;;  %v2720_v62 = vunpack.c.l.b16 %v2015_v18  ;;  %v1771_v47 = vrot.slane %v1769_v54, 4  ;;  %v4553_v24 = vsel %vm2776_vm6, %v3776_v45, %v2167_v2 }
  0xb2   : > { %2348 = vrot.lane.b32.xlu0 %v3795_v12, %s3888_s22  ;;  %v1989_v12 = vrot.slane %v4464_v6, 5  ;;  %v1695_v16 = vsel %vm3966_vm2, %v1690_v63, %v1694_v57  ;;  %v4521_v6 = vunpack.c.l.b16 %v1685_v30  ;;  %v1778_v57 = vshll.u32 %v3495_v52, 16 }
  0xb3   : > { %2356 = vrot.lane.b32.xlu1 %v3799_v28, %s3888_s22  ;;  %v4517_v28 = vunpack.c.l.b16 %v1169_v61  ;;  %v4526_v46 = vunpack.c.l.b16 %v1695_v16  ;;  %v1775_v40 = vor.u32 %v1774_v25, %v1771_v47  ;;  %v4539_v61 = vld [vmem:[%s3938_s19 + $0x44] sm:$0x1]  ;;  %v1784_v19 = vrot.slane %v1782_v5, 4 }
  0xb4   : > { %v1990_v29 = vsel %vm4168_vm5, %v1988_v22, %v1989_v12  ;;  %v1780_v52 = vrot.slane %v1778_v57, 5  ;;  %v1348_v63 = vrot.slane %v1346_v37, 4  ;;  %v1349_v11 = vrot.slane %v4539_v61, 5  ;;  %v3779_v22 = vld [vmem:[%s3938_s19 + $0x78] sm:$0xff] }
  0xb5   : > { %v2713_v54 = vunpack.c.l.b16 %v1990_v29  ;;  %v1776_v30 = vrot.slane %v1775_v40, 4  ;;  %v2404_v36 = vpack.c.b16 %v4519_v42, %v4517_v28  ;;  %v2656_v2 = vpack.c.b16 %v4526_v46, %v4521_v6 }
  0xb6   : > { %v1785_v27 = vor.u32 %v1784_v19, %v1780_v52  ;;  %v1350_v12 = vsel %vm4168_vm5, %v1348_v63, %v1349_v11  ;;  %v4570_v56 = vpack.c.b16 %v2721_v58, %v2720_v62  ;;  %v1790_v29 = vrot.slane %v1788_v0, 5  ;;  %v4613_v19 = vld [vmem:[%s3938_s19 + $0x20] sm:$0x1]  ;;  %v3478_v63 = vld [vmem:[%s3938_s19 + $0x48] sm:$0xf] }
  0xb7   : > { %v4572_v31 = vpack.c.b16 %v2713_v54, %v2712_v51  ;;  %v965_v25 = vshrl.u32 %v3398_v14, 16  ;;  %v2449_v6 = vunpack.c.l.b16 %v1350_v12  ;;  %v1321_v62 = vrot.slane %v4371_v53, 5  ;;  %v3470_v51 = vld [vmem:[%s3938_s19 + $0x18] sm:$0xf]  ;;  %v3813_v11 = vld [vmem:[%s3938_s19 + $0xa8] sm:$0xff] }
  0xb8   : > { %2424 = vrot.lane.b32.xlu2 %v2400_v8, %s3889_s23  ;;  %v2165_v8 = vpop.permute.xlu0 %2164  ;;  %v1786_v45 = vrot.slane %v1785_v27, 4  ;;  %v974_v58 = vshll.u32 %v4534_v33, 16  ;;  %v984_v32 = vshll.u32 %v4539_v61, 16  ;;  %v980_v61 = vrot.slane %v978_v59, 4 }
  0xb9   : > { %v2235_v3 = vpop.permute.xlu2 %2234  ;;  %v4563_v18 = vsel %vm2776_vm6, %v3775_v9, %v2165_v8  ;;  %v968_v9 = vshll.u32 %v3398_v14, 16 }
  0xba   : > { %2354 = vrot.lane.b32.xlu0 %v3798_v34, %s3888_s22  ;;  %v4549_v43 = vsel %vm2825_vm7, %v4467_v55, %v2235_v3  ;;  %v1318_v55 = vrot.slane %v4356_v38, 5  ;;  %v3454_v34 = vrot.slane %v3438_v20, 9  ;;  %v1781_v38 = vsel %vm3966_vm2, %v1776_v30, %v1780_v52 }
  0xbb   : > { %2410 = vrot.lane.b32.xlu1 %v2393_v35, %s3889_s23  ;;  %v1347_v35 = vsel %vm4168_vm5, %v3458_v7, %v1346_v37  ;;  %v970_v3 = vrot.slane %v968_v9, 5  ;;  %v4594_v54 = vunpack.c.l.b16 %v1781_v38  ;;  %v976_v40 = vrot.slane %v974_v58, 5  ;;  %v3522_v58 = vld [vmem:[%s3938_s19 + $0x48] sm:$0xe] }
  0xbc   : > { %v2448_v47 = vunpack.c.l.b16 %v1347_v35  ;;  %v1320_v46 = vrot.slane %v1318_v55, 4  ;;  %v4590_v5 = vsel %vm4168_vm5, %v3454_v34, %v1318_v55  ;;  %v1791_v4 = vsel %vm3966_vm2, %v1786_v45, %v1790_v29 }
  0xbd   : > { %v1481_v37 = vshrl.u32 %v3470_v51, 16  ;;  %v2440_v52 = vunpack.c.l.b16 %v4590_v5  ;;  %v1484_v30 = vshll.u32 %v3470_v51, 16  ;;  %v4618_v27 = vunpack.c.l.b16 %v1791_v4  ;;  %v3778_v5 = vld [vmem:[%s3938_s19 + $0x6c] sm:$0xff] }
  0xbe   : > { %v2173_v16 = vpop.permute.xlu1 %2172  ;;  %v4607_v8 = vpack.c.b16 %v2449_v6, %v2448_v47  ;;  %v1322_v33 = vsel %vm4168_vm5, %v1320_v46, %v1321_v62  ;;  %v981_v35 = vor.u32 %v980_v61, %v976_v40  ;;  %v986_v55 = vrot.slane %v984_v32, 5  ;;  %v4635_v62 = vld [vmem:[%s3938_s19 + $0x50] sm:$0x1] }
  0xbf   : > { %v4586_v57 = vsel %vm2776_vm6, %v3779_v22, %v2173_v16  ;;  %v1483_v20 = vrot.slane %v1481_v37, 4  ;;  %v1486_v34 = vrot.slane %v1484_v30, 5  ;;  %v1500_v38 = vshll.u32 %v4613_v19, 16  ;;  %v3809_v30 = vld [vmem:[%s3938_s19 + $0x78] sm:$0xff] }
  0xc0   : > { %2512 = vrot.lane.b32.xlu2 %v4481_v48, %s3890_s24  ;;  %v967_v48 = vrot.slane %v965_v25, 4  ;;  %v2441_v29 = vunpack.c.l.b16 %v1322_v33  ;;  %v982_v45 = vrot.slane %v981_v35, 4  ;;  %v4626_v25 = vld [vmem:[%s3938_s19 + $0x4c] sm:$0xf]  ;;  %v1577_v9 = vshrl.u32 %v3478_v63, 16 }
  0xc1   : > { %v1487_v46 = vor.u32 %v1486_v34, %v1483_v20  ;;  %v1580_v51 = vshll.u32 %v3478_v63, 16  ;;  %v1502_v4 = vrot.slane %v1500_v38, 5 }
  0xc2   : > { %2408 = vrot.lane.b32.xlu0 %v2392_v21, %s3889_s23  ;;  %v2241_v53 = vpop.permute.xlu2 %2240  ;;  %v4599_v21 = vld [vmem:[%s3938_s19 + $0x1c] sm:$0xf]  ;;  %v987_v28 = vsel %vm3966_vm2, %v982_v45, %v986_v55  ;;  %v4665_v55 = vpack.c.b16 %v2441_v29, %v2440_v52  ;;  %v1579_v29 = vrot.slane %v1577_v9, 4 }
  0xc3   : > { %2504 = vrot.lane.b32.xlu1 %v4502_v13, %s3890_s24  ;;  %v4603_v0 = vsel %vm2825_vm7, %v4367_v44, %v2241_v53  ;;  %v971_v13 = vor.u32 %v970_v3, %v967_v48  ;;  %v1490_v44 = vshll.u32 %v4599_v21, 16  ;;  %v1494_v14 = vshrl.u32 %v4599_v21, 16  ;;  %v3518_v53 = vld [vmem:[%s3938_s19 + $0x18] sm:$0xe] }
  0xc4   : > { %v2171_v22 = vpop.permute.xlu0 %2170  ;;  %v1961_v3 = vrot.slane %v4635_v62, 5  ;;  %v1488_v32 = vrot.slane %v1487_v46, 4  ;;  %v4650_v33 = vunpack.c.l.b16 %v987_v28  ;;  %v1930_v20 = vrot.slane %v4599_v21, 5 }
  0xc5   : > { %v972_v7 = vrot.slane %v971_v13, 4  ;;  %v1492_v16 = vrot.slane %v1490_v44, 5  ;;  %v1496_v47 = vrot.slane %v1494_v14, 4  ;;  %v2660_v44 = vpack.c.b16 %v4618_v27, %v4594_v54 }
  0xc6   : > { %v4663_v35 = vsel %vm2776_vm6, %v3778_v5, %v2171_v22  ;;  %v1932_v38 = vrot.slane %v1930_v20, 4  ;;  %v1582_v45 = vrot.slane %v1580_v51, 5  ;;  %v1596_v28 = vshll.u32 %v4635_v62, 16 }
  0xc7   : > { %v977_v12 = vsel %vm3966_vm2, %v972_v7, %v976_v40  ;;  %v1497_v42 = vor.u32 %v1496_v47, %v1492_v16  ;;  %v3782_v40 = vld [vmem:[%s3938_s19 + $0x9c] sm:$0xff] }
  0xc8   : > { %2680 = vrot.lane.b32.xlu2 %v2656_v2, %s3891_s25  ;;  %v4632_v6 = vunpack.c.l.b16 %v977_v12  ;;  %v1958_v2 = vrot.slane %v4626_v25, 5 }
  0xc9   : > { %v1498_v61 = vrot.slane %v1497_v42, 4  ;;  %v3416_v42 = vld [vmem:[%s3938_s19 + $0xa8] sm:$0xf] }
  0xca   : > { %2432 = vrot.lane.b32.xlu0 %v2404_v36, %s3889_s23  ;;  %v2247_v48 = vpop.permute.xlu2 %2246  ;;  %v3538_v36 = vrot.slane %v3522_v58, 9  ;;  %v1960_v13 = vrot.slane %v1958_v2, 4  ;;  %v2396_v52 = vpack.c.b16 %v4650_v33, %v4632_v6  ;;  %v1590_v58 = vshrl.u32 %v4626_v25, 16 }
  0xcb   : > { %2608 = vrot.lane.b32.xlu1 %v3813_v11, %s3892_s26  ;;  %v4648_v59 = vsel %vm2825_vm7, %v4553_v24, %v2247_v48  ;;  %v1493_v24 = vsel %vm3966_vm2, %v1488_v32, %v1492_v16  ;;  %v3534_v11 = vrot.slane %v3518_v53, 9  ;;  %v1503_v34 = vsel %vm3966_vm2, %v1498_v61, %v1502_v4  ;;  %v4700_v53 = vld [vmem:[%s3938_s19 + $0x7c] sm:$0xf]  ;;  %v4704_v61 = vld [vmem:[%s3938_s19 + $0x80] sm:$0x1] }
  0xcc   : > { %v1959_v7 = vsel %vm4168_vm5, %v3538_v36, %v1958_v2  ;;  %v1962_v63 = vsel %vm4168_vm5, %v1960_v13, %v1961_v3  ;;  %v1933_v16 = vrot.slane %v4613_v19, 5  ;;  %v4677_v22 = vunpack.c.l.b16 %v1493_v24  ;;  %v3447_v2 = vld [vmem:[%s3938_s19 + $0x78] sm:$0xe] }
  0xcd   : > { %v2179_v37 = vpop.permute.xlu1 %2178  ;;  %v2704_v14 = vunpack.c.l.b16 %v1959_v7  ;;  %v2705_v12 = vunpack.c.l.b16 %v1962_v63  ;;  %v1931_v46 = vsel %vm4168_vm5, %v3534_v11, %v1930_v20  ;;  %v4689_v51 = vunpack.c.l.b16 %v1503_v34  ;;  %v3408_v63 = vld [vmem:[%s3938_s19 + $0x78] sm:$0xf]  ;;  %v4719_v34 = vld [vmem:[%s3938_s19 + $0xb0] sm:$0x1] }
  0xce   : > { %v4668_v21 = vsel %vm2776_vm6, %v3782_v40, %v2179_v37  ;;  %v1934_v19 = vsel %vm4168_vm5, %v1932_v38, %v1933_v16  ;;  %v1583_v48 = vor.u32 %v1582_v45, %v1579_v29  ;;  %v1592_v3 = vrot.slane %v1590_v58, 4  ;;  %v3781_v40 = vld [vmem:[%s3938_s19 + $0x90] sm:$0xff] }
  0xcf   : > { %v4691_v5 = vpack.c.b16 %v2705_v12, %v2704_v14  ;;  %v2696_v4 = vunpack.c.l.b16 %v1931_v46  ;;  %v2697_v13 = vunpack.c.l.b16 %v1934_v19  ;;  %v1381_v62 = vrot.slane %v4700_v53, 5 }
  0xd0   : > { %2768 = vrot.lane.b32.xlu2 %v4570_v56, %s3893_s27  ;;  %v1586_v56 = vshll.u32 %v4626_v25, 16  ;;  %v1584_v37 = vrot.slane %v1583_v48, 4  ;;  %v1384_v20 = vrot.slane %v4704_v61, 5  ;;  %v1181_v24 = vshrl.u32 %v3416_v42, 16 }
  0xd1   : > { %v2648_v11 = vpack.c.b16 %v4689_v51, %v4677_v22  ;;  %v1598_v14 = vrot.slane %v1596_v28, 5  ;;  %v1383_v12 = vrot.slane %v1381_v62, 4  ;;  %v1184_v38 = vshll.u32 %v3416_v42, 16 }
  0xd2   : > { %2600 = vrot.lane.b32.xlu0 %v3809_v30, %s3892_s26  ;;  %v2177_v47 = vpop.permute.xlu0 %2176  ;;  %v2253_v9 = vpop.permute.xlu2 %2252  ;;  %v1588_v25 = vrot.slane %v1586_v56, 5  ;;  %v4713_v30 = vld [vmem:[%s3938_s19 + $0xac] sm:$0xf]  ;;  %v1183_v45 = vrot.slane %v1181_v24, 4 }
  0xd3   : > { %2760 = vrot.lane.b32.xlu1 %v4572_v31, %s3893_s27  ;;  %v4697_v36 = vsel %vm2825_vm7, %v4586_v57, %v2253_v9  ;;  %v3463_v31 = vrot.slane %v3447_v2, 9  ;;  %v1385_v22 = vsel %vm4168_vm5, %v1383_v12, %v1384_v20  ;;  %v1186_v46 = vrot.slane %v1184_v38, 5  ;;  %v3805_v20 = vld [vmem:[%s3938_s19 + $0x48] sm:$0xff] }
  0xd4   : > { %v1593_v7 = vor.u32 %v1592_v3, %v1588_v25  ;;  %v1589_v16 = vsel %vm3966_vm2, %v1584_v37, %v1588_v25  ;;  %v1190_v19 = vshll.u32 %v4713_v30, 16  ;;  %v1194_v56 = vshrl.u32 %v4713_v30, 16 }
  0xd5   : > { %v2233_v32 = vpop.permute.xlu1 %2232  ;;  %v1382_v29 = vsel %vm4168_vm5, %v3463_v31, %v1381_v62  ;;  %v4732_v58 = vsel %vm2776_vm6, %v3781_v40, %v2177_v47  ;;  %v4738_v2 = vpack.c.b16 %v2697_v13, %v2696_v4  ;;  %v1085_v9 = vshrl.u32 %v3408_v63, 16  ;;  %v3451_v13 = vld [vmem:[%s3938_s19 + $0xa8] sm:$0xe] }
  0xd6   : > { %v4709_v57 = vsel %vm2825_vm7, %v4421_v41, %v2233_v32  ;;  %v1594_v41 = vrot.slane %v1593_v7, 4  ;;  %v4743_v48 = vunpack.c.l.b16 %v1589_v16  ;;  %v1187_v28 = vor.u32 %v1186_v46, %v1183_v45 }
  0xd7   : > { %v1192_v47 = vrot.slane %v1190_v19, 5  ;;  %v1196_v42 = vrot.slane %v1194_v56, 4  ;;  %v2459_v3 = vunpack.c.l.b16 %v1385_v22  ;;  %v1087_v4 = vrot.slane %v1085_v9, 4  ;;  %v3527_v9 = vld [vmem:[%s3938_s19 + $0x84] sm:$0xe] }
  0xd8   : > { %2496 = vrot.lane.b32.xlu2 %v4607_v8, %s3890_s24  ;;  %v1200_v8 = vshll.u32 %v4719_v34, 16  ;;  %v1599_v27 = vsel %vm3966_vm2, %v1594_v41, %v1598_v14  ;;  %v1088_v62 = vshll.u32 %v3408_v63, 16  ;;  %v1098_v7 = vshrl.u32 %v4700_v53, 16  ;;  %v3784_v63 = vld [vmem:[%s3938_s19 + $0xb4] sm:$0xff] }
  0xd9   : > { %v1197_v40 = vor.u32 %v1196_v42, %v1192_v47  ;;  %v4759_v24 = vunpack.c.l.b16 %v1599_v27  ;;  %v1104_v38 = vshll.u32 %v4704_v61, 16  ;;  %v1409_v22 = vrot.slane %v4713_v30, 5 }
  0xda   : > { %2688 = vrot.lane.b32.xlu0 %v2660_v44, %s3891_s25  ;;  %v2259_v51 = vpop.permute.xlu2 %2258  ;;  %v2458_v44 = vunpack.c.l.b16 %v1382_v29  ;;  %v1202_v32 = vrot.slane %v1200_v8, 5  ;;  %v1090_v16 = vrot.slane %v1088_v62, 5  ;;  %v3467_v29 = vrot.slane %v3451_v13, 9  ;;  %v3801_v13 = vld [vmem:[%s3938_s19 + $0x18] sm:$0xff] }
  0xdb   : > { %2488 = vrot.lane.b32.xlu1 %v4665_v55, %s3890_s24  ;;  %v4747_v54 = vsel %vm2825_vm7, %v4668_v21, %v2259_v51  ;;  %v1188_v55 = vrot.slane %v1187_v28, 4  ;;  %v1094_v21 = vshll.u32 %v4700_v53, 16  ;;  %v1198_v12 = vrot.slane %v1197_v40, 4  ;;  %v4806_v40 = vld [vmem:[%s3938_s19 + $0x8c] sm:$0x1] }
  0xdc   : > { %v2183_v25 = vpop.permute.xlu0 %2182  ;;  %v4766_v45 = vpack.c.b16 %v2459_v3, %v2458_v44  ;;  %v1412_v46 = vrot.slane %v4719_v34, 5  ;;  %v1091_v19 = vor.u32 %v1090_v16, %v1087_v4  ;;  %v1106_v8 = vrot.slane %v1104_v38, 5  ;;  %v4810_v4 = vld [vmem:[%s3938_s19 + $0xb8] sm:$0xf] }
  0xdd   : > { %v2239_v31 = vpop.permute.xlu1 %2238  ;;  %v1193_v14 = vsel %vm3966_vm2, %v1188_v55, %v1192_v47  ;;  %v1096_v41 = vrot.slane %v1094_v21, 5  ;;  %v1203_v53 = vsel %vm3966_vm2, %v1198_v12, %v1202_v32  ;;  %v1411_v34 = vrot.slane %v1409_v22, 4  ;;  %v3496_v32 = vld [vmem:[%s3938_s19 + $0xb4] sm:$0xf] }
  0xde   : > { %v4754_v37 = vsel %vm2825_vm7, %v4436_v50, %v2239_v31  ;;  %v1100_v50 = vrot.slane %v1098_v7, 4  ;;  %v4776_v61 = vunpack.c.l.b16 %v1193_v14  ;;  %v4783_v30 = vunpack.c.l.b16 %v1203_v53  ;;  %v4823_v7 = vld [vmem:[%s3938_s19 + $0xbc] sm:$0x1] }
  0xdf   : > { %v3543_v6 = vrot.slane %v3527_v9, 9  ;;  %v1092_v47 = vrot.slane %v1091_v19, 4  ;;  %v4792_v27 = vsel %vm4168_vm5, %v3467_v29, %v1409_v22  ;;  %v4795_v44 = vsel %vm2776_vm6, %v3784_v63, %v2183_v25  ;;  %v3488_v29 = vld [vmem:[%s3938_s19 + $0x84] sm:$0xf] }
  0xe0   : > { %2664 = vrot.lane.b32.xlu2 %v2648_v11, %s3891_s25  ;;  %v1101_v56 = vor.u32 %v1100_v50, %v1096_v41  ;;  %v4779_v11 = vld [vmem:[%s3938_s19 + $0x88] sm:$0xf]  ;;  %v2652_v55 = vpack.c.b16 %v4759_v24, %v4743_v48  ;;  %v1996_v21 = vrot.slane %v4806_v40, 5  ;;  %v2466_v14 = vunpack.c.l.b16 %v4792_v27  ;;  %v3439_v27 = vld [vmem:[%s3938_s19 + $0x18] sm:$0xe] }
  0xe1   : > { %v1993_v33 = vrot.slane %v4779_v11, 5  ;;  %v1793_v16 = vshrl.u32 %v3496_v32, 16  ;;  %v1802_v50 = vshll.u32 %v4810_v4, 16  ;;  %v1806_v22 = vshrl.u32 %v4810_v4, 16 }
  0xe2   : > { %2416 = vrot.lane.b32.xlu0 %v2396_v52, %s3889_s23  ;;  %v2329_v51 = vpop.permute.xlu2 %2328  ;;  %v1102_v42 = vrot.slane %v1101_v56, 4 }
  0xe3   : > { %2592 = vrot.lane.b32.xlu1 %v3805_v20, %s3892_s26  ;;  %v4788_v28 = vsel %vm2858_vm8, %v4709_v57, %v2329_v51  ;;  %v1413_v57 = vsel %vm4168_vm5, %v1411_v34, %v1412_v46  ;;  %v2405_v20 = vpack.c.b16 %v4783_v30, %v4776_v61  ;;  %v4830_v12 = vsel %vm4168_vm5, %v3543_v6, %v1993_v33 }
  0xe4   : > { %v2237_v52 = vpop.permute.xlu0 %2236  ;;  %v1107_v62 = vsel %vm3966_vm2, %v1102_v42, %v1106_v8  ;;  %v2467_v38 = vunpack.c.l.b16 %v1413_v57  ;;  %v1812_v46 = vshll.u32 %v4823_v7, 16  ;;  %v2714_v61 = vunpack.c.l.b16 %v4830_v12 }
  0xe5   : > { %v4799_v3 = vsel %vm2825_vm7, %v4393_v17, %v2237_v52  ;;  %v2245_v31 = vpop.permute.xlu1 %2244  ;;  %v1097_v17 = vsel %vm3966_vm2, %v1092_v47, %v1096_v41  ;;  %v1796_v41 = vshll.u32 %v3496_v32, 16  ;;  %v4838_v53 = vunpack.c.l.b16 %v1107_v62 }
  0xe6   : > { %v4815_v25 = vsel %vm2825_vm7, %v4563_v18, %v2245_v31  ;;  %v1995_v18 = vrot.slane %v1993_v33, 4  ;;  %v4836_v63 = vunpack.c.l.b16 %v1097_v17  ;;  %v1795_v19 = vrot.slane %v1793_v16, 4 }
  0xe7   : > { %v1798_v56 = vrot.slane %v1796_v41, 5  ;;  %v1804_v8 = vrot.slane %v1802_v50, 5  ;;  %v1808_v51 = vrot.slane %v1806_v22, 4  ;;  %v1697_v30 = vshrl.u32 %v3488_v29, 16 }
  0xe8   : > { %2752 = vrot.lane.b32.xlu2 %v4691_v5, %s3893_s27  ;;  %v1997_v9 = vsel %vm4168_vm5, %v1995_v18, %v1996_v21  ;;  %v1700_v34 = vshll.u32 %v3488_v29, 16  ;;  %v1814_v47 = vrot.slane %v1812_v46, 5  ;;  %v1706_v42 = vshll.u32 %v4779_v11, 16  ;;  %v3400_v46 = vld [vmem:[%s3938_s19 + $0x48] sm:$0xf] }
  0xe9   : > { %v1799_v52 = vor.u32 %v1798_v56, %v1795_v19  ;;  %v1809_v57 = vor.u32 %v1808_v51, %v1804_v8  ;;  %v1699_v32 = vrot.slane %v1697_v30, 4  ;;  %v1710_v21 = vshrl.u32 %v4779_v11, 16  ;;  %v4896_v51 = vld [vmem:[%s3938_s19 + $0x50] sm:$0x1] }
  0xea   : > { %2584 = vrot.lane.b32.xlu0 %v3801_v13, %s3892_s26  ;;  %v2335_v5 = vpop.permute.xlu2 %2334  ;;  %v1702_v13 = vrot.slane %v1700_v34, 5  ;;  %v1708_v62 = vrot.slane %v1706_v42, 5  ;;  %v2715_v12 = vunpack.c.l.b16 %v1997_v9  ;;  %v3455_v41 = vrot.slane %v3439_v27, 9  ;;  %v3531_v42 = vld [vmem:[%s3938_s19 + $0xb4] sm:$0xe] }
  0xeb   : > { %2744 = vrot.lane.b32.xlu1 %v4738_v2, %s3893_s27  ;;  %v4850_v33 = vsel %vm2858_vm8, %v4754_v37, %v2335_v5  ;;  %v1800_v37 = vrot.slane %v1799_v52, 4  ;;  %v1810_v18 = vrot.slane %v1809_v57, 4  ;;  %v1712_v50 = vrot.slane %v1710_v21, 4  ;;  %v3443_v21 = vld [vmem:[%s3938_s19 + $0x48] sm:$0xe] }
  0xec   : > { %v2243_v6 = vpop.permute.xlu0 %2242  ;;  %v1703_v16 = vor.u32 %v1702_v13, %v1699_v32  ;;  %v1716_v29 = vshll.u32 %v4806_v40, 16  ;;  %v1325_v22 = vrot.slane %v4336_v23, 5  ;;  %v4872_v11 = vpack.c.b16 %v2467_v38, %v2466_v14 }
  0xed   : > { %v4856_v2 = vsel %vm2825_vm7, %v4381_v10, %v2243_v6  ;;  %v2251_v31 = vpop.permute.xlu1 %2250  ;;  %v1805_v10 = vsel %vm3966_vm2, %v1800_v37, %v1804_v8  ;;  %v1815_v19 = vsel %vm3966_vm2, %v1810_v18, %v1814_v47  ;;  %v1713_v40 = vor.u32 %v1712_v50, %v1708_v62  ;;  %v3814_v6 = vld [vmem:[%s3938_s19 + $0xb4] sm:$0xff] }
  0xee   : > { %v4860_v17 = vsel %vm2825_vm7, %v4663_v35, %v2251_v31  ;;  %v2401_v35 = vpack.c.b16 %v4838_v53, %v4836_v63  ;;  %v1704_v56 = vrot.slane %v1703_v16, 4  ;;  %v4880_v23 = vunpack.c.l.b16 %v1805_v10  ;;  %v3401_v53 = vld [vmem:[%s3938_s19 + $0x4c] sm:$0xf] }
  0xef   : > { %v1327_v8 = vrot.slane %v1325_v22, 4  ;;  %v4884_v38 = vunpack.c.l.b16 %v1815_v19  ;;  %v1326_v63 = vsel %vm4168_vm5, %v3455_v41, %v1325_v22  ;;  %v989_v48 = vshrl.u32 %v3400_v46, 16 }
  0xf0   : > { %2506 = vrot.lane.b32.xlu2 %v4766_v45, %s3890_s24  ;;  %v1328_v45 = vrot.slane %v4349_v1, 5  ;;  %v992_v24 = vshll.u32 %v3400_v46, 16  ;;  %v4893_v1 = vpack.c.b16 %v2715_v12, %v2714_v61  ;;  %v1714_v9 = vrot.slane %v1713_v40, 4 }
  0xf1   : > { %v1709_v52 = vsel %vm3966_vm2, %v1704_v56, %v1708_v62  ;;  %v991_v47 = vrot.slane %v989_v48, 4  ;;  %v2442_v31 = vunpack.c.l.b16 %v1326_v63  ;;  %v998_v57 = vshll.u32 %v3401_v53, 16  ;;  %v3519_v63 = vld [vmem:[%s3938_s19 + $0x24] sm:$0xe] }
  0xf2   : > { %2672 = vrot.lane.b32.xlu0 %v2652_v55, %s3891_s25  ;;  %v2341_v14 = vpop.permute.xlu2 %2340  ;;  %v1329_v27 = vsel %vm4168_vm5, %v1327_v8, %v1328_v45  ;;  %v2661_v32 = vpack.c.b16 %v4884_v38, %v4880_v23  ;;  %v1002_v37 = vshrl.u32 %v3401_v53, 16  ;;  %v1008_v62 = vshll.u32 %v4896_v51, 16 }
  0xf3   : > { %2434 = vrot.lane.b32.xlu1 %v2405_v20, %s3889_s23  ;;  %v4891_v5 = vsel %vm2858_vm8, %v4815_v25, %v2341_v14  ;;  %v1718_v20 = vrot.slane %v1716_v29, 5  ;;  %v994_v25 = vrot.slane %v992_v24, 5  ;;  %v1000_v18 = vrot.slane %v998_v57, 5 }
  0xf4   : > { %v2249_v55 = vpop.permute.xlu0 %2248  ;;  %v2021_v16 = vrot.slane %v4810_v4, 5  ;;  %v4921_v41 = vunpack.c.l.b16 %v1709_v52  ;;  %v2443_v10 = vunpack.c.l.b16 %v1329_v27  ;;  %v1004_v29 = vrot.slane %v1002_v37, 4  ;;  %v3480_v52 = vld [vmem:[%s3938_s19 + $0x54] sm:$0xf] }
  0xf5   : > { %v4900_v30 = vsel %vm2825_vm7, %v4390_v15, %v2249_v55  ;;  %v2257_v34 = vpop.permute.xlu1 %2256  ;;  %v3810_v15 = vld [vmem:[%s3938_s19 + $0x84] sm:$0xff]  ;;  %v995_v13 = vor.u32 %v994_v25, %v991_v47  ;;  %v1719_v12 = vsel %vm3966_vm2, %v1714_v9, %v1718_v20  ;;  %v2024_v19 = vrot.slane %v4823_v7, 5 }
  0xf6   : > { %v4908_v61 = vsel %vm2825_vm7, %v4732_v58, %v2257_v34  ;;  %v3547_v58 = vrot.slane %v3531_v42, 9  ;;  %v2023_v46 = vrot.slane %v2021_v16, 4  ;;  %v3459_v56 = vrot.slane %v3443_v21, 9 }
  0xf7   : > { %v996_v50 = vrot.slane %v995_v13, 4  ;;  %v4928_v40 = vunpack.c.l.b16 %v1719_v12  ;;  %v1005_v8 = vor.u32 %v1004_v29, %v1000_v18  ;;  %v1010_v45 = vrot.slane %v1008_v62, 5 }
  0xf8   : > { %2610 = vrot.lane.b32.xlu2 %v3814_v6, %s3892_s26  ;;  %v2022_v22 = vsel %vm4168_vm5, %v3547_v58, %v2021_v16  ;;  %v1353_v14 = vrot.slane %v3401_v53, 5  ;;  %v2025_v24 = vsel %vm4168_vm5, %v2023_v46, %v2024_v19  ;;  %v1356_v55 = vrot.slane %v4896_v51, 5  ;;  %v3473_v51 = vld [vmem:[%s3938_s19 + $0x28] sm:$0xf]  ;;  %v4974_v16 = vld [vmem:[%s3938_s19 + $0x5c] sm:$0x1] }
  0xf9   : > { %v1001_v7 = vsel %vm3966_vm2, %v996_v50, %v1000_v18  ;;  %v2473_v20 = vpack.c.b16 %v2443_v10, %v2442_v31  ;;  %v1006_v34 = vrot.slane %v1005_v8, 4  ;;  %v2722_v6 = vunpack.c.l.b16 %v2022_v22  ;;  %v3503_v18 = vld [vmem:[%s3938_s19 + $0x2c] sm:$0x1]  ;;  %v3472_v46 = vld [vmem:[%s3938_s19 + $0x24] sm:$0xf] }
  0xfa   : > { %2426 = vrot.lane.b32.xlu0 %v2401_v35, %s3889_s23  ;;  %v2347_v4 = vpop.permute.xlu2 %2346  ;;  %v4951_v47 = vsel %vm4168_vm5, %v3459_v56, %v1353_v14  ;;  %v1355_v25 = vrot.slane %v1353_v14, 4  ;;  %v3535_v42 = vrot.slane %v3519_v63, 9  ;;  %v2370_v31 = vunpack.c.l.b16 %v1001_v7 }
  0xfb   : > { %2602 = vrot.lane.b32.xlu1 %v3810_v15, %s3892_s26  ;;  %v4933_v35 = vsel %vm2858_vm8, %v4860_v17, %v2347_v4  ;;  %v1011_v27 = vsel %vm3966_vm2, %v1006_v34, %v1010_v45  ;;  %v2723_v57 = vunpack.c.l.b16 %v2025_v24  ;;  %v1937_v15 = vrot.slane %v3473_v51, 5  ;;  %v3418_v24 = vld [vmem:[%s3938_s19 + $0xb4] sm:$0xf] }
  0xfc   : > { %v2255_v48 = vpop.permute.xlu0 %2254  ;;  %v2371_v13 = vunpack.c.l.b16 %v1011_v27  ;;  %v1601_v37 = vshrl.u32 %v3480_v52, 16  ;;  %v1604_v62 = vshll.u32 %v3480_v52, 16  ;;  %v2657_v21 = vpack.c.b16 %v4928_v40, %v4921_v41 }
  0xfd   : > { %v4942_v9 = vsel %vm2825_vm7, %v4433_v49, %v2255_v48  ;;  %v2263_v53 = vpop.permute.xlu1 %2262  ;;  %v4955_v49 = vld [vmem:[%s3938_s19 + $0x58] sm:$0xf]  ;;  %v2450_v12 = vunpack.c.l.b16 %v4951_v47  ;;  %v4971_v58 = vsel %vm4168_vm5, %v3535_v42, %v1937_v15  ;;  %v1939_v50 = vrot.slane %v1937_v15, 4 }
  0xfe   : > { %v4947_v17 = vsel %vm2825_vm7, %v4795_v44, %v2263_v53  ;;  %v4961_v44 = vsel %vm4168_vm5, %v1355_v25, %v1356_v55  ;;  %v1610_v10 = vshll.u32 %v4955_v49, 16  ;;  %v1940_v29 = vrot.slane %v3503_v18, 5  ;;  %v5008_v15 = vld [vmem:[%s3938_s19 + $0xb8] sm:$0xf] }
  0xff   : > { %v1606_v22 = vrot.slane %v1604_v62, 5  ;;  %v4986_v19 = vpack.c.b16 %v2723_v57, %v2722_v6  ;;  %v2451_v56 = vunpack.c.l.b16 %v4961_v44  ;;  %v2397_v8 = vpack.c.b16 %v2371_v13, %v2370_v31 }
 0x100   : > { %2762 = vrot.lane.b32.xlu2 %v4893_v1, %s3893_s27  ;;  %v1603_v1 = vrot.slane %v1601_v37, 4  ;;  %v1612_v4 = vrot.slane %v1610_v10, 5  ;;  %v2698_v45 = vunpack.c.l.b16 %v4971_v58  ;;  %v1620_v63 = vshll.u32 %v4974_v16, 16 }
 0x101   : > { %v1505_v48 = vshrl.u32 %v3472_v46, 16  ;;  %v1508_v7 = vshll.u32 %v3472_v46, 16  ;;  %v5003_v53 = vsel %vm4168_vm5, %v1939_v50, %v1940_v29  ;;  %v1514_v42 = vshll.u32 %v3473_v51, 16 }
 0x102   : > { %2514 = vrot.lane.b32.xlu0 %v4872_v11, %s3890_s24  ;;  %v4984_v41 = vpop.permute.xlu2 %2352  ;;  %v1614_v11 = vshrl.u32 %v4955_v49, 16  ;;  %v1607_v14 = vor.u32 %v1606_v22, %v1603_v1  ;;  %v1622_v6 = vrot.slane %v1620_v63, 5  ;;  %v1518_v31 = vshrl.u32 %v3473_v51, 16  ;;  %v5025_v63 = vld [vmem:[%s3938_s19 + $0xbc] sm:$0x1] }
 0x103   : > { %2690 = vrot.lane.b32.xlu1 %v2661_v32, %s3891_s25  ;;  %v1507_v25 = vrot.slane %v1505_v48, 4  ;;  %v1524_v57 = vshll.u32 %v3503_v18, 16  ;;  %v1205_v13 = vshrl.u32 %v3418_v24, 16  ;;  %v1516_v10 = vrot.slane %v1514_v42, 5 }
 0x104   : > { %v2261_v40 = vpop.permute.xlu0 %2260  ;;  %v1616_v32 = vrot.slane %v1614_v11, 4  ;;  %v1608_v34 = vrot.slane %v1607_v14, 4  ;;  %v1520_v29 = vrot.slane %v1518_v31, 4  ;;  %v1208_v51 = vshll.u32 %v3418_v24, 16 }
 0x105   : > { %v4994_v23 = vsel %vm2825_vm7, %v4509_v39, %v2261_v40  ;;  %v2333_v38 = vpop.permute.xlu1 %2332  ;;  %v1510_v39 = vrot.slane %v1508_v7, 5  ;;  %v1207_v1 = vrot.slane %v1205_v13, 4  ;;  %v1214_v46 = vshll.u32 %v5008_v15, 16  ;;  %v3806_v7 = vld [vmem:[%s3938_s19 + $0x54] sm:$0xff] }
 0x106   : > { %v4999_v55 = vsel %vm2858_vm8, %v4799_v3, %v2333_v38  ;;  %v1617_v52 = vor.u32 %v1616_v32, %v1612_v4  ;;  %v1613_v27 = vsel %vm3966_vm2, %v1608_v34, %v1612_v4  ;;  %v2699_v3 = vunpack.c.l.b16 %v5003_v53  ;;  %v3410_v38 = vld [vmem:[%s3938_s19 + $0x84] sm:$0xf]  ;;  %v5036_v34 = vld [vmem:[%s3938_s19 + $0x88] sm:$0xf] }
 0x107   : > { %v1511_v62 = vor.u32 %v1510_v39, %v1507_v25  ;;  %v5013_v50 = vunpack.c.l.b16 %v1613_v27  ;;  %v1218_v4 = vshrl.u32 %v5008_v15, 16  ;;  %v1521_v40 = vor.u32 %v1520_v29, %v1516_v10 }
 0x108   : > { %2490 = vrot.lane.b32.xlu2 %v2473_v20, %s3890_s24  ;;  %v1618_v37 = vrot.slane %v1617_v52, 4  ;;  %v1526_v14 = vrot.slane %v1524_v57, 5  ;;  %v1216_v53 = vrot.slane %v1214_v46, 5  ;;  %v1224_v31 = vshll.u32 %v5025_v63, 16 }
 0x109   : > { %v1512_v22 = vrot.slane %v1511_v62, 4  ;;  %v1522_v25 = vrot.slane %v1521_v40, 4  ;;  %v1109_v57 = vshrl.u32 %v3410_v38, 16  ;;  %v1112_v62 = vshll.u32 %v3410_v38, 16 }
 0x10a   : > { %2682 = vrot.lane.b32.xlu0 %v2657_v21, %s3891_s25  ;;  %v2359_v18 = vpop.permute.xlu2 %2358  ;;  %v1623_v20 = vsel %vm3966_vm2, %v1618_v37, %v1622_v6  ;;  %v5051_v37 = vld [vmem:[%s3938_s19 + $0x8c] sm:$0x1]  ;;  %v2477_v40 = vpack.c.b16 %v2451_v56, %v2450_v12  ;;  %v3452_v12 = vld [vmem:[%s3938_s19 + $0xb4] sm:$0xe] }
 0x10b   : > { %2418 = vrot.lane.b32.xlu1 %v2397_v8, %s3889_s23  ;;  %v5022_v11 = vsel %vm2858_vm8, %v4947_v17, %v2359_v18  ;;  %v1210_v8 = vrot.slane %v1208_v51, 5  ;;  %v1517_v24 = vsel %vm3966_vm2, %v1512_v22, %v1516_v10  ;;  %v1220_v17 = vrot.slane %v1218_v4, 4 }
 0x10c   : > { %v2331_v21 = vpop.permute.xlu0 %2330  ;;  %v5042_v52 = vunpack.c.l.b16 %v1623_v20  ;;  %v5044_v39 = vunpack.c.l.b16 %v1517_v24  ;;  %v1527_v13 = vsel %vm3966_vm2, %v1522_v25, %v1526_v14  ;;  %v1122_v10 = vshrl.u32 %v5036_v34, 16 }
 0x10d   : > { %v5030_v32 = vsel %vm2858_vm8, %v4549_v43, %v2331_v21  ;;  %v2339_v48 = vpop.permute.xlu1 %2338  ;;  %v3802_v43 = vld [vmem:[%s3938_s19 + $0x24] sm:$0xff]  ;;  %v1211_v42 = vor.u32 %v1210_v8, %v1207_v1  ;;  %v1221_v27 = vor.u32 %v1220_v17, %v1216_v53  ;;  %v5056_v29 = vunpack.c.l.b16 %v1527_v13  ;;  %v3523_v21 = vld [vmem:[%s3938_s19 + $0x54] sm:$0xe] }
 0x10e   : > { %v5040_v6 = vsel %vm2858_vm8, %v4856_v2, %v2339_v48  ;;  %v1118_v2 = vshll.u32 %v5036_v34, 16  ;;  %v1226_v18 = vrot.slane %v1224_v31, 5  ;;  %v1111_v20 = vrot.slane %v1109_v57, 4  ;;  %v3448_v57 = vld [vmem:[%s3938_s19 + $0x84] sm:$0xe] }
 0x10f   : > { %v1212_v1 = vrot.slane %v1211_v42, 4  ;;  %v1222_v51 = vrot.slane %v1221_v27, 4  ;;  %v1114_v22 = vrot.slane %v1112_v62, 5  ;;  %v1124_v4 = vrot.slane %v1122_v10, 4 }
 0x110   : > { %2594 = vrot.lane.b32.xlu2 %v3806_v7, %s3892_s26  ;;  %v1120_v46 = vrot.slane %v1118_v2, 5  ;;  %v2729_v8 = vpack.c.b16 %v2699_v3, %v2698_v45  ;;  %v1128_v38 = vshll.u32 %v5051_v37, 16  ;;  %v2653_v7 = vpack.c.b16 %v5042_v52, %v5013_v50 }
 0x111   : > { %v1227_v47 = vsel %vm3966_vm2, %v1222_v51, %v1226_v18  ;;  %v1115_v24 = vor.u32 %v1114_v22, %v1111_v20  ;;  %v3539_v3 = vrot.slane %v3523_v21, 9  ;;  %v2649_v17 = vpack.c.b16 %v5056_v29, %v5044_v39  ;;  %v3498_v29 = vld [vmem:[%s3938_s19 + $0xc0] sm:$0xf] }
 0x112   : > { %2770 = vrot.lane.b32.xlu0 %v4986_v19, %s3893_s27  ;;  %v5066_v14 = vpop.permute.xlu2 %2424  ;;  %v1217_v19 = vsel %vm3966_vm2, %v1212_v1, %v1216_v53  ;;  %v1125_v44 = vor.u32 %v1124_v4, %v1120_v46  ;;  %v1130_v45 = vrot.slane %v1128_v38, 5  ;;  %v1965_v53 = vrot.slane %v4955_v49, 5 }
 0x113   : > { %2586 = vrot.lane.b32.xlu1 %v3802_v43, %s3892_s26  ;;  %v2388_v50 = vunpack.c.l.b16 %v1217_v19  ;;  %v1116_v52 = vrot.slane %v1115_v24, 4  ;;  %v2389_v43 = vunpack.c.l.b16 %v1227_v47  ;;  %v1968_v27 = vrot.slane %v4974_v16, 5  ;;  %v5114_v19 = vld [vmem:[%s3938_s19 + $0xc4] sm:$0xf]  ;;  %v5123_v24 = vld [vmem:[%s3938_s19 + $0xc8] sm:$0x1] }
 0x114   : > { %v2337_v48 = vpop.permute.xlu0 %2336  ;;  %v1126_v25 = vrot.slane %v1125_v44, 4  ;;  %v1967_v42 = vrot.slane %v1965_v53, 4  ;;  %v3468_v31 = vrot.slane %v3452_v12, 9  ;;  %v1966_v49 = vsel %vm4168_vm5, %v3539_v3, %v1965_v53  ;;  %v3490_v44 = vld [vmem:[%s3938_s19 + $0x90] sm:$0xf] }
 0x115   : > { %v5080_v58 = vsel %vm2858_vm8, %v4603_v0, %v2337_v48  ;;  %v2345_v56 = vpop.permute.xlu1 %2344  ;;  %v1121_v0 = vsel %vm3966_vm2, %v1116_v52, %v1120_v46  ;;  %v1416_v39 = vrot.slane %v5008_v15, 5  ;;  %v1419_v10 = vrot.slane %v5025_v63, 5  ;;  %v5131_v53 = vld [vmem:[%s3938_s19 + $0x94] sm:$0xf] }
 0x116   : > { %v1131_v13 = vsel %vm3966_vm2, %v1126_v25, %v1130_v45  ;;  %v2380_v62 = vunpack.c.l.b16 %v1121_v0  ;;  %v1969_v16 = vsel %vm4168_vm5, %v1967_v42, %v1968_v27  ;;  %v5102_v1 = vsel %vm2858_vm8, %v4900_v30, %v2345_v56  ;;  %v5140_v0 = vld [vmem:[%s3938_s19 + $0x98] sm:$0x1] }
 0x117   : > { %v2381_v2 = vunpack.c.l.b16 %v1131_v13  ;;  %v1417_v15 = vsel %vm4168_vm5, %v3468_v31, %v1416_v39  ;;  %v1418_v51 = vrot.slane %v1416_v39, 4  ;;  %v3464_v18 = vrot.slane %v3448_v57, 9 }
 0x118   : > { %2746 = vrot.lane.b32.xlu2 %v2729_v8, %s3893_s27  ;;  %v2406_v22 = vpack.c.b16 %v2389_v43, %v2388_v50  ;;  %v2706_v63 = vunpack.c.l.b16 %v1966_v49  ;;  %v1388_v46 = vrot.slane %v5036_v34, 5  ;;  %v1391_v4 = vrot.slane %v5051_v37, 5 }
 0x119   : > { %v2402_v30 = vpack.c.b16 %v2381_v2, %v2380_v62  ;;  %v1420_v8 = vsel %vm4168_vm5, %v1418_v51, %v1419_v10  ;;  %v1817_v38 = vshrl.u32 %v3498_v29, 16  ;;  %v2468_v47 = vunpack.c.l.b16 %v1417_v15 }
 0x11a   : > { %2498 = vrot.lane.b32.xlu0 %v2477_v40, %s3890_s24  ;;  %v5107_v20 = vpop.permute.xlu2 %2512  ;;  %v2707_v40 = vunpack.c.l.b16 %v1969_v16  ;;  %v1389_v34 = vsel %vm4168_vm5, %v3464_v18, %v1388_v46  ;;  %v1390_v37 = vrot.slane %v1388_v46, 4  ;;  %v2469_v56 = vunpack.c.l.b16 %v1420_v8  ;;  %v3811_v8 = vld [vmem:[%s3938_s19 + $0x90] sm:$0xff] }
 0x11b   : > { %2674 = vrot.lane.b32.xlu1 %v2653_v7, %s3891_s25  ;;  %v1819_v45 = vrot.slane %v1817_v38, 4  ;;  %v1820_v3 = vshll.u32 %v3498_v29, 16  ;;  %v2460_v50 = vunpack.c.l.b16 %v1389_v34  ;;  %v1826_v52 = vshll.u32 %v5114_v19, 16 }
 0x11c   : > { %v2343_v21 = vpop.permute.xlu0 %2342  ;;  %v1830_v25 = vshrl.u32 %v5114_v19, 16  ;;  %v1836_v27 = vshll.u32 %v5123_v24, 16  ;;  %v1724_v13 = vshll.u32 %v3490_v44, 16  ;;  %v1730_v49 = vshll.u32 %v5131_v53, 16 }
 0x11d   : > { %v5118_v48 = vsel %vm2858_vm8, %v4648_v59, %v2343_v21  ;;  %v2351_v7 = vpop.permute.xlu1 %2350  ;;  %v1392_v59 = vsel %vm4168_vm5, %v1390_v37, %v1391_v4  ;;  %v1822_v42 = vrot.slane %v1820_v3, 5  ;;  %v1828_v31 = vrot.slane %v1826_v52, 5  ;;  %v5158_v37 = vld [vmem:[%s3938_s19 + $0x28] sm:$0xf] }
 0x11e   : > { %v5128_v12 = vsel %vm2858_vm8, %v4942_v9, %v2351_v7  ;;  %v2461_v43 = vunpack.c.l.b16 %v1392_v59  ;;  %v1721_v9 = vshrl.u32 %v3490_v44, 16  ;;  %v1832_v57 = vrot.slane %v1830_v25, 4 }
 0x11f   : > { %v2733_v39 = vpack.c.b16 %v2707_v40, %v2706_v63  ;;  %v1823_v62 = vor.u32 %v1822_v42, %v1819_v45  ;;  %v1838_v2 = vrot.slane %v1836_v27, 5  ;;  %v1726_v15 = vrot.slane %v1724_v13, 5  ;;  %v5167_v45 = vld [vmem:[%s3938_s19 + $0x2c] sm:$0x1]  ;;  %v3532_v27 = vld [vmem:[%s3938_s19 + $0xc0] sm:$0xe] }
 0x120   : > { %2436 = vrot.lane.b32.xlu2 %v2406_v22, %s3889_s23  ;;  %v1723_v16 = vrot.slane %v1721_v9, 4  ;;  %v1833_v29 = vor.u32 %v1832_v57, %v1828_v31  ;;  %v1732_v51 = vrot.slane %v1730_v49, 5  ;;  %v1734_v18 = vshrl.u32 %v5131_v53, 16  ;;  %v3394_v22 = vld [vmem:[%s3938_s19 + $0x24] sm:$0xf] }
 0x121   : > { %v2486_v4 = vpack.c.b16 %v2469_v56, %v2468_v47  ;;  %v1824_v63 = vrot.slane %v1823_v62, 4  ;;  %v1740_v21 = vshll.u32 %v5140_v0, 16  ;;  %v920_v42 = vshll.u32 %v3394_v22, 16 }
 0x122   : > { %2666 = vrot.lane.b32.xlu0 %v2649_v17, %s3891_s25  ;;  %v5145_v10 = vpop.permute.xlu2 %2680  ;;  %v5149_v17 = vpack.c.b16 %v2461_v43, %v2460_v50  ;;  %v1834_v38 = vrot.slane %v1833_v29, 4  ;;  %v1727_v7 = vor.u32 %v1726_v15, %v1723_v16  ;;  %v1736_v34 = vrot.slane %v1734_v18, 4  ;;  %v3528_v29 = vld [vmem:[%s3938_s19 + $0x90] sm:$0xe] }
 0x123   : > { %2428 = vrot.lane.b32.xlu1 %v2402_v30, %s3889_s23  ;;  %v1829_v44 = vsel %vm3966_vm2, %v1824_v63, %v1828_v31  ;;  %v1742_v56 = vrot.slane %v1740_v21, 5  ;;  %v930_v57 = vshrl.u32 %v5158_v37, 16  ;;  %v936_v13 = vshll.u32 %v5167_v45, 16 }
 0x124   : > { %v2349_v46 = vpop.permute.xlu0 %2348  ;;  %v1839_v3 = vsel %vm3966_vm2, %v1834_v38, %v1838_v2  ;;  %v2644_v59 = vunpack.c.l.b16 %v1829_v44  ;;  %v1728_v50 = vrot.slane %v1727_v7, 4  ;;  %v1737_v52 = vor.u32 %v1736_v34, %v1732_v51 }
 0x125   : > { %v5154_v30 = vsel %vm2858_vm8, %v4697_v36, %v2349_v46  ;;  %v2357_v40 = vpop.permute.xlu1 %2356  ;;  %v917_v36 = vshrl.u32 %v3394_v22, 16  ;;  %v2645_v25 = vunpack.c.l.b16 %v1839_v3  ;;  %v922_v2 = vrot.slane %v920_v42, 5  ;;  %v3444_v42 = vld [vmem:[%s3938_s19 + $0x54] sm:$0xe] }
 0x126   : > { %v5162_v47 = vsel %vm2858_vm8, %v4994_v23, %v2357_v40  ;;  %v926_v23 = vshll.u32 %v5158_v37, 16  ;;  %v1733_v9 = vsel %vm3966_vm2, %v1728_v50, %v1732_v51  ;;  %v1738_v31 = vrot.slane %v1737_v52, 4 }
 0x127   : > { %v919_v43 = vrot.slane %v917_v36, 4  ;;  %v2662_v49 = vpack.c.b16 %v2645_v25, %v2644_v59  ;;  %v2636_v62 = vunpack.c.l.b16 %v1733_v9  ;;  %v932_v51 = vrot.slane %v930_v57, 4 }
 0x128   : > { %2604 = vrot.lane.b32.xlu2 %v3811_v8, %s3892_s26  ;;  %v928_v16 = vrot.slane %v926_v23, 5  ;;  %v1743_v18 = vsel %vm3966_vm2, %v1738_v31, %v1742_v56  ;;  %v938_v22 = vrot.slane %v936_v13, 5  ;;  %v3548_v46 = vrot.slane %v3532_v27, 9 }
 0x129   : > { %v2637_v21 = vunpack.c.l.b16 %v1743_v18  ;;  %v923_v40 = vor.u32 %v922_v2, %v919_v43  ;;  %v2031_v8 = vrot.slane %v5123_v24, 5  ;;  %v3544_v34 = vrot.slane %v3528_v29, 9  ;;  %v3403_v29 = vld [vmem:[%s3938_s19 + $0x58] sm:$0xf]  ;;  %v3428_v18 = vld [vmem:[%s3938_s19 + $0x5c] sm:$0x1] }
 0x12a   : > { %2754 = vrot.lane.b32.xlu0 %v2733_v39, %s3893_s27  ;;  %v5181_v15 = vpop.permute.xlu2 %2768  ;;  %v2028_v39 = vrot.slane %v5114_v19, 5  ;;  %v933_v7 = vor.u32 %v932_v51, %v928_v16  ;;  %v2000_v44 = vrot.slane %v5131_v53, 5  ;;  %v2003_v25 = vrot.slane %v5140_v0, 5 }
 0x12b   : > { %2516 = vrot.lane.b32.xlu1 %v2486_v4, %s3890_s24  ;;  %v2658_v36 = vpack.c.b16 %v2637_v21, %v2636_v62  ;;  %v924_v3 = vrot.slane %v923_v40, 4  ;;  %v5220_v62 = vsel %vm2858_vm8, %v4908_v61, %v4984_v41  ;;  %v3460_v51 = vrot.slane %v3444_v42, 9  ;;  %v3402_v41 = vld [vmem:[%s3938_s19 + $0x54] sm:$0xf] }
 0x12c   : > { %v2355_v63 = vpop.permute.xlu0 %2354  ;;  %v2029_v19 = vsel %vm4168_vm5, %v3548_v46, %v2028_v39  ;;  %v934_v24 = vrot.slane %v933_v7, 4  ;;  %v2030_v59 = vrot.slane %v2028_v39, 4  ;;  %v2001_v52 = vsel %vm4168_vm5, %v3544_v34, %v2000_v44  ;;  %v3815_v7 = vld [vmem:[%s3938_s19 + $0xc0] sm:$0xff] }
 0x12d   : > { %v5189_v38 = vsel %vm2858_vm8, %v4747_v54, %v2355_v63  ;;  %v2411_v4 = vpop.permute.xlu1 %2410  ;;  %v3060_v54 = vld [vmem:[%s5754_s1 + $0x10] sm:$0x3]  ;;  %v2724_v50 = vunpack.c.l.b16 %v2029_v19  ;;  %v2002_v53 = vrot.slane %v2000_v44, 4  ;;  %v2716_v43 = vunpack.c.l.b16 %v2001_v52  ;;  %v3818_v44 = vld [vmem:[%s5754_s1 + $0x8] sm:$0xff] }
 0x12e   : > { %v5194_v56 = vsel %vm2891_vm9, %v5030_v32, %v2411_v4  ;;  %v929_v32 = vsel %vm3966_vm2, %v924_v3, %v928_v16  ;;  %v939_v23 = vsel %vm3966_vm2, %v934_v24, %v938_v22  ;;  %v2032_v9 = vsel %vm4168_vm5, %v2030_v59, %v2031_v8 }
 0x12f   : > { %v2364_v27 = vunpack.c.l.b16 %v929_v32  ;;  %v3073_v31 = vunpack.c.l.b16 %v3060_v54  ;;  %v2365_v57 = vunpack.c.l.b16 %v939_v23  ;;  %v2725_v13 = vunpack.c.l.b16 %v2032_v9  ;;  %v3817_v9 = vld [vmem:[%s5754_s1] sm:$0xff] }
 0x130   : > { %2692 = vrot.lane.b32.xlu2 %v2662_v49, %s3891_s25  ;;  %v2004_v0 = vsel %vm4168_vm5, %v2002_v53, %v2003_v25  ;;  %v3440_v49 = vld [vmem:[%s3938_s19 + $0x24] sm:$0xe]  ;;  %v2909_v46 = vsel %vm2891_vm9, %v5102_v1, %v5066_v14  ;;  %v1360_v63 = vrot.slane %v3403_v29, 5  ;;  %v1363_v61 = vrot.slane %v3428_v18, 5 }
 0x131   : > { %v2717_v16 = vunpack.c.l.b16 %v2004_v0  ;;  %v2394_v40 = vpack.c.b16 %v2365_v57, %v2364_v27  ;;  %v2742_v39 = vpack.c.b16 %v2725_v13, %v2724_v50  ;;  %v3456_v4 = vrot.slane %v3440_v49, 9 }
 0x132   : > { %2508 = vrot.lane.b32.xlu0 %v5149_v17, %s3890_s24  ;;  %v5223_v2 = vpop.permute.xlu2 %2496  ;;  %v3076_v17 = vpack.c.b16 %v3073_v31, %v3073_v31  ;;  %v1361_v14 = vsel %vm4168_vm5, %v3460_v51, %v1360_v63  ;;  %v1362_v1 = vrot.slane %v1360_v63, 4  ;;  %v1335_v19 = vrot.slane %v5167_v45, 5  ;;  %v3474_v31 = vld [vmem:[%s3938_s19 + $0x30] sm:$0xf] }
 0x133   : > { %2684 = vrot.lane.b32.xlu1 %v2658_v36, %s3891_s25  ;;  %v5235_v34 = vpack.c.b16 %v2717_v16, %v2716_v43  ;;  %v1332_v36 = vrot.slane %v5158_v37, 5  ;;  %v2452_v3 = vunpack.c.l.b16 %v1361_v14  ;;  %v1013_v54 = vshrl.u32 %v3402_v41, 16  ;;  %v5259_v16 = vld [vmem:[%s3938_s19 + $0x34] sm:$0xf] }
 0x134   : > { %v5227_v22 = vpop.permute.xlu0 %2408  ;;  %v3114_v8 = vsel %vm3112_vm10, %v3076_v17, 0  ;;  %v1016_v24 = vshll.u32 %v3402_v41, 16  ;;  %v1364_v59 = vsel %vm4168_vm5, %v1362_v1, %v1363_v61  ;;  %v1022_v32 = vshll.u32 %v3403_v29, 16 }
 0x135   : > { %v2505_v21 = vpop.permute.xlu1 %2504  ;;  %3820 = vmatpush.bf16.msra.mxu2 %v3114_v8  ;;  %3821 = vmatpush.bf16.msra.mxu3 %v3114_v8  ;;  %v1333_v50 = vsel %vm4168_vm5, %v3456_v4, %v1332_v36  ;;  %v1334_v52 = vrot.slane %v1332_v36, 4  ;;  %v2453_v37 = vunpack.c.l.b16 %v1364_v59  ;;  %v1015_v25 = vrot.slane %v1013_v54, 4  ;;  %v3520_v36 = vld [vmem:[%s3938_s19 + $0x30] sm:$0xe]  ;;  %v3483_v59 = vld [vmem:[%s3938_s19 + $0x64] sm:$0xf] }
 0x136   : > { %3121 = vmatpush.bf16.msra.mxu0 %v3114_v8  ;;  %3819 = vmatpush.bf16.msra.mxu1 %v3114_v8  ;;  %v2444_v53 = vunpack.c.l.b16 %v1333_v50  ;;  %v1018_v45 = vrot.slane %v1016_v24, 5  ;;  %v1024_v42 = vrot.slane %v1022_v32, 5  ;;  %v1026_v23 = vshrl.u32 %v3403_v29, 16 }
 0x137   : > { %v1336_v43 = vsel %vm4168_vm5, %v1334_v52, %v1335_v19  ;;  %v1032_v27 = vshll.u32 %v3428_v18, 16  ;;  %v2942_v57 = vsel %vm2924_vm11, %v2909_v46, %v2505_v21  ;;  %v2478_v13 = vpack.c.b16 %v2453_v37, %v2452_v3  ;;  %v5280_v52 = vld [vmem:[%s3938_s19 + $0x68] sm:$0x1] }
 0x138   : > { %2412 = vrot.lane.b32.xlu2 %v2394_v40, %s3889_s23  ;;  %v2445_v0 = vunpack.c.l.b16 %v1336_v43  ;;  %v1019_v49 = vor.u32 %v1018_v45, %v1015_v25  ;;  %v1028_v51 = vrot.slane %v1026_v23, 4  ;;  %v1529_v41 = vshrl.u32 %v3474_v31, 16 }
 0x139   : > { %3823 = vmatpush.bf16.msra.mxu2 %v3818_v44  ;;  %3824 = vmatpush.bf16.msra.mxu3 %v3818_v44  ;;  %v1034_v29 = vrot.slane %v1032_v27, 5  ;;  %v1532_v8 = vshll.u32 %v3474_v31, 16  ;;  %v1538_v4 = vshll.u32 %v5259_v16, 16  ;;  %v1542_v1 = vshrl.u32 %v5259_v16, 16 }
 0x13a   : > { %2612 = vrot.lane.b32.xlu0 %v3815_v7, %s3892_s26  ;;  %3122 = vmatpush.bf16.msra.mxu0 %v3818_v44  ;;  %v5263_v46 = vpop.permute.xlu2 %2664  ;;  %v1020_v61 = vrot.slane %v1019_v49, 4  ;;  %v2474_v21 = vpack.c.b16 %v2445_v0, %v2444_v53  ;;  %v1029_v40 = vor.u32 %v1028_v51, %v1024_v42  ;;  %v3524_v7 = vld [vmem:[%s3938_s19 + $0x60] sm:$0xe]  ;;  %v1531_v14 = vrot.slane %v1529_v41, 4 }
 0x13b   : > { %2772 = vrot.lane.b32.xlu1 %v2742_v39, %s3893_s27  ;;  %3822 = vmatpush.bf16.msra.mxu1 %v3818_v44  ;;  %v5266_v39 = vld [vmem:[%s3938_s19 + $0x38] sm:$0x1]  ;;  %v1534_v54 = vrot.slane %v1532_v8, 5  ;;  %v1540_v24 = vrot.slane %v1538_v4, 5  ;;  %v1544_v50 = vrot.slane %v1542_v1, 4  ;;  %v3540_v32 = vrot.slane %v3524_v7, 9 }
 0x13c   : > { %v2433_v17 = vpop.permute.xlu0 %2432  ;;  %v1025_v44 = vsel %vm3966_vm2, %v1020_v61, %v1024_v42  ;;  %v1030_v3 = vrot.slane %v1029_v40, 4  ;;  %v1972_v37 = vrot.slane %v3483_v59, 5  ;;  %v1975_v45 = vrot.slane %v5280_v52, 5  ;;  %v3482_v61 = vld [vmem:[%s3938_s19 + $0x60] sm:$0xf] }
 0x13d   : > { %v2917_v18 = vsel %vm2891_vm9, %v5220_v62, %v2433_v17  ;;  %v2609_v63 = vpop.permute.xlu1 %2608  ;;  %3826 = vmatpush.bf16.msra.mxu2 %v3817_v9  ;;  %3827 = vmatpush.bf16.msra.mxu3 %v3817_v9  ;;  %v2372_v19 = vunpack.c.l.b16 %v1025_v44  ;;  %v1535_v25 = vor.u32 %v1534_v54, %v1531_v14  ;;  %v3536_v43 = vrot.slane %v3520_v36, 9  ;;  %v3807_v7 = vld [vmem:[%s3938_s19 + $0x60] sm:$0xff] }
 0x13e   : > { %v2950_v62 = vsel %vm2924_vm11, %v2917_v18, %v5107_v20  ;;  %3123 = vmatpush.bf16.msra.mxu0 %v3817_v9  ;;  %v1548_v20 = vshll.u32 %v5266_v39, 16  ;;  %v1035_v53 = vsel %vm3966_vm2, %v1030_v3, %v1034_v29  ;;  %v1545_v27 = vor.u32 %v1544_v50, %v1540_v24 }
 0x13f   : > { %3825 = vmatpush.bf16.msra.mxu1 %v3817_v9  ;;  %v2983_v42 = vsel %vm2957_vm12, %v2950_v62, %v2609_v63  ;;  %v2373_v23 = vunpack.c.l.b16 %v1035_v53  ;;  %v1974_v0 = vrot.slane %v1972_v37, 4  ;;  %v1944_v49 = vrot.slane %v5259_v16, 5  ;;  %v5316_v53 = vld [vmem:[%s3938_s19 + $0x94] sm:$0xf] }
 0x140   : > { %2500 = vrot.lane.b32.xlu2 %v2478_v13, %s3890_s24  ;;  %v1550_v9 = vrot.slane %v1548_v20, 5  ;;  %v1536_v13 = vrot.slane %v1535_v25, 4  ;;  %v1546_v18 = vrot.slane %v1545_v27, 4  ;;  %v1947_v63 = vrot.slane %v5266_v39, 5 }
 0x141   : > { %v2398_v51 = vpack.c.b16 %v2373_v23, %v2372_v19  ;;  %v1976_v40 = vsel %vm4168_vm5, %v1974_v0, %v1975_v45  ;;  %v1945_v16 = vsel %vm4168_vm5, %v3536_v43, %v1944_v49  ;;  %v1946_v14 = vrot.slane %v1944_v49, 4  ;;  %v5320_v23 = vld [vmem:[%s3938_s19 + $0x98] sm:$0x1] }
 0x142   : > { %2764 = vrot.lane.b32.xlu0 %v5235_v34, %s3893_s27  ;;  %v1973_v34 = vsel %vm4168_vm5, %v3540_v32, %v1972_v37  ;;  %v1551_v39 = vsel %vm3966_vm2, %v1546_v18, %v1550_v9  ;;  %v2709_v44 = vunpack.c.l.b16 %v1976_v40  ;;  %v1625_v1 = vshrl.u32 %v3482_v61, 16  ;;  %v5328_v18 = vld [vmem:[%s3938_s19 + $0xc4] sm:$0xf] }
 0x143   : > { %2492 = vrot.lane.b32.xlu1 %v2474_v21, %s3890_s24  ;;  %v1541_v21 = vsel %vm3966_vm2, %v1536_v13, %v1540_v24  ;;  %v2621_v62 = vunpack.c.l.b16 %v1551_v39  ;;  %v2700_v36 = vunpack.c.l.b16 %v1945_v16  ;;  %v1628_v3 = vshll.u32 %v3482_v61, 16  ;;  %v3449_v24 = vld [vmem:[%s3938_s19 + $0x90] sm:$0xe] }
 0x144   : > { %v2601_v31 = vpop.permute.xlu0 %2600  ;;  %v2620_v4 = vunpack.c.l.b16 %v1541_v21  ;;  %v1634_v19 = vshll.u32 %v3483_v59, 16  ;;  %v1638_v54 = vshrl.u32 %v3483_v59, 16  ;;  %v1948_v20 = vsel %vm4168_vm5, %v1946_v14, %v1947_v63  ;;  %v3803_v61 = vld [vmem:[%s3938_s19 + $0x30] sm:$0xff] }
 0x145   : > { %v2975_v17 = vsel %vm2957_vm12, %v2942_v57, %v2601_v31  ;;  %v2761_v29 = vpop.permute.xlu1 %2760  ;;  %v5303_v57 = vpop.permute.xlu2 %2752  ;;  %v1627_v32 = vrot.slane %v1625_v1, 4  ;;  %v1644_v37 = vshll.u32 %v5280_v52, 16  ;;  %v2701_v25 = vunpack.c.l.b16 %v1948_v20 }
 0x146   : > { %v3008_v41 = vsel %vm2990_vm13, %v2975_v17, %v5145_v10  ;;  %v2708_v10 = vunpack.c.l.b16 %v1973_v34  ;;  %v2650_v50 = vpack.c.b16 %v2621_v62, %v2620_v4  ;;  %v1630_v45 = vrot.slane %v1628_v3, 5  ;;  %v3420_v34 = vld [vmem:[%s3938_s19 + $0xc0] sm:$0xf]  ;;  %v3412_v4 = vld [vmem:[%s3938_s19 + $0x90] sm:$0xf] }
 0x147   : > { %v3041_v8 = vsel %vm3023_vm14, %v3008_v41, %v2761_v29  ;;  %v1636_v43 = vrot.slane %v1634_v19, 5  ;;  %v1640_v59 = vrot.slane %v1638_v54, 4  ;;  %v3465_v31 = vrot.slane %v3449_v24, 9 }
 0x148   : > { %3758 = vmatmul.msk.bf16.vlgmr.msra.gmra.mxu2 %vm3079_vm15, %v3041_v8  ;;  %2668 = vrot.lane.b32.xlu2 %v2650_v50, %s3891_s25  ;;  %v2734_v9 = vpack.c.b16 %v2709_v44, %v2708_v10  ;;  %v1395_v13 = vrot.slane %v5316_v53, 5  ;;  %v1398_v52 = vrot.slane %v5320_v23, 5  ;;  %v1631_v17 = vor.u32 %v1630_v45, %v1627_v32  ;;  %v5340_v10 = vld [vmem:[%s3938_s19 + $0xc8] sm:$0x1] }
 0x149   : > { %v1646_v29 = vrot.slane %v1644_v37, 5  ;;  %v2730_v41 = vpack.c.b16 %v2701_v25, %v2700_v36  ;;  %v1229_v39 = vshrl.u32 %v3420_v34, 16  ;;  %v1232_v62 = vshll.u32 %v3420_v34, 16 }
 0x14a   : > { %2420 = vrot.lane.b32.xlu0 %v2398_v51, %s3889_s23  ;;  %v1641_v51 = vor.u32 %v1640_v59, %v1636_v43  ;;  %v1396_v21 = vsel %vm4168_vm5, %v3465_v31, %v1395_v13  ;;  %v1397_v40 = vrot.slane %v1395_v13, 4  ;;  %v1242_v44 = vshrl.u32 %v5328_v18, 16 }
 0x14b   : > { %2596 = vrot.lane.b32.xlu1 %v3807_v7, %s3892_s26  ;;  %v2462_v8 = vunpack.c.l.b16 %v1396_v21  ;;  %v1231_v19 = vrot.slane %v1229_v39, 4  ;;  %v1234_v50 = vrot.slane %v1232_v62, 5  ;;  %v2893_v32 = vsel %vm2891_vm9, %v4788_v28, %v5227_v22  ;;  %v3529_v39 = vld [vmem:[%s3938_s19 + $0x9c] sm:$0xe] }
 0x14c   : > { %v2689_v27 = vpop.permute.xlu0 %2688  ;;  %v1642_v16 = vrot.slane %v1641_v51, 4  ;;  %v1399_v7 = vsel %vm4168_vm5, %v1397_v40, %v1398_v52  ;;  %v1244_v37 = vrot.slane %v1242_v44, 4  ;;  %v1248_v25 = vshll.u32 %v5340_v10, 16 }
 0x14d   : > { %v3016_v0 = vsel %vm2990_vm13, %v2983_v42, %v2689_v27  ;;  %v2489_v49 = vpop.permute.xlu1 %2488  ;;  %v1632_v42 = vrot.slane %v1631_v17, 4  ;;  %v5344_v14 = vpop.permute.xlu2 %2506  ;;  %v2463_v3 = vunpack.c.l.b16 %v1399_v7  ;;  %v1133_v45 = vshrl.u32 %v3412_v4, 16  ;;  %v3453_v17 = vld [vmem:[%s3938_s19 + $0xc0] sm:$0xe] }
 0x14e   : > { %v3049_v63 = vsel %vm3023_vm14, %v3016_v0, %v5181_v15  ;;  %v1238_v15 = vshll.u32 %v5328_v18, 16  ;;  %v1647_v36 = vsel %vm3966_vm2, %v1642_v16, %v1646_v29  ;;  %v1235_v27 = vor.u32 %v1234_v50, %v1231_v19  ;;  %v5384_v19 = vld [vmem:[%s3938_s19 + $0xa4] sm:$0x1] }
 0x14f   : > { %3762 = vmatmul.msk.bf16.vlgmr.msra.gmra.mxu3 %vm3079_vm15, %v3049_v63  ;;  %v1637_v1 = vsel %vm3966_vm2, %v1632_v42, %v1636_v43  ;;  %v2629_v24 = vunpack.c.l.b16 %v1647_v36  ;;  %v2926_v43 = vsel %vm2924_vm11, %v2893_v32, %v2489_v49  ;;  %v1136_v31 = vshll.u32 %v3412_v4, 16 }
 0x150   : > { %v2628_v54 = vunpack.c.l.b16 %v1637_v1  ;;  %v1240_v20 = vrot.slane %v1238_v15, 5  ;;  %2756 = vrot.lane.b32.xlu2 %v2734_v9, %s3893_s27  ;;  %v1142_v13 = vshll.u32 %v5316_v53, 16  ;;  %v2483_v34 = vpack.c.b16 %v2463_v3, %v2462_v8 }
 0x151   : > { %v1250_v22 = vrot.slane %v1248_v25, 5  ;;  %v1135_v0 = vrot.slane %v1133_v45, 4  ;;  %v1236_v49 = vrot.slane %v1235_v27, 4  ;;  %v1138_v63 = vrot.slane %v1136_v31, 5  ;;  %v3500_v25 = vld [vmem:[%s3938_s19 + $0xcc] sm:$0xf] }
 0x152   : > { %2588 = vrot.lane.b32.xlu0 %v3803_v61, %s3892_s26  ;;  %v1245_v28 = vor.u32 %v1244_v37, %v1240_v20  ;;  %v2654_v29 = vpack.c.b16 %v2629_v24, %v2628_v54  ;;  %v1144_v9 = vrot.slane %v1142_v13, 5  ;;  %v1152_v21 = vshll.u32 %v5320_v23, 16 }
 0x153   : > { %2748 = vrot.lane.b32.xlu1 %v2730_v41, %s3893_s27  ;;  %v1146_v41 = vshrl.u32 %v5316_v53, 16  ;;  %v1241_v40 = vsel %vm3966_vm2, %v1236_v49, %v1240_v20  ;;  %v1139_v42 = vor.u32 %v1138_v63, %v1135_v0  ;;  %v3469_v16 = vrot.slane %v3453_v17, 9  ;;  %v5401_v0 = vld [vmem:[%s3938_s19 + $0xd0] sm:$0xf]  ;;  %v3492_v63 = vld [vmem:[%s3938_s19 + $0x9c] sm:$0xf] }
 0x154   : > { %v2417_v59 = vpop.permute.xlu0 %2416  ;;  %v1246_v61 = vrot.slane %v1245_v28, 4  ;;  %v1423_v8 = vrot.slane %v5328_v18, 5  ;;  %v2390_v7 = vunpack.c.l.b16 %v1241_v40  ;;  %v5378_v18 = vld [vmem:[%s3938_s19 + $0xa0] sm:$0xf]  ;;  %v1426_v3 = vrot.slane %v5340_v10, 5 }
 0x155   : > { %v5359_v52 = vpop.permute.xlu1 %2592  ;;  %v2901_v51 = vsel %vm2891_vm9, %v5080_v58, %v2417_v59  ;;  %v1148_v53 = vrot.slane %v1146_v41, 4  ;;  %v1140_v62 = vrot.slane %v1139_v42, 4  ;;  %v5380_v1 = vpop.permute.xlu2 %2610  ;;  %v3545_v54 = vrot.slane %v3529_v39, 9 }
 0x156   : > { %v2934_v58 = vsel %vm2924_vm11, %v2901_v51, %v5223_v2  ;;  %v1251_v4 = vsel %vm3966_vm2, %v1246_v61, %v1250_v22  ;;  %v1424_v15 = vsel %vm4168_vm5, %v3469_v16, %v1423_v8  ;;  %v1425_v44 = vrot.slane %v1423_v8, 4 }
 0x157   : > { %v2391_v23 = vunpack.c.l.b16 %v1251_v4  ;;  %v1149_v36 = vor.u32 %v1148_v53, %v1144_v9  ;;  %v1154_v2 = vrot.slane %v1152_v21, 5  ;;  %v1145_v20 = vsel %vm3966_vm2, %v1140_v62, %v1144_v9  ;;  %v3812_v4 = vld [vmem:[%s3938_s19 + $0x9c] sm:$0xff] }
 0x158   : > { %2510 = vrot.lane.b32.xlu2 %v2483_v34, %s3890_s24  ;;  %v2007_v32 = vrot.slane %v5378_v18, 5  ;;  %v2010_v37 = vrot.slane %v5384_v19, 5  ;;  %v1427_v27 = vsel %vm4168_vm5, %v1425_v44, %v1426_v3  ;;  %v2470_v31 = vunpack.c.l.b16 %v1424_v15 }
 0x159   : > { %v2407_v50 = vpack.c.b16 %v2391_v23, %v2390_v7  ;;  %v1150_v10 = vrot.slane %v1149_v36, 4  ;;  %v2382_v13 = vunpack.c.l.b16 %v1145_v20  ;;  %v2471_v51 = vunpack.c.l.b16 %v1427_v27 }
 0x15a   : > { %2676 = vrot.lane.b32.xlu0 %v2654_v29, %s3891_s25  ;;  %v2008_v28 = vsel %vm4168_vm5, %v3545_v54, %v2007_v32  ;;  %v2009_v22 = vrot.slane %v2007_v32, 4  ;;  %v5407_v29 = vld [vmem:[%s3938_s19 + $0xd4] sm:$0x1]  ;;  %v1841_v49 = vshrl.u32 %v3500_v25, 16  ;;  %v1844_v21 = vshll.u32 %v3500_v25, 16 }
 0x15b   : > { %2438 = vrot.lane.b32.xlu1 %v2407_v50, %s3889_s23  ;;  %v2718_v41 = vunpack.c.l.b16 %v2008_v28  ;;  %v1850_v16 = vshll.u32 %v5401_v0, 16  ;;  %v1854_v8 = vshrl.u32 %v5401_v0, 16  ;;  %v1860_v53 = vshll.u32 %v5407_v29, 16 }
 0x15c   : > { %v2585_v24 = vpop.permute.xlu0 %2584  ;;  %v2011_v9 = vsel %vm4168_vm5, %v2009_v22, %v2010_v37  ;;  %v1843_v42 = vrot.slane %v1841_v49, 4  ;;  %v1846_v7 = vrot.slane %v1844_v21, 5  ;;  %v1745_v23 = vshrl.u32 %v3492_v63, 16 }
 0x15d   : > { %v2959_v45 = vsel %vm2957_vm12, %v2926_v43, %v2585_v24  ;;  %v2745_v59 = vpop.permute.xlu1 %2744  ;;  %v1155_v43 = vsel %vm3966_vm2, %v1150_v10, %v1154_v2  ;;  %v2719_v40 = vunpack.c.l.b16 %v2011_v9  ;;  %v2967_v62 = vsel %vm2957_vm12, %v2934_v58, %v5359_v52  ;;  %v5422_v20 = vpop.permute.xlu2 %2762 }
 0x15e   : > { %v2992_v34 = vsel %vm2990_vm13, %v2959_v45, %v5263_v46  ;;  %v2383_v61 = vunpack.c.l.b16 %v1155_v43  ;;  %v3816_v46 = vld [vmem:[%s3938_s19 + $0xcc] sm:$0xff]  ;;  %v1852_v15 = vrot.slane %v1850_v16, 5  ;;  %v1856_v44 = vrot.slane %v1854_v8, 4  ;;  %v3404_v45 = vld [vmem:[%s3938_s19 + $0x60] sm:$0xf] }
 0x15f   : > { %v3025_v17 = vsel %vm3023_vm14, %v2992_v34, %v2745_v59  ;;  %v1748_v36 = vshll.u32 %v3492_v63, 16  ;;  %v2487_v3 = vpack.c.b16 %v2471_v51, %v2470_v31  ;;  %v1847_v54 = vor.u32 %v1846_v7, %v1843_v42  ;;  %v5436_v43 = vld [vmem:[%s3938_s19 + $0x64] sm:$0xf] }
 0x160   : > { %3750 = vmatmul.msk.bf16.vlgmr.msra.gmra.mxu0 %vm3079_vm15, %v3025_v17  ;;  %v2403_v39 = vpack.c.b16 %v2383_v61, %v2382_v13  ;;  %2614 = vrot.lane.b32.xlu2 %v3816_v46, %s3892_s26  ;;  %v1862_v24 = vrot.slane %v1860_v53, 5  ;;  %v1747_v50 = vrot.slane %v1745_v23, 4  ;;  %v1857_v52 = vor.u32 %v1856_v44, %v1852_v15 }
 0x161   : > { %v1750_v58 = vrot.slane %v1748_v36, 5  ;;  %v1754_v25 = vshll.u32 %v5378_v18, 16  ;;  %v2739_v59 = vpack.c.b16 %v2719_v40, %v2718_v41  ;;  %v1848_v27 = vrot.slane %v1847_v54, 4  ;;  %v5456_v54 = vld [vmem:[%s3938_s19 + $0x34] sm:$0xf] }
 0x162   : > { %2430 = vrot.lane.b32.xlu0 %v2403_v39, %s3889_s23  ;;  %v1758_v31 = vshrl.u32 %v5378_v18, 16  ;;  %v1858_v13 = vrot.slane %v1857_v52, 4  ;;  %v1764_v22 = vshll.u32 %v5384_v19, 16  ;;  %v1037_v49 = vshrl.u32 %v3404_v45, 16 }
 0x163   : > { %2606 = vrot.lane.b32.xlu1 %v3812_v4, %s3892_s26  ;;  %v1751_v34 = vor.u32 %v1750_v58, %v1747_v50  ;;  %v1756_v28 = vrot.slane %v1754_v25, 5  ;;  %v1853_v17 = vsel %vm3966_vm2, %v1848_v27, %v1852_v15  ;;  %v1040_v63 = vshll.u32 %v3404_v45, 16  ;;  %v3396_v4 = vld [vmem:[%s3938_s19 + $0x30] sm:$0xf]  ;;  %v5464_v45 = vld [vmem:[%s3938_s19 + $0x38] sm:$0x1] }
 0x164   : > { %v2673_v2 = vpop.permute.xlu0 %2672  ;;  %v1760_v51 = vrot.slane %v1758_v31, 4  ;;  %v1863_v18 = vsel %vm3966_vm2, %v1858_v13, %v1862_v24  ;;  %v2646_v61 = vunpack.c.l.b16 %v1853_v17  ;;  %v1766_v9 = vrot.slane %v1764_v22, 5 }
 0x165   : > { %v3000_v32 = vsel %vm2990_vm13, %v2967_v62, %v2673_v2  ;;  %v5425_v37 = vpop.permute.xlu1 %2434  ;;  %v1752_v46 = vrot.slane %v1751_v34, 4  ;;  %v2647_v41 = vunpack.c.l.b16 %v1863_v18  ;;  %v1039_v19 = vrot.slane %v1037_v49, 4 }
 0x166   : > { %v3033_v10 = vsel %vm3023_vm14, %v3000_v32, %v5303_v57  ;;  %v5441_v57 = vld [vmem:[%s3938_s19 + $0x68] sm:$0x1]  ;;  %v1761_v21 = vor.u32 %v1760_v51, %v1756_v28  ;;  %v1042_v40 = vrot.slane %v1040_v63, 5  ;;  %v1046_v16 = vshll.u32 %v5436_v43, 16  ;;  %v5461_v32 = vpop.permute.xlu2 %2490 }
 0x167   : > { %3754 = vmatmul.msk.bf16.vlgmr.msra.gmra.mxu1 %vm3079_vm15, %v3033_v10  ;;  %v1757_v42 = vsel %vm3966_vm2, %v1752_v46, %v1756_v28  ;;  %v1050_v8 = vshrl.u32 %v5436_v43, 16  ;;  %v1056_v39 = vshll.u32 %v5441_v57, 16  ;;  %v2663_v53 = vpack.c.b16 %v2647_v41, %v2646_v61  ;;  %v3445_v46 = vld [vmem:[%s3938_s19 + $0x60] sm:$0xe] }
 0x168   : > { %2766 = vrot.lane.b32.xlu2 %v2739_v59, %s3893_s27  ;;  %v1762_v23 = vrot.slane %v1761_v21, 4  ;;  %v1043_v62 = vor.u32 %v1042_v40, %v1039_v19  ;;  %v2638_v15 = vunpack.c.l.b16 %v1757_v42  ;;  %v1048_v36 = vrot.slane %v1046_v16, 5  ;;  %v3533_v59 = vld [vmem:[%s3938_s19 + $0xcc] sm:$0xe] }
 0x169   : > { %v1052_v2 = vrot.slane %v1050_v8, 4  ;;  %v941_v50 = vshrl.u32 %v3396_v4, 16  ;;  %v1058_v25 = vrot.slane %v1056_v39, 5  ;;  %v944_v10 = vshll.u32 %v3396_v4, 16 }
 0x16a   : > { %2518 = vrot.lane.b32.xlu0 %v2487_v3, %s3890_s24  ;;  %v1767_v3 = vsel %vm3966_vm2, %v1762_v23, %v1766_v9  ;;  %v1044_v24 = vrot.slane %v1043_v62, 4  ;;  %v950_v13 = vshll.u32 %v5456_v54, 16  ;;  %v954_v34 = vshrl.u32 %v5456_v54, 16 }
 0x16b   : > { %2694 = vrot.lane.b32.xlu1 %v2663_v53, %s3891_s25  ;;  %v2639_v52 = vunpack.c.l.b16 %v1767_v3  ;;  %v1053_v58 = vor.u32 %v1052_v2, %v1048_v36  ;;  %v943_v31 = vrot.slane %v941_v50, 4  ;;  %v946_v51 = vrot.slane %v944_v10, 5 }
 0x16c   : > { %v2427_v7 = vpop.permute.xlu0 %2426  ;;  %v1049_v27 = vsel %vm3966_vm2, %v1044_v24, %v1048_v36  ;;  %v952_v49 = vrot.slane %v950_v13, 5  ;;  %v956_v63 = vrot.slane %v954_v34, 4  ;;  %v960_v18 = vshll.u32 %v5464_v45, 16  ;;  %v3441_v36 = vld [vmem:[%s3938_s19 + $0x30] sm:$0xe] }
 0x16d   : > { %v5453_v44 = vpop.permute.xlu1 %2602  ;;  %v2659_v28 = vpack.c.b16 %v2639_v52, %v2638_v15  ;;  %v1054_v22 = vrot.slane %v1053_v58, 4  ;;  %v2374_v17 = vunpack.c.l.b16 %v1049_v27  ;;  %v3549_v61 = vrot.slane %v3533_v59, 9 }
 0x16e   : > { %v947_v41 = vor.u32 %v946_v51, %v943_v31  ;;  %v2035_v21 = vrot.slane %v5401_v0, 5  ;;  %v2038_v19 = vrot.slane %v5407_v29, 5  ;;  %v2911_v40 = vsel %vm2891_vm9, %v4933_v35, %v2427_v7  ;;  %v5500_v10 = vpop.permute.xlu2 %2594 }
 0x16f   : > { %v1059_v9 = vsel %vm3966_vm2, %v1054_v22, %v1058_v25  ;;  %v957_v8 = vor.u32 %v956_v63, %v952_v49  ;;  %v962_v39 = vrot.slane %v960_v18, 5  ;;  %v3461_v0 = vrot.slane %v3445_v46, 9  ;;  %v3476_v25 = vld [vmem:[%s3938_s19 + $0x3c] sm:$0xf]  ;;  %v3477_v46 = vld [vmem:[%s3938_s19 + $0x40] sm:$0xf] }
 0x170   : > { %v2375_v16 = vunpack.c.l.b16 %v1059_v9  ;;  %v948_v4 = vrot.slane %v947_v41, 4  ;;  %v2036_v53 = vsel %vm4168_vm5, %v3549_v61, %v2035_v21  ;;  %v2037_v23 = vrot.slane %v2035_v21, 4  ;;  %v3505_v21 = vld [vmem:[%s3938_s19 + $0x44] sm:$0x1] }
 0x171   : > { %v2919_v29 = vsel %vm2891_vm9, %v5189_v38, %v5425_v37  ;;  %v958_v7 = vrot.slane %v957_v8, 4  ;;  %v2726_v15 = vunpack.c.l.b16 %v2036_v53  ;;  %v2944_v2 = vsel %vm2924_vm11, %v2911_v40, %v5344_v14 }
 0x172   : > { %2686 = vrot.lane.b32.xlu0 %v2659_v28, %s3891_s25  ;;  %v2399_v35 = vpack.c.b16 %v2375_v16, %v2374_v17  ;;  %v953_v3 = vsel %vm3966_vm2, %v948_v4, %v952_v49  ;;  %v2039_v24 = vsel %vm4168_vm5, %v2037_v23, %v2038_v19  ;;  %v1367_v50 = vrot.slane %v5436_v43, 5 }
 0x173   : > { %v963_v38 = vsel %vm3966_vm2, %v958_v7, %v962_v39  ;;  %v2366_v37 = vunpack.c.l.b16 %v953_v3  ;;  %v2727_v52 = vunpack.c.l.b16 %v2039_v24  ;;  %v1370_v58 = vrot.slane %v5441_v57, 5  ;;  %v3484_v3 = vld [vmem:[%s3938_s19 + $0x6c] sm:$0xf] }
 0x174   : > { %v2515_v42 = vpop.permute.xlu0 %2514  ;;  %2422 = vrot.lane.b32.xlu2 %v2399_v35, %s3889_s23  ;;  %v2367_v14 = vunpack.c.l.b16 %v963_v38  ;;  %v1368_v59 = vsel %vm4168_vm5, %v3461_v0, %v1367_v50  ;;  %v1369_v27 = vrot.slane %v1367_v50, 4  ;;  %v3457_v31 = vrot.slane %v3441_v36, 9  ;;  %v3485_v35 = vld [vmem:[%s3938_s19 + $0x70] sm:$0xf]  ;;  %v3525_v36 = vld [vmem:[%s3938_s19 + $0x6c] sm:$0xe] }
 0x175   : > { %v5482_v62 = vpop.permute.xlu1 %2690  ;;  %v2977_v43 = vsel %vm2957_vm12, %v2944_v2, %v5453_v44  ;;  %v2743_v13 = vpack.c.b16 %v2727_v52, %v2726_v15  ;;  %v1339_v34 = vrot.slane %v5456_v54, 5  ;;  %v1342_v28 = vrot.slane %v5464_v45, 5  ;;  %v3804_v54 = vld [vmem:[%s3938_s19 + $0x3c] sm:$0xff] }
 0x176   : > { %v2395_v57 = vpack.c.b16 %v2367_v14, %v2366_v37  ;;  %v1371_v22 = vsel %vm4168_vm5, %v1369_v27, %v1370_v58  ;;  %v1553_v17 = vshrl.u32 %v3476_v25, 16  ;;  %v1556_v51 = vshll.u32 %v3476_v25, 16  ;;  %v3521_v38 = vld [vmem:[%s3938_s19 + $0x3c] sm:$0xe]  ;;  %v5533_v37 = vpop.permute.xlu2 %2746  ;;  %v3509_v14 = vld [vmem:[%s3938_s19 + $0x74] sm:$0x1] }
 0x177   : > { %v2454_v63 = vunpack.c.l.b16 %v1368_v59  ;;  %v2455_v18 = vunpack.c.l.b16 %v1371_v22  ;;  %v1340_v44 = vsel %vm4168_vm5, %v3457_v31, %v1339_v34  ;;  %v1341_v61 = vrot.slane %v1339_v34, 4 }
 0x178   : > { %2414 = vrot.lane.b32.xlu1 %v2395_v57, %s3889_s23  ;;  %v2446_v9 = vunpack.c.l.b16 %v1340_v44  ;;  %v1555_v19 = vrot.slane %v1553_v17, 4  ;;  %v1558_v40 = vrot.slane %v1556_v51, 5  ;;  %v2952_v16 = vsel %vm2924_vm11, %v2919_v29, %v2515_v42 }
 0x179   : > { %v1343_v39 = vsel %vm4168_vm5, %v1341_v61, %v1342_v28  ;;  %v1562_v23 = vshll.u32 %v3477_v46, 16  ;;  %v1566_v0 = vshrl.u32 %v3477_v46, 16  ;;  %v2479_v7 = vpack.c.b16 %v2455_v18, %v2454_v63 }
 0x17a   : > { %2774 = vrot.lane.b32.xlu0 %v2743_v13, %s3893_s27  ;;  %v2447_v4 = vunpack.c.l.b16 %v1343_v39  ;;  %v1559_v53 = vor.u32 %v1558_v40, %v1555_v19  ;;  %v1572_v15 = vshll.u32 %v3505_v21, 16  ;;  %v2985_v24 = vsel %vm2957_vm12, %v2952_v16, %v5380_v1 }
 0x17b   : > { %v1564_v29 = vrot.slane %v1562_v23, 5  ;;  %v1568_v2 = vrot.slane %v1566_v0, 4  ;;  %v1979_v50 = vrot.slane %v3485_v35, 5  ;;  %v1951_v59 = vrot.slane %v3477_v46, 5 }
 0x17c   : > { %v2683_v49 = vpop.permute.xlu0 %2682  ;;  %2590 = vrot.lane.b32.xlu2 %v3804_v54, %s3892_s26  ;;  %v2475_v42 = vpack.c.b16 %v2447_v4, %v2446_v9  ;;  %v1574_v25 = vrot.slane %v1572_v15, 5  ;;  %v3018_v27 = vsel %vm2990_vm13, %v2985_v24, %v5482_v62  ;;  %v1649_v13 = vshrl.u32 %v3484_v3, 16  ;;  %v3808_v54 = vld [vmem:[%s3938_s19 + $0x6c] sm:$0xff] }
 0x17d   : > { %v3010_v45 = vsel %vm2990_vm13, %v2977_v43, %v2683_v49  ;;  %v5517_v41 = vpop.permute.xlu1 %2418  ;;  %v1569_v58 = vor.u32 %v1568_v2, %v1564_v29  ;;  %v3541_v43 = vrot.slane %v3525_v36, 9  ;;  %v3537_v57 = vrot.slane %v3521_v38, 9 }
 0x17e   : > { %v3043_v8 = vsel %vm3023_vm14, %v3010_v45, %v5422_v20  ;;  %v1560_v20 = vrot.slane %v1559_v53, 4  ;;  %v1954_v22 = vrot.slane %v3505_v21, 5  ;;  %v1981_v51 = vrot.slane %v1979_v50, 4 }
 0x17f   : > { %3759 = vmatmul.msk.bf16.gmra.mxu2 %vm3079_vm15, %v3043_v8  ;;  %v1570_v34 = vrot.slane %v1569_v58, 4  ;;  %v1982_v49 = vrot.slane %v3509_v14, 5  ;;  %v1953_v62 = vrot.slane %v1951_v59, 4  ;;  %v1651_v18 = vrot.slane %v1649_v13, 4 }
 0x180   : > { %v1565_v52 = vsel %vm3966_vm2, %v1560_v20, %v1564_v29  ;;  %2502 = vrot.lane.b32.xlu1 %v2479_v7, %s3890_s24  ;;  %v1652_v44 = vshll.u32 %v3484_v3, 16  ;;  %v1658_v61 = vshll.u32 %v3485_v35, 16  ;;  %v1662_v45 = vshrl.u32 %v3485_v35, 16 }
 0x181   : > { %v2622_v17 = vunpack.c.l.b16 %v1565_v52  ;;  %v1575_v63 = vsel %vm3966_vm2, %v1570_v34, %v1574_v25  ;;  %v1668_v9 = vshll.u32 %v3509_v14, 16  ;;  %v1952_v19 = vsel %vm4168_vm5, %v3537_v57, %v1951_v59 }
 0x182   : > { %2494 = vrot.lane.b32.xlu0 %v2475_v42, %s3890_s24  ;;  %v2623_v46 = vunpack.c.l.b16 %v1575_v63  ;;  %v1955_v21 = vsel %vm4168_vm5, %v1953_v62, %v1954_v22  ;;  %v1654_v40 = vrot.slane %v1652_v44, 5  ;;  %v1660_v16 = vrot.slane %v1658_v61, 5  ;;  %v2437_v42 = vpop.permute.xlu2 %2436 }
 0x183   : > { %v1980_v39 = vsel %vm4168_vm5, %v3541_v43, %v1979_v50  ;;  %v1983_v4 = vsel %vm4168_vm5, %v1981_v51, %v1982_v49  ;;  %v1664_v53 = vrot.slane %v1662_v45, 4  ;;  %v2702_v35 = vunpack.c.l.b16 %v1952_v19 }
 0x184   : > { %v2771_v31 = vpop.permute.xlu0 %2770  ;;  %v2651_v8 = vpack.c.b16 %v2623_v46, %v2622_v17  ;;  %v1655_v23 = vor.u32 %v1654_v40, %v1651_v18  ;;  %v2703_v7 = vunpack.c.l.b16 %v1955_v21  ;;  %v1670_v36 = vrot.slane %v1668_v9, 5 }
 0x185   : > { %v3051_v1 = vsel %vm3023_vm14, %v3018_v27, %v2771_v31  ;;  %v2587_v28 = vpop.permute.xlu1 %2586  ;;  %v1665_v15 = vor.u32 %v1664_v53, %v1660_v16  ;;  %v2710_v20 = vunpack.c.l.b16 %v1980_v39  ;;  %v2711_v29 = vunpack.c.l.b16 %v1983_v4 }
 0x186   : > { %3763 = vmatmul.msk.bf16.gmra.mxu3 %vm3079_vm15, %v3051_v1  ;;  %v1656_v3 = vrot.slane %v1655_v23, 4  ;;  %v2731_v50 = vpack.c.b16 %v2703_v7, %v2702_v35  ;;  %v2928_v14 = vsel %vm2924_vm11, %v5194_v56, %v5461_v32  ;;  %v2903_v56 = vsel %vm2891_vm9, %v5040_v6, %v5517_v41 }
 0x187   : > { %v1666_v24 = vrot.slane %v1665_v15, 4  ;;  %v2735_v58 = vpack.c.b16 %v2711_v29, %v2710_v20  ;;  %v2961_v27 = vsel %vm2957_vm12, %v2928_v14, %v2587_v28  ;;  %v2921_v6 = vsel %vm2891_vm9, %v5162_v47, %v2437_v42 }
 0x188   : > { %2670 = vrot.lane.b32.xlu1 %v2651_v8, %s3891_s25  ;;  %v1661_v60 = vsel %vm3966_vm2, %v1656_v3, %v1660_v16 }
 0x189   : > { %v1671_v38 = vsel %vm3966_vm2, %v1666_v24, %v1670_v36  ;;  %v2630_v52 = vunpack.c.l.b16 %v1661_v60  ;;  %v5607_v36 = vld [vmem:[%s5755_s2] ss:$0 sm:$0xff] }
 0x18a   : > { %2598 = vrot.lane.b32.xlu0 %v3808_v54, %s3892_s26  ;;  %v2631_v25 = vunpack.c.l.b16 %v1671_v38  ;;  %v2605_v32 = vpop.permute.xlu2 %2604 }
 0x18c   : > { %v2499_v0 = vpop.permute.xlu0 %2498  ;;  %v2655_v59 = vpack.c.b16 %v2631_v25, %v2630_v52 }
 0x18d   : > { %v2675_v2 = vpop.permute.xlu1 %2674  ;;  %v2936_v1 = vsel %vm2924_vm11, %v2903_v56, %v2499_v0 }
 0x18e   : > { %2678 = vrot.lane.b32.xlu2 %v2655_v59, %s3891_s25  ;;  %v2969_v34 = vsel %vm2957_vm12, %v2936_v1, %v5500_v10 }
 0x18f   : > { %v3002_v28 = vsel %vm2990_vm13, %v2969_v34, %v2675_v2 }
 0x190   : > { %2758 = vrot.lane.b32.xlu1 %v2735_v58, %s3893_s27 }
 0x192   : > { %2750 = vrot.lane.b32.xlu0 %v2731_v50, %s3893_s27 }
 0x194   : > { %v2667_v31 = vpop.permute.xlu0 %2666 }
 0x195   : > { %v2994_v43 = vsel %vm2990_vm13, %v2961_v27, %v2667_v31  ;;  %v2429_v13 = vpop.permute.xlu1 %2428 }
 0x196   : > { %v3027_v26 = vsel %vm3023_vm14, %v2994_v43, %v5533_v37  ;;  %v2693_v37 = vpop.permute.xlu2 %2692  ;;  %v2913_v61 = vsel %vm2891_vm9, %v5154_v30, %v2429_v13 }
 0x197   : > { %3751 = vmatmul.msk.bf16.gmra.mxu0 %vm3079_vm15, %v3027_v26 }
 0x19c   : > { %v2755_v57 = vpop.permute.xlu0 %2754 }
 0x19d   : > { %v3035_v22 = vsel %vm3023_vm14, %v3002_v28, %v2755_v57  ;;  %v2517_v17 = vpop.permute.xlu1 %2516 }
 0x19e   : > { %3755 = vmatmul.msk.bf16.gmra.mxu1 %vm3079_vm15, %v3035_v22  ;;  %v2413_v41 = vpop.permute.xlu2 %2412  ;;  %v2954_v62 = vsel %vm2924_vm11, %v2921_v6, %v2517_v17 }
 0x19f   : > { %v2897_v39 = vsel %vm2891_vm9, %v4999_v55, %v2413_v41 }
 0x1a4   : > { %v2509_v51 = vpop.permute.xlu0 %2508 }
 0x1a5   : > { %v2685_v49 = vpop.permute.xlu1 %2684  ;;  %v2946_v54 = vsel %vm2924_vm11, %v2913_v61, %v2509_v51 }
 0x1a6   : > { %v2979_v47 = vsel %vm2957_vm12, %v2946_v54, %v2605_v32  ;;  %v2501_v19 = vpop.permute.xlu2 %2500 }
 0x1a7   : > { %v3012_v45 = vsel %vm2990_vm13, %v2979_v47, %v2685_v49 }
 0x1ac   : > { %v2613_v63 = vpop.permute.xlu0 %2612 }
 0x1ad   : > { %v2987_v10 = vsel %vm2957_vm12, %v2954_v62, %v2613_v63  ;;  %v2773_v18 = vpop.permute.xlu1 %2772 }
 0x1ae   : > { %v3020_v44 = vsel %vm2990_vm13, %v2987_v10, %v2693_v37  ;;  %v2669_v8 = vpop.permute.xlu2 %2668 }
 0x1af   : > { %v3053_v46 = vsel %vm3023_vm14, %v3020_v44, %v2773_v18 }
 0x1b0   : > { %3764 = vmatmul.msk.bf16.gmra.mxu3 %vm3079_vm15, %v3053_v46 }
 0x1b4   : > { %v2765_v9 = vpop.permute.xlu0 %2764 }
 0x1b5   : > { %v3045_v21 = vsel %vm3023_vm14, %v3012_v45, %v2765_v9  ;;  %v2493_v40 = vpop.permute.xlu1 %2492 }
 0x1b6   : > { %3760 = vmatmul.msk.bf16.gmra.mxu2 %vm3079_vm15, %v3045_v21  ;;  %v2930_v4 = vsel %vm2924_vm11, %v2897_v39, %v2493_v40  ;;  %v2757_v55 = vpop.permute.xlu2 %2756 }
 0x1bc   : > { %v2421_v16 = vpop.permute.xlu0 %2420 }
 0x1bd   : > { %v2597_v30 = vpop.permute.xlu1 %2596  ;;  %v2905_v15 = vsel %vm2891_vm9, %v4891_v5, %v2421_v16 }
 0x1be   : > { %v2938_v42 = vsel %vm2924_vm11, %v2905_v15, %v2501_v19  ;;  %v2511_v52 = vpop.permute.xlu2 %2510 }
 0x1bf   : > { %v2971_v29 = vsel %vm2957_vm12, %v2938_v42, %v2597_v30 }
 0x1c4   : > { %v2589_v53 = vpop.permute.xlu0 %2588 }
 0x1c5   : > { %v2963_v23 = vsel %vm2957_vm12, %v2930_v4, %v2589_v53  ;;  %v2749_v0 = vpop.permute.xlu1 %2748 }
 0x1c6   : > { %v2996_v35 = vsel %vm2990_vm13, %v2963_v23, %v2669_v8  ;;  %v2615_v56 = vpop.permute.xlu2 %2614 }
 0x1c7   : > { %v3029_v7 = vsel %vm3023_vm14, %v2996_v35, %v2749_v0 }
 0x1c8   : > { %3752 = vmatmul.msk.bf16.gmra.mxu0 %vm3079_vm15, %v3029_v7 }
 0x1cb   : > { %v3165_v20 = vpop.f32.mrf.mxu2 }
 0x1cc   : > { %v2677_v2 = vpop.permute.xlu0 %2676  ;;  %v3166_v3 = vadd.f32 %v5607_v36, %v3165_v20 }
 0x1cd   : > { %v3004_v24 = vsel %vm2990_vm13, %v2971_v29, %v2677_v2  ;;  %v2439_v50 = vpop.permute.xlu1 %2438 }
 0x1ce   : > { %v3037_v5 = vsel %vm3023_vm14, %v3004_v24, %v2757_v55  ;;  %v3221_v60 = vmax.f32 %v3166_v3, 0.0  ;;  %v2767_v10 = vpop.permute.xlu2 %2766  ;;  %v2923_v46 = vsel %vm2891_vm9, %v5022_v11, %v2439_v50 }
 0x1cf   : > { %3756 = vmatmul.msk.bf16.gmra.mxu1 %vm3079_vm15, %v3037_v5 }
 0x1d0   : > { %3253 = vst.msk [vmem:[%s5617_s16 + $0x80] sm:$0xff] %vm2825_vm7, %v3221_v60 }
 0x1d2   : > { %v3185_v38 = vpop.f32.mrf.mxu3 }
 0x1d3   : > { %v3186_v58 = vadd.f32 %v5607_v36, %v3185_v38  ;;  %v3167_v25 = vpop.f32.mrf.mxu2 }
 0x1d4   : > { %v3168_v14 = vadd.f32 %v5607_v36, %v3167_v25  ;;  %v2431_v27 = vpop.permute.xlu0 %2430 }
 0x1d5   : > { %v3229_v59 = vmax.f32 %v3186_v58, 0.0  ;;  %v2607_v26 = vpop.permute.xlu1 %2606  ;;  %v2915_v22 = vsel %vm2891_vm9, %v5128_v12, %v2431_v27 }
 0x1d6   : > { %v3222_v31 = vmax.f32 %v3168_v14, 0.0  ;;  %v2948_v37 = vsel %vm2924_vm11, %v2915_v22, %v2511_v52  ;;  %v2423_v30 = vpop.permute.xlu2 %2422 }
 0x1d7   : > { %3261 = vst.msk [vmem:[%s5617_s16 + $0xc0] sm:$0xff] %vm2825_vm7, %v3229_v59  ;;  %v2981_v41 = vsel %vm2957_vm12, %v2948_v37, %v2607_v26  ;;  %v2907_v35 = vsel %vm2891_vm9, %v5118_v48, %v2423_v30 }
 0x1d8   : > { %3254 = vst.msk [vmem:[%s5617_s16 + $0x88] sm:$0xff] %vm2825_vm7, %v3222_v31 }
 0x1da   : > { %v3187_v43 = vpop.f32.mrf.mxu3 }
 0x1db   : > { %v3188_v13 = vadd.f32 %v5607_v36, %v3187_v43 }
 0x1dc   : > { %v2519_v34 = vpop.permute.xlu0 %2518 }
 0x1dd   : > { %v3230_v32 = vmax.f32 %v3188_v13, 0.0  ;;  %v3125_v1 = vpop.f32.mrf.mxu0  ;;  %v2695_v51 = vpop.permute.xlu1 %2694  ;;  %v2956_v54 = vsel %vm2924_vm11, %v2923_v46, %v2519_v34 }
 0x1de   : > { %v3126_v28 = vadd.f32 %v5607_v36, %v3125_v1  ;;  %v2989_v45 = vsel %vm2957_vm12, %v2956_v54, %v2615_v56  ;;  %v2591_v4 = vpop.permute.xlu2 %2590 }
 0x1df   : > { %3262 = vst.msk [vmem:[%s5617_s16 + $0xc8] sm:$0xff] %vm2825_vm7, %v3230_v32  ;;  %v3022_v19 = vsel %vm2990_vm13, %v2989_v45, %v2695_v51 }
 0x1e0   : > { %v3205_v57 = vmax.f32 %v3126_v28, 0.0 }
 0x1e2   : > { %3237 = vst.msk [vmem:[%s5617_s16] sm:$0xff] %vm2825_vm7, %v3205_v57 }
 0x1e4   : > { %v3145_v17 = vpop.f32.mrf.mxu1  ;;  %v2687_v62 = vpop.permute.xlu0 %2686 }
 0x1e5   : > { %v3146_v49 = vadd.f32 %v5607_v36, %v3145_v17  ;;  %v3127_v6 = vpop.f32.mrf.mxu0  ;;  %v3014_v12 = vsel %vm2990_vm13, %v2981_v41, %v2687_v62 }
 0x1e6   : > { %v3128_v63 = vadd.f32 %v5607_v36, %v3127_v6  ;;  %v3047_v44 = vsel %vm3023_vm14, %v3014_v12, %v2767_v10 }
 0x1e7   : > { %v3213_v18 = vmax.f32 %v3146_v49, 0.0  ;;  %3761 = vmatmul.msk.bf16.gmra.mxu2 %vm3079_vm15, %v3047_v44 }
 0x1e8   : > { %v3206_v61 = vmax.f32 %v3128_v63, 0.0  ;;  %v2679_v29 = vpop.permute.xlu2 %2678 }
 0x1e9   : > { %3245 = vst.msk [vmem:[%s5617_s16 + $0x40] sm:$0xff] %vm2825_vm7, %v3213_v18 }
 0x1ea   : > { %3238 = vst.msk [vmem:[%s5617_s16 + $0x8] sm:$0xff] %vm2825_vm7, %v3206_v61  ;;  %v2415_v40 = vpop.permute.xlu1 %2414 }
 0x1eb   : > { %v2899_v0 = vsel %vm2891_vm9, %v4850_v33, %v2415_v40 }
 0x1ec   : > { %v3147_v47 = vpop.f32.mrf.mxu1  ;;  %v2775_v21 = vpop.permute.xlu0 %2774 }
 0x1ed   : > { %v3148_v9 = vadd.f32 %v5607_v36, %v3147_v47  ;;  %v3055_v11 = vsel %vm3023_vm14, %v3022_v19, %v2775_v21 }
 0x1ee   : > { %3765 = vmatmul.msk.bf16.gmra.mxu3 %vm3079_vm15, %v3055_v11 }
 0x1ef   : > { %v3214_v16 = vmax.f32 %v3148_v9, 0.0 }
 0x1f1   : > { %3246 = vst.msk [vmem:[%s5617_s16 + $0x48] sm:$0xff] %vm2825_vm7, %v3214_v16 }
 0x1f2   : > { %v2503_v39 = vpop.permute.xlu1 %2502 }
 0x1f3   : > { %v2940_v55 = vsel %vm2924_vm11, %v2907_v35, %v2503_v39 }
 0x1f4   : > { %v2495_v8 = vpop.permute.xlu0 %2494 }
 0x1f5   : > { %v2932_v7 = vsel %vm2924_vm11, %v2899_v0, %v2495_v8 }
 0x1f6   : > { %v2965_v2 = vsel %vm2957_vm12, %v2932_v7, %v2591_v4 }
 0x1fa   : > { %v2671_v23 = vpop.permute.xlu1 %2670 }
 0x1fb   : > { %v2998_v24 = vsel %vm2990_vm13, %v2965_v2, %v2671_v23 }
 0x1fc   : > { %v2599_v53 = vpop.permute.xlu0 %2598 }
 0x1fd   : > { %v2973_v20 = vsel %vm2957_vm12, %v2940_v55, %v2599_v53 }
 0x1fe   : > { %v3006_v48 = vsel %vm2990_vm13, %v2973_v20, %v2679_v29 }
 0x202   : > { %v3170_v15 = vpop.f32.mrf.mxu2  ;;  %v2759_v5 = vpop.permute.xlu1 %2758 }
 0x203   : > { %v3171_v42 = vadd.f32 %v5607_v36, %v3170_v15  ;;  %v3039_v50 = vsel %vm3023_vm14, %v3006_v48, %v2759_v5 }
 0x204   : > { %v2751_v33 = vpop.permute.xlu0 %2750  ;;  %3757 = vmatmul.msk.bf16.gmra.mxu1 %vm3079_vm15, %v3039_v50 }
 0x205   : > { %v3223_v3 = vmax.f32 %v3171_v42, 0.0  ;;  %v3031_v60 = vsel %vm3023_vm14, %v2998_v24, %v2751_v33 }
 0x206   : > { %3753 = vmatmul.msk.bf16.gmra.mxu0 %vm3079_vm15, %v3031_v60 }
 0x207   : > { %3255 = vst.msk [vmem:[%s5617_s16 + $0x90] sm:$0xff] %vm2825_vm7, %v3223_v3 }
 0x209   : > { %v3190_v38 = vpop.f32.mrf.mxu3 }
 0x20a   : > { %v3191_v52 = vadd.f32 %v5607_v36, %v3190_v38  ;;  %v3172_v58 = vpop.f32.mrf.mxu2 }
 0x20b   : > { %v3173_v25 = vadd.f32 %v5607_v36, %v3172_v58 }
 0x20c   : > { %v3231_v14 = vmax.f32 %v3191_v52, 0.0 }
 0x20d   : > { %v3224_v59 = vmax.f32 %v3173_v25, 0.0 }
 0x20e   : > { %3263 = vst.msk [vmem:[%s5617_s16 + $0xd0] sm:$0xff] %vm2825_vm7, %v3231_v14 }
 0x20f   : > { %3256 = vst.msk [vmem:[%s5617_s16 + $0x98] sm:$0xff] %vm2825_vm7, %v3224_v59 }
 0x211   : > { %v3192_v27 = vpop.f32.mrf.mxu3 }
 0x212   : > { %v3193_v31 = vadd.f32 %v5607_v36, %v3192_v27 }
 0x214   : > { %v3232_v43 = vmax.f32 %v3193_v31, 0.0  ;;  %v3130_v13 = vpop.f32.mrf.mxu0 }
 0x215   : > { %v3131_v26 = vadd.f32 %v5607_v36, %v3130_v13 }
 0x216   : > { %3264 = vst.msk [vmem:[%s5617_s16 + $0xd8] sm:$0xff] %vm2825_vm7, %v3232_v43 }
 0x217   : > { %v3207_v56 = vmax.f32 %v3131_v26, 0.0 }
 0x219   : > { %3239 = vst.msk [vmem:[%s5617_s16 + $0x10] sm:$0xff] %vm2825_vm7, %v3207_v56 }
 0x21b   : > { %v3150_v32 = vpop.f32.mrf.mxu1 }
 0x21c   : > { %v3151_v1 = vadd.f32 %v5607_v36, %v3150_v32  ;;  %v3132_v34 = vpop.f32.mrf.mxu0 }
 0x21d   : > { %v3133_v28 = vadd.f32 %v5607_v36, %v3132_v34 }
 0x21e   : > { %v3215_v57 = vmax.f32 %v3151_v1, 0.0 }
 0x21f   : > { %v3208_v22 = vmax.f32 %v3133_v28, 0.0 }
 0x220   : > { %3247 = vst.msk [vmem:[%s5617_s16 + $0x50] sm:$0xff] %vm2825_vm7, %v3215_v57 }
 0x221   : > { %3240 = vst.msk [vmem:[%s5617_s16 + $0x18] sm:$0xff] %vm2825_vm7, %v3208_v22 }
 0x223   : > { %v3152_v17 = vpop.f32.mrf.mxu1 }
 0x224   : > { %v3153_v37 = vadd.f32 %v5607_v36, %v3152_v17 }
 0x226   : > { %v3216_v51 = vmax.f32 %v3153_v37, 0.0 }
 0x228   : > { %3248 = vst.msk [vmem:[%s5617_s16 + $0x58] sm:$0xff] %vm2825_vm7, %v3216_v51 }
 0x233   : > { %v3195_v49 = vpop.f32.mrf.mxu3 }
 0x234   : > { %v3196_v6 = vadd.f32 %v5607_v36, %v3195_v49 }
 0x236   : > { %v3233_v41 = vmax.f32 %v3196_v6, 0.0 }
 0x238   : > { %3265 = vst.msk [vmem:[%s5617_s16 + $0xe0] sm:$0xff] %vm2825_vm7, %v3233_v41 }
 0x239   : > { %v3175_v62 = vpop.f32.mrf.mxu2 }
 0x23a   : > { %v3176_v63 = vadd.f32 %v5607_v36, %v3175_v62 }
 0x23b   : > { %v3197_v10 = vpop.f32.mrf.mxu3 }
 0x23c   : > { %v3225_v18 = vmax.f32 %v3176_v63, 0.0  ;;  %v3198_v12 = vadd.f32 %v5607_v36, %v3197_v10 }
 0x23e   : > { %3257 = vst.msk [vmem:[%s5617_s16 + $0xa0] sm:$0xff] %vm2825_vm7, %v3225_v18  ;;  %v3234_v44 = vmax.f32 %v3198_v12, 0.0 }
 0x240   : > { %3266 = vst.msk [vmem:[%s5617_s16 + $0xe8] sm:$0xff] %vm2825_vm7, %v3234_v44 }
 0x241   : > { %v3177_v61 = vpop.f32.mrf.mxu2 }
 0x242   : > { %v3178_v46 = vadd.f32 %v5607_v36, %v3177_v61 }
 0x244   : > { %v3226_v54 = vmax.f32 %v3178_v46, 0.0 }
 0x245   : > { %v3135_v47 = vpop.f32.mrf.mxu0 }
 0x246   : > { %3258 = vst.msk [vmem:[%s5617_s16 + $0xa8] sm:$0xff] %vm2825_vm7, %v3226_v54  ;;  %v3136_v45 = vadd.f32 %v5607_v36, %v3135_v47 }
 0x248   : > { %v3209_v9 = vmax.f32 %v3136_v45, 0.0 }
 0x24a   : > { %3241 = vst.msk [vmem:[%s5617_s16 + $0x20] sm:$0xff] %vm2825_vm7, %v3209_v9 }
 0x24c   : > { %v3155_v19 = vpop.f32.mrf.mxu1 }
 0x24d   : > { %v3156_v21 = vadd.f32 %v5607_v36, %v3155_v19  ;;  %v3137_v40 = vpop.f32.mrf.mxu0 }
 0x24e   : > { %v3138_v16 = vadd.f32 %v5607_v36, %v3137_v40 }
 0x24f   : > { %v3217_v11 = vmax.f32 %v3156_v21, 0.0 }
 0x250   : > { %v3210_v30 = vmax.f32 %v3138_v16, 0.0 }
 0x251   : > { %3249 = vst.msk [vmem:[%s5617_s16 + $0x60] sm:$0xff] %vm2825_vm7, %v3217_v11 }
 0x252   : > { %3242 = vst.msk [vmem:[%s5617_s16 + $0x28] sm:$0xff] %vm2825_vm7, %v3210_v30 }
 0x254   : > { %v3157_v8 = vpop.f32.mrf.mxu1 }
 0x255   : > { %v3158_v39 = vadd.f32 %v5607_v36, %v3157_v8 }
 0x257   : > { %v3218_v4 = vmax.f32 %v3158_v39, 0.0 }
 0x259   : > { %3250 = vst.msk [vmem:[%s5617_s16 + $0x68] sm:$0xff] %vm2825_vm7, %v3218_v4 }
 0x26a   : > { %v3180_v53 = vpop.f32.mrf.mxu2 }
 0x26b   : > { %v3181_v23 = vadd.f32 %v5607_v36, %v3180_v53 }
 0x26d   : > { %v3227_v0 = vmax.f32 %v3181_v23, 0.0 }
 0x26f   : > { %3259 = vst.msk [vmem:[%s5617_s16 + $0xb0] sm:$0xff] %vm2825_vm7, %v3227_v0 }
 0x271   : > { %v3200_v35 = vpop.f32.mrf.mxu3 }
 0x272   : > { %v3201_v7 = vadd.f32 %v5607_v36, %v3200_v35  ;;  %v3182_v15 = vpop.f32.mrf.mxu2 }
 0x273   : > { %v3183_v55 = vadd.f32 %v5607_v36, %v3182_v15 }
 0x274   : > { %v3235_v42 = vmax.f32 %v3201_v7, 0.0 }
 0x275   : > { %v3228_v20 = vmax.f32 %v3183_v55, 0.0 }
 0x276   : > { %3267 = vst.msk [vmem:[%s5617_s16 + $0xf0] sm:$0xff] %vm2825_vm7, %v3235_v42 }
 0x277   : > { %3260 = vst.msk [vmem:[%s5617_s16 + $0xb8] sm:$0xff] %vm2825_vm7, %v3228_v20 }
 0x279   : > { %v3202_v29 = vpop.f32.mrf.mxu3 }
 0x27a   : > { %v3203_v2 = vadd.f32 %v5607_v36, %v3202_v29 }
 0x27c   : > { %v3236_v3 = vmax.f32 %v3203_v2, 0.0 }
 0x27e   : > { %3268 = vst.msk [vmem:[%s5617_s16 + $0xf8] sm:$0xff] %vm2825_vm7, %v3236_v3 }
 0x281   : > { %v3160_v48 = vpop.f32.mrf.mxu1 }
 0x282   : > { %v3161_v5 = vadd.f32 %v5607_v36, %v3160_v48 }
 0x283   : > { %v3140_v24 = vpop.f32.mrf.mxu0 }
 0x284   : > { %v3141_v33 = vadd.f32 %v5607_v36, %v3140_v24  ;;  %v3219_v50 = vmax.f32 %v3161_v5, 0.0 }
 0x286   : > { %v3211_v60 = vmax.f32 %v3141_v33, 0.0  ;;  %3251 = vst.msk [vmem:[%s5617_s16 + $0x70] sm:$0xff] %vm2825_vm7, %v3219_v50 }
 0x288   : > { %3243 = vst.msk [vmem:[%s5617_s16 + $0x30] sm:$0xff] %vm2825_vm7, %v3211_v60 }
 0x289   : > { %v3162_v58 = vpop.f32.mrf.mxu1 }
 0x28a   : > { %v3163_v25 = vadd.f32 %v5607_v36, %v3162_v58 }
 0x28b   : > { %v3142_v38 = vpop.f32.mrf.mxu0 }
 0x28c   : > { %v3143_v52 = vadd.f32 %v5607_v36, %v3142_v38  ;;  %v3220_v59 = vmax.f32 %v3163_v25, 0.0 }
 0x28e   : > { %v3212_v14 = vmax.f32 %v3143_v52, 0.0  ;;  %3252 = vst.msk [vmem:[%s5617_s16 + $0x78] sm:$0xff] %vm2825_vm7, %v3220_v59 }
 0x290   : > { %3244 = vst.msk [vmem:[%s5617_s16 + $0x38] sm:$0xff] %vm2825_vm7, %v3212_v14 }
 0x291 PF: > { %s13_s14 = sadd.s32 1, %s3884_s14   ;;  %s5761_s12 = smov %s3880_s13 }
 0x292   : > { %p10_p5 = scmp.ge.s32.totalorder %s13_s14, 4   ;;  %s5762_s13 = smov %s5764_s15 }
 0x294   :  { %12 = sbr.rel (!%p10_p5) target bundleno = 2 (0x2), region = 65 }

</bundles_post_ra>
